<compile_context>
chip_gen: v6e
topology: v6e:2x2x1
jax: 0.10.0
libtpu: 0.0.40
codegen_flags: <defaults>
</compile_context>

<pallas_src>
import functools
import math

import jax
import jax.numpy as jnp
from jax.experimental import pallas as pl
from jax.experimental.pallas import tpu as pltpu


def _sasrec_kernel(num_layers, d_real, x_ref, pn_ref, vecs_ref, mats_ref,
                   out_ref):
    TB, L, D = x_ref.shape          # D = lane-padded hidden (multiple of 128)
    N = TB * L
    NL = num_layers
    cdt = mats_ref.dtype            # MXU compute dtype (bfloat16)
    inv_d = 1.0 / d_real            # layer-norm stats over the REAL hidden dim
    eps = 1e-5

    x = x_ref[...].reshape(N, D)    # (TB*L, D) f32 residual-stream slab

    def vrow(kind, l):              # (1, D) f32 per-layer vector parameter
        return vecs_ref[pl.ds(kind * NL + l, 1), :]

    def mm(a_c, w):                 # operands already in cdt; f32 accumulation
        return jnp.dot(a_c, w, preferred_element_type=jnp.float32)

    def layer_norm(v, g, b):
        # Single-pass stats (E[x^2] - mu^2).  Padded lanes of v are zero, so
        # the sums equal the real-hidden sums; only the divisor is corrected.
        mu = jnp.sum(v, axis=-1, keepdims=True) * inv_d
        ex2 = jnp.sum(v * v, axis=-1, keepdims=True) * inv_d
        var = ex2 - mu * mu
        return (v - mu) * jax.lax.rsqrt(var + eps) * g + b

    def layer_body(l, x):
        # ---- self-attention block: x = x + SA(norm1(x)) ----
        h_c = layer_norm(x, vrow(0, l), vrow(1, l)).astype(cdt)
        # 1/sqrt(d_real) is folded into wq/bq at pack time.
        q = (mm(h_c, mats_ref[l, 0]) + vrow(2, l)).astype(cdt).reshape(TB, L, D)
        k = (mm(h_c, mats_ref[l, 1]) + vrow(3, l)).astype(cdt).reshape(TB, L, D)
        v = (mm(h_c, mats_ref[l, 2]) + vrow(4, l)).astype(cdt).reshape(TB, L, D)
        scores = jnp.einsum("bqd,bkd->bqk", q, k,
                            preferred_element_type=jnp.float32)
        # Additive causal mask rebuilt from iota compares (cheap VPU work,
        # nothing held live across layers).
        r = jax.lax.broadcasted_iota(jnp.int32, (L, L), 0)
        c = jax.lax.broadcasted_iota(jnp.int32, (L, L), 1)
        scores = scores + jnp.where(r >= c, 0.0, -1e9)[None]
        m = jnp.max(scores, axis=-1, keepdims=True)
        e = jnp.exp(scores - m)
        attn = (e * pl.reciprocal(jnp.sum(e, axis=-1, keepdims=True),
                                  approx=True)).astype(cdt)
        ctx_c = jnp.einsum("bqk,bkd->bqd", attn, v,
                           preferred_element_type=jnp.float32
                           ).reshape(N, D).astype(cdt)
        x = x + mm(ctx_c, mats_ref[l, 3]) + vrow(5, l)   # dropout=identity (eval)

        # ---- feed-forward block: x = x + FF(norm2(x)) ----
        h2_c = layer_norm(x, vrow(6, l), vrow(7, l)).astype(cdt)
        ff_c = jnp.maximum(mm(h2_c, mats_ref[l, 4]) + vrow(8, l), 0.0).astype(cdt)
        x = x + mm(ff_c, mats_ref[l, 5]) + vrow(9, l)
        return x

    if NL <= 4:
        for l in range(NL):          # shallow: unrolled (LLO scheduler visibility)
            x = layer_body(l, x)
    else:
        # Deep models: real loop + dynamic layer indexing bounds vreg live ranges.
        x = jax.lax.fori_loop(0, NL, layer_body, x)

    # Final encoder norm (TransformerEncoder(norm=self.norm)).
    out = layer_norm(x, vecs_ref[10 * NL:10 * NL + 1, :],
                     vecs_ref[10 * NL + 1:10 * NL + 2, :])

    # Merged pos/neg logits -> single lane-dense (1, 2, TB*L) store.
    pn = pn_ref[...].astype(jnp.float32).reshape(2, N, D)
    out_ref[0] = jnp.sum(out[None, :, :] * pn, axis=-1)


def pack_params(ln1_g, ln1_b, wq, bq, wk, bk, wv, bv, wo, bo,
                ln2_g, ln2_b, w1, b1, w2, b2, fn_g, fn_b,
                *, hidden_pad=None, matmul_dtype=jnp.bfloat16):
    """Consolidate parameters into two kernel inputs, fold the 1/sqrt(D)
    attention scale into wq/bq, and zero-pad the hidden dim to `hidden_pad`
    (a multiple of 128) so every vreg lane / MXU column is used.

    NOTE: dim_feedforward == hidden_units (as in the reference module), so
    w1/w2 are (NL, D, D)."""
    NL, D = ln1_g.shape
    Dp = hidden_pad if hidden_pad is not None else D
    assert Dp >= D
    scale = 1.0 / math.sqrt(D)
    wq = wq * scale
    bq = bq * scale                      # bias must be scaled with the weight

    def pv(v):                           # (R, D) -> (R, Dp) zero pad
        return jnp.pad(v, ((0, 0), (0, Dp - D)))

    def pm(m):                           # (NL, D, D) -> (NL, Dp, Dp) zero pad
        return jnp.pad(m, ((0, 0), (0, Dp - D), (0, Dp - D)))

    vecs = jnp.concatenate(
        [pv(a) for a in (ln1_g, ln1_b, bq, bk, bv, bo, ln2_g, ln2_b, b1, b2,
                         fn_g.reshape(1, -1), fn_b.reshape(1, -1))],
        axis=0).astype(jnp.float32)
    mats = jnp.stack([pm(a) for a in (wq, wk, wv, wo, w1, w2)],
                     axis=1).astype(matmul_dtype)
    return vecs, mats


def _vmem_budget():
    """Generation-aware (VMEM limit, batch-tile row budget)."""
    cap = 64 * 1024 * 1024
    try:
        cap = int(getattr(pltpu.get_tpu_info(), "vmem_capacity_bytes", cap))
    except Exception:
        pass
    if cap >= 100 * 1024 * 1024:          # v5e / v6e: 128 MiB physical VMEM
        return 80 * 1024 * 1024, 4096
    return 40 * 1024 * 1024, 1536         # v7x: 64 MiB physical VMEM


def _pick_batch_tile(batch, seq_len, max_rows):
    """Largest TB dividing `batch` with TB*seq_len <= max_rows, preferring an
    even grid >= 2 (keeps both v7x TensorCores busy under 'parallel')."""
    cands = [d for d in range(1, batch + 1)
             if batch % d == 0 and d * seq_len <= max_rows]
    if not cands:
        return 1
    even = [d for d in cands if (batch // d) >= 2 and (batch // d) % 2 == 0]
    multi = [d for d in cands if (batch // d) >= 2]
    pool = even or multi or cands
    return max(pool)


def sasrec_forward_pallas(x_emb, pos_e, neg_e, vecs, mats, *, num_layers,
                          hidden_real, batch_tile=None):
    """x_emb/pos_e/neg_e: (B, L, Dp) with the hidden axis zero-padded to Dp;
    vecs: (10*NL+2, Dp) f32; mats: (NL, 6, Dp, Dp) bf16."""
    B, L, Dp = x_emb.shape
    vmem_limit, max_rows = _vmem_budget()
    tb = batch_tile if batch_tile is not None else _pick_batch_tile(B, L, max_rows)
    assert B % tb == 0, (B, tb)
    G = B // tb
    N = tb * L

    # pos/neg embeddings only feed the final mul+reduce: ship them as bf16.
    pn = jnp.stack([pos_e, neg_e], axis=0).astype(jnp.bfloat16)   # (2,B,L,Dp)

    kernel = functools.partial(_sasrec_kernel, num_layers, float(hidden_real))
    seq_spec = pl.BlockSpec((tb, L, Dp), lambda b: (b, 0, 0))
    pn_spec = pl.BlockSpec((2, tb, L, Dp), lambda b: (0, b, 0, 0))
    out_spec = pl.BlockSpec((1, 2, N), lambda b: (b, 0, 0))

    def make_call(param_mode):
        extra = {} if param_mode is None else {"pipeline_mode": param_mode}
        vec_spec = pl.BlockSpec(vecs.shape, lambda b: (0, 0), **extra)
        mat_spec = pl.BlockSpec(mats.shape, lambda b: (0, 0, 0, 0), **extra)
        return pl.pallas_call(
            kernel,
            grid=(G,),
            in_specs=[seq_spec, pn_spec, vec_spec, mat_spec],
            out_specs=out_spec,
            out_shape=jax.ShapeDtypeStruct((G, 2, N), jnp.float32),
            compiler_params=pltpu.CompilerParams(
                dimension_semantics=("parallel",),
                vmem_limit_bytes=vmem_limit,
            ),
        )

    try:
        # Constant-index_map parameters only need a single VMEM buffer.
        out = make_call(pl.Buffered(1))(x_emb, pn, vecs, mats)
    except Exception:
        # TODO(synk): drop fallback once pl.Buffered(1) is verified on the
        # deployed jax version.
        out = make_call(None)(x_emb, pn, vecs, mats)

    out = out.reshape(G, 2, tb, L)
    out = jnp.transpose(out, (1, 0, 2, 3)).reshape(2, B, L)
    return out[0], out[1]


def sasrec_forward_ref(x_emb, pos_e, neg_e, params, *, num_layers,
                       matmul_dtype=jnp.float32):
    """Pure-JAX reference on the RAW (unpadded, unfolded) parameters, mirroring
    the PyTorch module (norm_first encoder layer, nhead=1, dim_feedforward=D,
    eval-mode dropout).  matmul_dtype=bf16 mirrors the kernel's MXU precision."""
    (ln1_g, ln1_b, wq, bq, wk, bk, wv, bv, wo, bo,
     ln2_g, ln2_b, w1, b1, w2, b2, fn_g, fn_b) = params
    B, L, D = x_emb.shape
    scale = 1.0 / math.sqrt(D)
    causal = jnp.where(jnp.arange(L)[:, None] >= jnp.arange(L)[None, :],
                       0.0, -1e9)

    def ln(x, g, b, eps=1e-5):
        mu = jnp.mean(x, -1, keepdims=True)
        var = jnp.mean((x - mu) ** 2, -1, keepdims=True)
        return (x - mu) * jax.lax.rsqrt(var + eps) * g + b

    def mm(a, w):
        return jnp.dot(a.astype(matmul_dtype), w.astype(matmul_dtype),
                       preferred_element_type=jnp.float32)

    def one(x, pe, ne):
        for l in range(num_layers):
            h = ln(x, ln1_g[l], ln1_b[l])
            q = mm(h, wq[l]) + bq[l]
            k = mm(h, wk[l]) + bk[l]
            v = mm(h, wv[l]) + bv[l]
            s = mm(q, k.T) * scale + causal
            a = jax.nn.softmax(s, axis=-1)
            x = x + mm(mm(a, v), wo[l]) + bo[l]
            h2 = ln(x, ln2_g[l], ln2_b[l])
            ff = jnp.maximum(mm(h2, w1[l]) + b1[l], 0.0)
            x = x + mm(ff, w2[l]) + b2[l]
        out = ln(x, fn_g.reshape(-1), fn_b.reshape(-1))
        return jnp.sum(out * pe, -1), jnp.sum(out * ne, -1)

    return jax.vmap(one)(x_emb, pos_e, neg_e)


if __name__ == "__main__":
    # Small SASRec config (nhead=1, dim_feedforward=hidden, as in the module).
    num_items, hidden, max_len, num_layers = 50, 32, 16, 2
    B, L = 4, 8                      # grid of 2 steps after batch tiling
    NL, D = num_layers, hidden
    Dp = ((D + 127) // 128) * 128    # lane-pad hidden to a multiple of 128

    key = jax.random.PRNGKey(0)
    ks = jax.random.split(key, 32)

    item_table = jax.random.normal(ks[0], (num_items + 1, hidden), jnp.float32) * 0.02
    item_table = item_table.at[0].set(0.0)          # padding_idx = 0
    pos_table = jax.random.normal(ks[1], (max_len, hidden), jnp.float32) * 0.02

    def w(k, shape, s=0.05):
        return jax.random.normal(k, shape, jnp.float32) * s

    # Transformer weights stacked on the layer axis; projections stored as
    # (in, out) so the kernel computes x @ W.  q/k/v kept as separate matrices.
    ln1_g = 1.0 + 0.1 * jax.random.normal(ks[2], (NL, D), jnp.float32)
    ln1_b = 0.05 * jax.random.normal(ks[3], (NL, D), jnp.float32)
    wq, wk, wv = w(ks[4], (NL, D, D)), w(ks[5], (NL, D, D)), w(ks[6], (NL, D, D))
    bq, bk, bv = w(ks[7], (NL, D)), w(ks[8], (NL, D)), w(ks[9], (NL, D))
    wo, bo = w(ks[10], (NL, D, D)), w(ks[11], (NL, D))
    ln2_g = 1.0 + 0.1 * jax.random.normal(ks[12], (NL, D), jnp.float32)
    ln2_b = 0.05 * jax.random.normal(ks[13], (NL, D), jnp.float32)
    w1, b1 = w(ks[14], (NL, D, D)), w(ks[15], (NL, D))   # dim_feedforward == D
    w2, b2 = w(ks[16], (NL, D, D)), w(ks[17], (NL, D))
    fn_g = 1.0 + 0.1 * jax.random.normal(ks[18], (1, D), jnp.float32)
    fn_b = 0.05 * jax.random.normal(ks[19], (1, D), jnp.float32)

    raw = (ln1_g, ln1_b, wq, bq, wk, bk, wv, bv, wo, bo,
           ln2_g, ln2_b, w1, b1, w2, b2, fn_g, fn_b)
    vecs, mats = pack_params(*raw, hidden_pad=Dp, matmul_dtype=jnp.bfloat16)

    # Inputs: item id sequences.
    input_ids = jax.random.randint(ks[20], (B, L), 1, num_items + 1)
    pos_ids = jax.random.randint(ks[21], (B, L), 1, num_items + 1)
    neg_ids = jax.random.randint(ks[22], (B, L), 1, num_items + 1)

    # Glue (plain JAX): embedding gathers + positional embedding + sqrt(D)
    # scaling.  Tables are zero-padded on the hidden axis so activations keep
    # exact zeros in the padded lanes (kernel layer-norm uses the real D).
    item_p = jnp.pad(item_table, ((0, 0), (0, Dp - D)))
    pos_p = jnp.pad(pos_table, ((0, 0), (0, Dp - D)))
    position_ids = jnp.arange(L)
    x_emb = item_p[input_ids] * math.sqrt(D) + pos_p[position_ids][None]
    pos_e = item_p[pos_ids]
    neg_e = item_p[neg_ids]

    pos_logits, neg_logits = sasrec_forward_pallas(
        x_emb, pos_e, neg_e, vecs, mats, num_layers=num_layers, hidden_real=D)
    jax.block_until_ready((pos_logits, neg_logits))
    assert pos_logits.shape == (B, L) and neg_logits.shape == (B, L)

    # Unpadded reference inputs (original module math).
    x_raw = item_table[input_ids] * math.sqrt(D) + pos_table[position_ids][None]
    pe_raw, ne_raw = item_table[pos_ids], item_table[neg_ids]

    # Check vs a reference with matching bf16-on-MXU mixed precision.
    rp, rn = sasrec_forward_ref(x_raw, pe_raw, ne_raw, raw,
                                num_layers=num_layers, matmul_dtype=jnp.bfloat16)
    assert jnp.allclose(pos_logits, rp, rtol=2e-2, atol=5e-3), (
        float(jnp.max(jnp.abs(pos_logits - rp))))
    assert jnp.allclose(neg_logits, rn, rtol=2e-2, atol=5e-3), (
        float(jnp.max(jnp.abs(neg_logits - rn))))

    # Looser sanity check vs full-f32 math (original PyTorch f32 semantics).
    fp32_p, fp32_n = sasrec_forward_ref(x_raw, pe_raw, ne_raw, raw,
                                        num_layers=num_layers,
                                        matmul_dtype=jnp.float32)
    assert jnp.allclose(pos_logits, fp32_p, rtol=5e-2, atol=1e-2)
    assert jnp.allclose(neg_logits, fp32_n, rtol=5e-2, atol=1e-2)

    print("KERNEL_OK")
</pallas_src>

<mosaic_0001>
module attributes {stable_mosaic.version = 11 : i64} {
  func.func @_sasrec_kernel(%arg0: i32, %arg1: memref<2x8x128xf32, #tpu.memory_space<vmem>>, %arg2: memref<2x2x8x128xbf16, #tpu.memory_space<vmem>>, %arg3: memref<22x128xf32, #tpu.memory_space<vmem>>, %arg4: memref<2x6x128x128xbf16, #tpu.memory_space<vmem>>, %arg5: memref<1x2x16xf32, #tpu.memory_space<vmem>>) attributes {dimension_semantics = [#tpu.dimension_semantics<parallel>], iteration_bounds = array<i64: 2>, scalar_prefetch = 0 : i64, scratch_operands = 0 : i64, tpu.core_type = #tpu.core_type<tc>, window_params = [{transform_indices = @transform_0, window_bounds = array<i64: 2, 8, 128>}, {transform_indices = @transform_1, window_bounds = array<i64: 2, 2, 8, 128>}, {pipeline_mode = #tpu.pipeline_mode<synchronous>, transform_indices = @transform_2, window_bounds = array<i64: 22, 128>}, {pipeline_mode = #tpu.pipeline_mode<synchronous>, transform_indices = @transform_3, window_bounds = array<i64: 2, 6, 128, 128>}, {transform_indices = @transform_4, window_bounds = array<i64: 1, 2, 16>}]} {
    %c0 = arith.constant 0 : index
    %c0_0 = arith.constant 0 : index
    %c0_1 = arith.constant 0 : index
    %0 = vector.load %arg1[%c0, %c0_0, %c0_1] : memref<2x8x128xf32, #tpu.memory_space<vmem>>, vector<2x8x128xf32>
    %1 = vector.shape_cast %0 : vector<2x8x128xf32> to vector<16x128xf32>
    %c0_2 = arith.constant 0 : index
    %c0_3 = arith.constant 0 : index
    %2 = vector.load %arg3[%c0_2, %c0_3] : memref<22x128xf32, #tpu.memory_space<vmem>>, vector<1x128xf32>
    %c2 = arith.constant 2 : index
    %c0_4 = arith.constant 0 : index
    %3 = vector.load %arg3[%c2, %c0_4] : memref<22x128xf32, #tpu.memory_space<vmem>>, vector<1x128xf32>
    %cst = arith.constant dense<0.000000e+00> : vector<16xf32>
    %4 = vector.multi_reduction <add>, %1, %cst [1] : vector<16x128xf32> to vector<16xf32>
    %5 = vector.shape_cast %4 : vector<16xf32> to vector<16x1xf32>
    %cst_5 = arith.constant 3.125000e-02 : f32
    %6 = vector.broadcast %cst_5 : f32 to vector<16x1xf32>
    %7 = arith.mulf %5, %6 : vector<16x1xf32>
    %8 = arith.mulf %1, %1 : vector<16x128xf32>
    %cst_6 = arith.constant dense<0.000000e+00> : vector<16xf32>
    %9 = vector.multi_reduction <add>, %8, %cst_6 [1] : vector<16x128xf32> to vector<16xf32>
    %10 = vector.shape_cast %9 : vector<16xf32> to vector<16x1xf32>
    %cst_7 = arith.constant 3.125000e-02 : f32
    %11 = vector.broadcast %cst_7 : f32 to vector<16x1xf32>
    %12 = arith.mulf %10, %11 : vector<16x1xf32>
    %13 = arith.mulf %7, %7 : vector<16x1xf32>
    %14 = arith.subf %12, %13 : vector<16x1xf32>
    %15 = vector.broadcast %7 : vector<16x1xf32> to vector<16x128xf32>
    %16 = arith.subf %1, %15 : vector<16x128xf32>
    %cst_8 = arith.constant 9.99999974E-6 : f32
    %17 = vector.broadcast %cst_8 : f32 to vector<16x1xf32>
    %18 = arith.addf %14, %17 : vector<16x1xf32>
    %19 = math.rsqrt %18 : vector<16x1xf32>
    %20 = vector.broadcast %19 : vector<16x1xf32> to vector<16x128xf32>
    %21 = arith.mulf %16, %20 : vector<16x128xf32>
    %22 = vector.broadcast %2 : vector<1x128xf32> to vector<16x128xf32>
    %23 = arith.mulf %21, %22 : vector<16x128xf32>
    %24 = vector.broadcast %3 : vector<1x128xf32> to vector<16x128xf32>
    %25 = arith.addf %23, %24 : vector<16x128xf32>
    %26 = arith.truncf %25 : vector<16x128xf32> to vector<16x128xbf16>
    %c0_9 = arith.constant 0 : index
    %c0_10 = arith.constant 0 : index
    %c0_11 = arith.constant 0 : index
    %c0_12 = arith.constant 0 : index
    %27 = vector.load %arg4[%c0_9, %c0_10, %c0_11, %c0_12] : memref<2x6x128x128xbf16, #tpu.memory_space<vmem>>, vector<1x1x128x128xbf16>
    %28 = vector.shape_cast %27 : vector<1x1x128x128xbf16> to vector<128x128xbf16>
    %cst_13 = arith.constant dense<0.000000e+00> : vector<16x128xf32>
    %29 = tpu.matmul %26, %28, %cst_13 {dimension_numbers = #tpu.dot_dimension_numbers<[1], [0], [0], [1], [0, 0, 1, 1], [], []>} : vector<16x128xbf16>, vector<128x128xbf16>, vector<16x128xf32> -> vector<16x128xf32>
    %c4 = arith.constant 4 : index
    %c0_14 = arith.constant 0 : index
    %30 = vector.load %arg3[%c4, %c0_14] : memref<22x128xf32, #tpu.memory_space<vmem>>, vector<1x128xf32>
    %31 = vector.broadcast %30 : vector<1x128xf32> to vector<16x128xf32>
    %32 = arith.addf %29, %31 : vector<16x128xf32>
    %33 = arith.truncf %32 : vector<16x128xf32> to vector<16x128xbf16>
    %34 = vector.shape_cast %33 : vector<16x128xbf16> to vector<2x8x128xbf16>
    %c0_15 = arith.constant 0 : index
    %c1 = arith.constant 1 : index
    %c0_16 = arith.constant 0 : index
    %c0_17 = arith.constant 0 : index
    %35 = vector.load %arg4[%c0_15, %c1, %c0_16, %c0_17] : memref<2x6x128x128xbf16, #tpu.memory_space<vmem>>, vector<1x1x128x128xbf16>
    %36 = vector.shape_cast %35 : vector<1x1x128x128xbf16> to vector<128x128xbf16>
    %cst_18 = arith.constant dense<0.000000e+00> : vector<16x128xf32>
    %37 = tpu.matmul %26, %36, %cst_18 {dimension_numbers = #tpu.dot_dimension_numbers<[1], [0], [0], [1], [0, 0, 1, 1], [], []>} : vector<16x128xbf16>, vector<128x128xbf16>, vector<16x128xf32> -> vector<16x128xf32>
    %c6 = arith.constant 6 : index
    %c0_19 = arith.constant 0 : index
    %38 = vector.load %arg3[%c6, %c0_19] : memref<22x128xf32, #tpu.memory_space<vmem>>, vector<1x128xf32>
    %39 = vector.broadcast %38 : vector<1x128xf32> to vector<16x128xf32>
    %40 = arith.addf %37, %39 : vector<16x128xf32>
    %41 = arith.truncf %40 : vector<16x128xf32> to vector<16x128xbf16>
    %42 = vector.shape_cast %41 : vector<16x128xbf16> to vector<2x8x128xbf16>
    %c0_20 = arith.constant 0 : index
    %c2_21 = arith.constant 2 : index
    %c0_22 = arith.constant 0 : index
    %c0_23 = arith.constant 0 : index
    %43 = vector.load %arg4[%c0_20, %c2_21, %c0_22, %c0_23] : memref<2x6x128x128xbf16, #tpu.memory_space<vmem>>, vector<1x1x128x128xbf16>
    %44 = vector.shape_cast %43 : vector<1x1x128x128xbf16> to vector<128x128xbf16>
    %cst_24 = arith.constant dense<0.000000e+00> : vector<16x128xf32>
    %45 = tpu.matmul %26, %44, %cst_24 {dimension_numbers = #tpu.dot_dimension_numbers<[1], [0], [0], [1], [0, 0, 1, 1], [], []>} : vector<16x128xbf16>, vector<128x128xbf16>, vector<16x128xf32> -> vector<16x128xf32>
    %c8 = arith.constant 8 : index
    %c0_25 = arith.constant 0 : index
    %46 = vector.load %arg3[%c8, %c0_25] : memref<22x128xf32, #tpu.memory_space<vmem>>, vector<1x128xf32>
    %47 = vector.broadcast %46 : vector<1x128xf32> to vector<16x128xf32>
    %48 = arith.addf %45, %47 : vector<16x128xf32>
    %49 = arith.truncf %48 : vector<16x128xf32> to vector<16x128xbf16>
    %50 = vector.shape_cast %49 : vector<16x128xbf16> to vector<2x8x128xbf16>
    "tpu.trace_start"() <{level = 10 : i32, message = "bqd,bkd->bqk"}> : () -> ()
    %cst_26 = arith.constant dense<0.000000e+00> : vector<2x8x8xf32>
    %51 = tpu.matmul %34, %42, %cst_26 {dimension_numbers = #tpu.dot_dimension_numbers<[2], [2], [1], [1], [0, 0, 0, 1, 1, 1], [0], [0]>} : vector<2x8x128xbf16>, vector<2x8x128xbf16>, vector<2x8x8xf32> -> vector<2x8x8xf32>
    "tpu.trace_stop"() : () -> ()
    %52 = tpu.iota {dimensions = array<i32: 0>} : vector<8x8xi32>
    %53 = tpu.iota {dimensions = array<i32: 1>} : vector<8x8xi32>
    %54 = arith.cmpi sge, %52, %53 : vector<8x8xi32>
    %cst_27 = arith.constant 0.000000e+00 : f32
    %cst_28 = arith.constant -1.000000e+09 : f32
    %55 = vector.broadcast %cst_27 : f32 to vector<8x8xf32>
    %56 = vector.broadcast %cst_28 : f32 to vector<8x8xf32>
    %57 = arith.select %54, %55, %56 : vector<8x8xi1>, vector<8x8xf32>
    %58 = vector.shape_cast %57 : vector<8x8xf32> to vector<1x8x8xf32>
    %59 = vector.broadcast %58 : vector<1x8x8xf32> to vector<2x8x8xf32>
    %60 = arith.addf %51, %59 : vector<2x8x8xf32>
    %cst_29 = arith.constant dense<0xFF800000> : vector<2x8xf32>
    %61 = vector.multi_reduction <maximumf>, %60, %cst_29 [2] : vector<2x8x8xf32> to vector<2x8xf32>
    %62 = vector.shape_cast %61 : vector<2x8xf32> to vector<2x8x1xf32>
    %63 = vector.broadcast %62 : vector<2x8x1xf32> to vector<2x8x8xf32>
    %64 = arith.subf %60, %63 : vector<2x8x8xf32>
    %65 = math.exp %64 : vector<2x8x8xf32>
    %cst_30 = arith.constant dense<0.000000e+00> : vector<2x8xf32>
    %66 = vector.multi_reduction <add>, %65, %cst_30 [2] : vector<2x8x8xf32> to vector<2x8xf32>
    %67 = vector.shape_cast %66 : vector<2x8xf32> to vector<2x8x1xf32>
    %68 = tpu.reciprocal %67 {approx = true} : vector<2x8x1xf32> -> vector<2x8x1xf32>
    %69 = vector.broadcast %68 : vector<2x8x1xf32> to vector<2x8x8xf32>
    %70 = arith.mulf %65, %69 : vector<2x8x8xf32>
    %71 = arith.truncf %70 : vector<2x8x8xf32> to vector<2x8x8xbf16>
    "tpu.trace_start"() <{level = 10 : i32, message = "bqk,bkd->bqd"}> : () -> ()
    %cst_31 = arith.constant dense<0.000000e+00> : vector<2x8x128xf32>
    %72 = tpu.matmul %71, %50, %cst_31 {dimension_numbers = #tpu.dot_dimension_numbers<[2], [1], [1], [2], [0, 0, 0, 1, 1, 2], [0], [0]>} : vector<2x8x8xbf16>, vector<2x8x128xbf16>, vector<2x8x128xf32> -> vector<2x8x128xf32>
    "tpu.trace_stop"() : () -> ()
    %73 = vector.shape_cast %72 : vector<2x8x128xf32> to vector<16x128xf32>
    %74 = arith.truncf %73 : vector<16x128xf32> to vector<16x128xbf16>
    %c0_32 = arith.constant 0 : index
    %c3 = arith.constant 3 : index
    %c0_33 = arith.constant 0 : index
    %c0_34 = arith.constant 0 : index
    %75 = vector.load %arg4[%c0_32, %c3, %c0_33, %c0_34] : memref<2x6x128x128xbf16, #tpu.memory_space<vmem>>, vector<1x1x128x128xbf16>
    %76 = vector.shape_cast %75 : vector<1x1x128x128xbf16> to vector<128x128xbf16>
    %cst_35 = arith.constant dense<0.000000e+00> : vector<16x128xf32>
    %77 = tpu.matmul %74, %76, %cst_35 {dimension_numbers = #tpu.dot_dimension_numbers<[1], [0], [0], [1], [0, 0, 1, 1], [], []>} : vector<16x128xbf16>, vector<128x128xbf16>, vector<16x128xf32> -> vector<16x128xf32>
    %78 = arith.addf %1, %77 : vector<16x128xf32>
    %c10 = arith.constant 10 : index
    %c0_36 = arith.constant 0 : index
    %79 = vector.load %arg3[%c10, %c0_36] : memref<22x128xf32, #tpu.memory_space<vmem>>, vector<1x128xf32>
    %80 = vector.broadcast %79 : vector<1x128xf32> to vector<16x128xf32>
    %81 = arith.addf %78, %80 : vector<16x128xf32>
    %c12 = arith.constant 12 : index
    %c0_37 = arith.constant 0 : index
    %82 = vector.load %arg3[%c12, %c0_37] : memref<22x128xf32, #tpu.memory_space<vmem>>, vector<1x128xf32>
    %c14 = arith.constant 14 : index
    %c0_38 = arith.constant 0 : index
    %83 = vector.load %arg3[%c14, %c0_38] : memref<22x128xf32, #tpu.memory_space<vmem>>, vector<1x128xf32>
    %cst_39 = arith.constant dense<0.000000e+00> : vector<16xf32>
    %84 = vector.multi_reduction <add>, %81, %cst_39 [1] : vector<16x128xf32> to vector<16xf32>
    %85 = vector.shape_cast %84 : vector<16xf32> to vector<16x1xf32>
    %cst_40 = arith.constant 3.125000e-02 : f32
    %86 = vector.broadcast %cst_40 : f32 to vector<16x1xf32>
    %87 = arith.mulf %85, %86 : vector<16x1xf32>
    %88 = arith.mulf %81, %81 : vector<16x128xf32>
    %cst_41 = arith.constant dense<0.000000e+00> : vector<16xf32>
    %89 = vector.multi_reduction <add>, %88, %cst_41 [1] : vector<16x128xf32> to vector<16xf32>
    %90 = vector.shape_cast %89 : vector<16xf32> to vector<16x1xf32>
    %cst_42 = arith.constant 3.125000e-02 : f32
    %91 = vector.broadcast %cst_42 : f32 to vector<16x1xf32>
    %92 = arith.mulf %90, %91 : vector<16x1xf32>
    %93 = arith.mulf %87, %87 : vector<16x1xf32>
    %94 = arith.subf %92, %93 : vector<16x1xf32>
    %95 = vector.broadcast %87 : vector<16x1xf32> to vector<16x128xf32>
    %96 = arith.subf %81, %95 : vector<16x128xf32>
    %cst_43 = arith.constant 9.99999974E-6 : f32
    %97 = vector.broadcast %cst_43 : f32 to vector<16x1xf32>
    %98 = arith.addf %94, %97 : vector<16x1xf32>
    %99 = math.rsqrt %98 : vector<16x1xf32>
    %100 = vector.broadcast %99 : vector<16x1xf32> to vector<16x128xf32>
    %101 = arith.mulf %96, %100 : vector<16x128xf32>
    %102 = vector.broadcast %82 : vector<1x128xf32> to vector<16x128xf32>
    %103 = arith.mulf %101, %102 : vector<16x128xf32>
    %104 = vector.broadcast %83 : vector<1x128xf32> to vector<16x128xf32>
    %105 = arith.addf %103, %104 : vector<16x128xf32>
    %106 = arith.truncf %105 : vector<16x128xf32> to vector<16x128xbf16>
    %c0_44 = arith.constant 0 : index
    %c4_45 = arith.constant 4 : index
    %c0_46 = arith.constant 0 : index
    %c0_47 = arith.constant 0 : index
    %107 = vector.load %arg4[%c0_44, %c4_45, %c0_46, %c0_47] : memref<2x6x128x128xbf16, #tpu.memory_space<vmem>>, vector<1x1x128x128xbf16>
    %108 = vector.shape_cast %107 : vector<1x1x128x128xbf16> to vector<128x128xbf16>
    %cst_48 = arith.constant dense<0.000000e+00> : vector<16x128xf32>
    %109 = tpu.matmul %106, %108, %cst_48 {dimension_numbers = #tpu.dot_dimension_numbers<[1], [0], [0], [1], [0, 0, 1, 1], [], []>} : vector<16x128xbf16>, vector<128x128xbf16>, vector<16x128xf32> -> vector<16x128xf32>
    %c16 = arith.constant 16 : index
    %c0_49 = arith.constant 0 : index
    %110 = vector.load %arg3[%c16, %c0_49] : memref<22x128xf32, #tpu.memory_space<vmem>>, vector<1x128xf32>
    %111 = vector.broadcast %110 : vector<1x128xf32> to vector<16x128xf32>
    %112 = arith.addf %109, %111 : vector<16x128xf32>
    %cst_50 = arith.constant 0.000000e+00 : f32
    %113 = vector.broadcast %cst_50 : f32 to vector<16x128xf32>
    %114 = arith.maximumf %112, %113 : vector<16x128xf32>
    %115 = arith.truncf %114 : vector<16x128xf32> to vector<16x128xbf16>
    %c0_51 = arith.constant 0 : index
    %c5 = arith.constant 5 : index
    %c0_52 = arith.constant 0 : index
    %c0_53 = arith.constant 0 : index
    %116 = vector.load %arg4[%c0_51, %c5, %c0_52, %c0_53] : memref<2x6x128x128xbf16, #tpu.memory_space<vmem>>, vector<1x1x128x128xbf16>
    %117 = vector.shape_cast %116 : vector<1x1x128x128xbf16> to vector<128x128xbf16>
    %cst_54 = arith.constant dense<0.000000e+00> : vector<16x128xf32>
    %118 = tpu.matmul %115, %117, %cst_54 {dimension_numbers = #tpu.dot_dimension_numbers<[1], [0], [0], [1], [0, 0, 1, 1], [], []>} : vector<16x128xbf16>, vector<128x128xbf16>, vector<16x128xf32> -> vector<16x128xf32>
    %119 = arith.addf %81, %118 : vector<16x128xf32>
    %c18 = arith.constant 18 : index
    %c0_55 = arith.constant 0 : index
    %120 = vector.load %arg3[%c18, %c0_55] : memref<22x128xf32, #tpu.memory_space<vmem>>, vector<1x128xf32>
    %121 = vector.broadcast %120 : vector<1x128xf32> to vector<16x128xf32>
    %122 = arith.addf %119, %121 : vector<16x128xf32>
    %c1_56 = arith.constant 1 : index
    %c0_57 = arith.constant 0 : index
    %123 = vector.load %arg3[%c1_56, %c0_57] : memref<22x128xf32, #tpu.memory_space<vmem>>, vector<1x128xf32>
    %c3_58 = arith.constant 3 : index
    %c0_59 = arith.constant 0 : index
    %124 = vector.load %arg3[%c3_58, %c0_59] : memref<22x128xf32, #tpu.memory_space<vmem>>, vector<1x128xf32>
    %cst_60 = arith.constant dense<0.000000e+00> : vector<16xf32>
    %125 = vector.multi_reduction <add>, %122, %cst_60 [1] : vector<16x128xf32> to vector<16xf32>
    %126 = vector.shape_cast %125 : vector<16xf32> to vector<16x1xf32>
    %cst_61 = arith.constant 3.125000e-02 : f32
    %127 = vector.broadcast %cst_61 : f32 to vector<16x1xf32>
    %128 = arith.mulf %126, %127 : vector<16x1xf32>
    %129 = arith.mulf %122, %122 : vector<16x128xf32>
    %cst_62 = arith.constant dense<0.000000e+00> : vector<16xf32>
    %130 = vector.multi_reduction <add>, %129, %cst_62 [1] : vector<16x128xf32> to vector<16xf32>
    %131 = vector.shape_cast %130 : vector<16xf32> to vector<16x1xf32>
    %cst_63 = arith.constant 3.125000e-02 : f32
    %132 = vector.broadcast %cst_63 : f32 to vector<16x1xf32>
    %133 = arith.mulf %131, %132 : vector<16x1xf32>
    %134 = arith.mulf %128, %128 : vector<16x1xf32>
    %135 = arith.subf %133, %134 : vector<16x1xf32>
    %136 = vector.broadcast %128 : vector<16x1xf32> to vector<16x128xf32>
    %137 = arith.subf %122, %136 : vector<16x128xf32>
    %cst_64 = arith.constant 9.99999974E-6 : f32
    %138 = vector.broadcast %cst_64 : f32 to vector<16x1xf32>
    %139 = arith.addf %135, %138 : vector<16x1xf32>
    %140 = math.rsqrt %139 : vector<16x1xf32>
    %141 = vector.broadcast %140 : vector<16x1xf32> to vector<16x128xf32>
    %142 = arith.mulf %137, %141 : vector<16x128xf32>
    %143 = vector.broadcast %123 : vector<1x128xf32> to vector<16x128xf32>
    %144 = arith.mulf %142, %143 : vector<16x128xf32>
    %145 = vector.broadcast %124 : vector<1x128xf32> to vector<16x128xf32>
    %146 = arith.addf %144, %145 : vector<16x128xf32>
    %147 = arith.truncf %146 : vector<16x128xf32> to vector<16x128xbf16>
    %c1_65 = arith.constant 1 : index
    %c0_66 = arith.constant 0 : index
    %c0_67 = arith.constant 0 : index
    %c0_68 = arith.constant 0 : index
    %148 = vector.load %arg4[%c1_65, %c0_66, %c0_67, %c0_68] : memref<2x6x128x128xbf16, #tpu.memory_space<vmem>>, vector<1x1x128x128xbf16>
    %149 = vector.shape_cast %148 : vector<1x1x128x128xbf16> to vector<128x128xbf16>
    %cst_69 = arith.constant dense<0.000000e+00> : vector<16x128xf32>
    %150 = tpu.matmul %147, %149, %cst_69 {dimension_numbers = #tpu.dot_dimension_numbers<[1], [0], [0], [1], [0, 0, 1, 1], [], []>} : vector<16x128xbf16>, vector<128x128xbf16>, vector<16x128xf32> -> vector<16x128xf32>
    %c5_70 = arith.constant 5 : index
    %c0_71 = arith.constant 0 : index
    %151 = vector.load %arg3[%c5_70, %c0_71] : memref<22x128xf32, #tpu.memory_space<vmem>>, vector<1x128xf32>
    %152 = vector.broadcast %151 : vector<1x128xf32> to vector<16x128xf32>
    %153 = arith.addf %150, %152 : vector<16x128xf32>
    %154 = arith.truncf %153 : vector<16x128xf32> to vector<16x128xbf16>
    %155 = vector.shape_cast %154 : vector<16x128xbf16> to vector<2x8x128xbf16>
    %c1_72 = arith.constant 1 : index
    %c1_73 = arith.constant 1 : index
    %c0_74 = arith.constant 0 : index
    %c0_75 = arith.constant 0 : index
    %156 = vector.load %arg4[%c1_72, %c1_73, %c0_74, %c0_75] : memref<2x6x128x128xbf16, #tpu.memory_space<vmem>>, vector<1x1x128x128xbf16>
    %157 = vector.shape_cast %156 : vector<1x1x128x128xbf16> to vector<128x128xbf16>
    %cst_76 = arith.constant dense<0.000000e+00> : vector<16x128xf32>
    %158 = tpu.matmul %147, %157, %cst_76 {dimension_numbers = #tpu.dot_dimension_numbers<[1], [0], [0], [1], [0, 0, 1, 1], [], []>} : vector<16x128xbf16>, vector<128x128xbf16>, vector<16x128xf32> -> vector<16x128xf32>
    %c7 = arith.constant 7 : index
    %c0_77 = arith.constant 0 : index
    %159 = vector.load %arg3[%c7, %c0_77] : memref<22x128xf32, #tpu.memory_space<vmem>>, vector<1x128xf32>
    %160 = vector.broadcast %159 : vector<1x128xf32> to vector<16x128xf32>
    %161 = arith.addf %158, %160 : vector<16x128xf32>
    %162 = arith.truncf %161 : vector<16x128xf32> to vector<16x128xbf16>
    %163 = vector.shape_cast %162 : vector<16x128xbf16> to vector<2x8x128xbf16>
    %c1_78 = arith.constant 1 : index
    %c2_79 = arith.constant 2 : index
    %c0_80 = arith.constant 0 : index
    %c0_81 = arith.constant 0 : index
    %164 = vector.load %arg4[%c1_78, %c2_79, %c0_80, %c0_81] : memref<2x6x128x128xbf16, #tpu.memory_space<vmem>>, vector<1x1x128x128xbf16>
    %165 = vector.shape_cast %164 : vector<1x1x128x128xbf16> to vector<128x128xbf16>
    %cst_82 = arith.constant dense<0.000000e+00> : vector<16x128xf32>
    %166 = tpu.matmul %147, %165, %cst_82 {dimension_numbers = #tpu.dot_dimension_numbers<[1], [0], [0], [1], [0, 0, 1, 1], [], []>} : vector<16x128xbf16>, vector<128x128xbf16>, vector<16x128xf32> -> vector<16x128xf32>
    %c9 = arith.constant 9 : index
    %c0_83 = arith.constant 0 : index
    %167 = vector.load %arg3[%c9, %c0_83] : memref<22x128xf32, #tpu.memory_space<vmem>>, vector<1x128xf32>
    %168 = vector.broadcast %167 : vector<1x128xf32> to vector<16x128xf32>
    %169 = arith.addf %166, %168 : vector<16x128xf32>
    %170 = arith.truncf %169 : vector<16x128xf32> to vector<16x128xbf16>
    %171 = vector.shape_cast %170 : vector<16x128xbf16> to vector<2x8x128xbf16>
    "tpu.trace_start"() <{level = 10 : i32, message = "bqd,bkd->bqk"}> : () -> ()
    %cst_84 = arith.constant dense<0.000000e+00> : vector<2x8x8xf32>
    %172 = tpu.matmul %155, %163, %cst_84 {dimension_numbers = #tpu.dot_dimension_numbers<[2], [2], [1], [1], [0, 0, 0, 1, 1, 1], [0], [0]>} : vector<2x8x128xbf16>, vector<2x8x128xbf16>, vector<2x8x8xf32> -> vector<2x8x8xf32>
    "tpu.trace_stop"() : () -> ()
    %173 = tpu.iota {dimensions = array<i32: 0>} : vector<8x8xi32>
    %174 = tpu.iota {dimensions = array<i32: 1>} : vector<8x8xi32>
    %175 = arith.cmpi sge, %173, %174 : vector<8x8xi32>
    %cst_85 = arith.constant 0.000000e+00 : f32
    %cst_86 = arith.constant -1.000000e+09 : f32
    %176 = vector.broadcast %cst_85 : f32 to vector<8x8xf32>
    %177 = vector.broadcast %cst_86 : f32 to vector<8x8xf32>
    %178 = arith.select %175, %176, %177 : vector<8x8xi1>, vector<8x8xf32>
    %179 = vector.shape_cast %178 : vector<8x8xf32> to vector<1x8x8xf32>
    %180 = vector.broadcast %179 : vector<1x8x8xf32> to vector<2x8x8xf32>
    %181 = arith.addf %172, %180 : vector<2x8x8xf32>
    %cst_87 = arith.constant dense<0xFF800000> : vector<2x8xf32>
    %182 = vector.multi_reduction <maximumf>, %181, %cst_87 [2] : vector<2x8x8xf32> to vector<2x8xf32>
    %183 = vector.shape_cast %182 : vector<2x8xf32> to vector<2x8x1xf32>
    %184 = vector.broadcast %183 : vector<2x8x1xf32> to vector<2x8x8xf32>
    %185 = arith.subf %181, %184 : vector<2x8x8xf32>
    %186 = math.exp %185 : vector<2x8x8xf32>
    %cst_88 = arith.constant dense<0.000000e+00> : vector<2x8xf32>
    %187 = vector.multi_reduction <add>, %186, %cst_88 [2] : vector<2x8x8xf32> to vector<2x8xf32>
    %188 = vector.shape_cast %187 : vector<2x8xf32> to vector<2x8x1xf32>
    %189 = tpu.reciprocal %188 {approx = true} : vector<2x8x1xf32> -> vector<2x8x1xf32>
    %190 = vector.broadcast %189 : vector<2x8x1xf32> to vector<2x8x8xf32>
    %191 = arith.mulf %186, %190 : vector<2x8x8xf32>
    %192 = arith.truncf %191 : vector<2x8x8xf32> to vector<2x8x8xbf16>
    "tpu.trace_start"() <{level = 10 : i32, message = "bqk,bkd->bqd"}> : () -> ()
    %cst_89 = arith.constant dense<0.000000e+00> : vector<2x8x128xf32>
    %193 = tpu.matmul %192, %171, %cst_89 {dimension_numbers = #tpu.dot_dimension_numbers<[2], [1], [1], [2], [0, 0, 0, 1, 1, 2], [0], [0]>} : vector<2x8x8xbf16>, vector<2x8x128xbf16>, vector<2x8x128xf32> -> vector<2x8x128xf32>
    "tpu.trace_stop"() : () -> ()
    %194 = vector.shape_cast %193 : vector<2x8x128xf32> to vector<16x128xf32>
    %195 = arith.truncf %194 : vector<16x128xf32> to vector<16x128xbf16>
    %c1_90 = arith.constant 1 : index
    %c3_91 = arith.constant 3 : index
    %c0_92 = arith.constant 0 : index
    %c0_93 = arith.constant 0 : index
    %196 = vector.load %arg4[%c1_90, %c3_91, %c0_92, %c0_93] : memref<2x6x128x128xbf16, #tpu.memory_space<vmem>>, vector<1x1x128x128xbf16>
    %197 = vector.shape_cast %196 : vector<1x1x128x128xbf16> to vector<128x128xbf16>
    %cst_94 = arith.constant dense<0.000000e+00> : vector<16x128xf32>
    %198 = tpu.matmul %195, %197, %cst_94 {dimension_numbers = #tpu.dot_dimension_numbers<[1], [0], [0], [1], [0, 0, 1, 1], [], []>} : vector<16x128xbf16>, vector<128x128xbf16>, vector<16x128xf32> -> vector<16x128xf32>
    %199 = arith.addf %122, %198 : vector<16x128xf32>
    %c11 = arith.constant 11 : index
    %c0_95 = arith.constant 0 : index
    %200 = vector.load %arg3[%c11, %c0_95] : memref<22x128xf32, #tpu.memory_space<vmem>>, vector<1x128xf32>
    %201 = vector.broadcast %200 : vector<1x128xf32> to vector<16x128xf32>
    %202 = arith.addf %199, %201 : vector<16x128xf32>
    %c13 = arith.constant 13 : index
    %c0_96 = arith.constant 0 : index
    %203 = vector.load %arg3[%c13, %c0_96] : memref<22x128xf32, #tpu.memory_space<vmem>>, vector<1x128xf32>
    %c15 = arith.constant 15 : index
    %c0_97 = arith.constant 0 : index
    %204 = vector.load %arg3[%c15, %c0_97] : memref<22x128xf32, #tpu.memory_space<vmem>>, vector<1x128xf32>
    %cst_98 = arith.constant dense<0.000000e+00> : vector<16xf32>
    %205 = vector.multi_reduction <add>, %202, %cst_98 [1] : vector<16x128xf32> to vector<16xf32>
    %206 = vector.shape_cast %205 : vector<16xf32> to vector<16x1xf32>
    %cst_99 = arith.constant 3.125000e-02 : f32
    %207 = vector.broadcast %cst_99 : f32 to vector<16x1xf32>
    %208 = arith.mulf %206, %207 : vector<16x1xf32>
    %209 = arith.mulf %202, %202 : vector<16x128xf32>
    %cst_100 = arith.constant dense<0.000000e+00> : vector<16xf32>
    %210 = vector.multi_reduction <add>, %209, %cst_100 [1] : vector<16x128xf32> to vector<16xf32>
    %211 = vector.shape_cast %210 : vector<16xf32> to vector<16x1xf32>
    %cst_101 = arith.constant 3.125000e-02 : f32
    %212 = vector.broadcast %cst_101 : f32 to vector<16x1xf32>
    %213 = arith.mulf %211, %212 : vector<16x1xf32>
    %214 = arith.mulf %208, %208 : vector<16x1xf32>
    %215 = arith.subf %213, %214 : vector<16x1xf32>
    %216 = vector.broadcast %208 : vector<16x1xf32> to vector<16x128xf32>
    %217 = arith.subf %202, %216 : vector<16x128xf32>
    %cst_102 = arith.constant 9.99999974E-6 : f32
    %218 = vector.broadcast %cst_102 : f32 to vector<16x1xf32>
    %219 = arith.addf %215, %218 : vector<16x1xf32>
    %220 = math.rsqrt %219 : vector<16x1xf32>
    %221 = vector.broadcast %220 : vector<16x1xf32> to vector<16x128xf32>
    %222 = arith.mulf %217, %221 : vector<16x128xf32>
    %223 = vector.broadcast %203 : vector<1x128xf32> to vector<16x128xf32>
    %224 = arith.mulf %222, %223 : vector<16x128xf32>
    %225 = vector.broadcast %204 : vector<1x128xf32> to vector<16x128xf32>
    %226 = arith.addf %224, %225 : vector<16x128xf32>
    %227 = arith.truncf %226 : vector<16x128xf32> to vector<16x128xbf16>
    %c1_103 = arith.constant 1 : index
    %c4_104 = arith.constant 4 : index
    %c0_105 = arith.constant 0 : index
    %c0_106 = arith.constant 0 : index
    %228 = vector.load %arg4[%c1_103, %c4_104, %c0_105, %c0_106] : memref<2x6x128x128xbf16, #tpu.memory_space<vmem>>, vector<1x1x128x128xbf16>
    %229 = vector.shape_cast %228 : vector<1x1x128x128xbf16> to vector<128x128xbf16>
    %cst_107 = arith.constant dense<0.000000e+00> : vector<16x128xf32>
    %230 = tpu.matmul %227, %229, %cst_107 {dimension_numbers = #tpu.dot_dimension_numbers<[1], [0], [0], [1], [0, 0, 1, 1], [], []>} : vector<16x128xbf16>, vector<128x128xbf16>, vector<16x128xf32> -> vector<16x128xf32>
    %c17 = arith.constant 17 : index
    %c0_108 = arith.constant 0 : index
    %231 = vector.load %arg3[%c17, %c0_108] : memref<22x128xf32, #tpu.memory_space<vmem>>, vector<1x128xf32>
    %232 = vector.broadcast %231 : vector<1x128xf32> to vector<16x128xf32>
    %233 = arith.addf %230, %232 : vector<16x128xf32>
    %cst_109 = arith.constant 0.000000e+00 : f32
    %234 = vector.broadcast %cst_109 : f32 to vector<16x128xf32>
    %235 = arith.maximumf %233, %234 : vector<16x128xf32>
    %236 = arith.truncf %235 : vector<16x128xf32> to vector<16x128xbf16>
    %c1_110 = arith.constant 1 : index
    %c5_111 = arith.constant 5 : index
    %c0_112 = arith.constant 0 : index
    %c0_113 = arith.constant 0 : index
    %237 = vector.load %arg4[%c1_110, %c5_111, %c0_112, %c0_113] : memref<2x6x128x128xbf16, #tpu.memory_space<vmem>>, vector<1x1x128x128xbf16>
    %238 = vector.shape_cast %237 : vector<1x1x128x128xbf16> to vector<128x128xbf16>
    %cst_114 = arith.constant dense<0.000000e+00> : vector<16x128xf32>
    %239 = tpu.matmul %236, %238, %cst_114 {dimension_numbers = #tpu.dot_dimension_numbers<[1], [0], [0], [1], [0, 0, 1, 1], [], []>} : vector<16x128xbf16>, vector<128x128xbf16>, vector<16x128xf32> -> vector<16x128xf32>
    %240 = arith.addf %202, %239 : vector<16x128xf32>
    %c19 = arith.constant 19 : index
    %c0_115 = arith.constant 0 : index
    %241 = vector.load %arg3[%c19, %c0_115] : memref<22x128xf32, #tpu.memory_space<vmem>>, vector<1x128xf32>
    %242 = vector.broadcast %241 : vector<1x128xf32> to vector<16x128xf32>
    %243 = arith.addf %240, %242 : vector<16x128xf32>
    %c20 = arith.constant 20 : index
    %c0_116 = arith.constant 0 : index
    %244 = vector.load %arg3[%c20, %c0_116] : memref<22x128xf32, #tpu.memory_space<vmem>>, vector<1x128xf32>
    %c21 = arith.constant 21 : index
    %c0_117 = arith.constant 0 : index
    %245 = vector.load %arg3[%c21, %c0_117] : memref<22x128xf32, #tpu.memory_space<vmem>>, vector<1x128xf32>
    %cst_118 = arith.constant dense<0.000000e+00> : vector<16xf32>
    %246 = vector.multi_reduction <add>, %243, %cst_118 [1] : vector<16x128xf32> to vector<16xf32>
    %247 = vector.shape_cast %246 : vector<16xf32> to vector<16x1xf32>
    %cst_119 = arith.constant 3.125000e-02 : f32
    %248 = vector.broadcast %cst_119 : f32 to vector<16x1xf32>
    %249 = arith.mulf %247, %248 : vector<16x1xf32>
    %250 = arith.mulf %243, %243 : vector<16x128xf32>
    %cst_120 = arith.constant dense<0.000000e+00> : vector<16xf32>
    %251 = vector.multi_reduction <add>, %250, %cst_120 [1] : vector<16x128xf32> to vector<16xf32>
    %252 = vector.shape_cast %251 : vector<16xf32> to vector<16x1xf32>
    %cst_121 = arith.constant 3.125000e-02 : f32
    %253 = vector.broadcast %cst_121 : f32 to vector<16x1xf32>
    %254 = arith.mulf %252, %253 : vector<16x1xf32>
    %255 = arith.mulf %249, %249 : vector<16x1xf32>
    %256 = arith.subf %254, %255 : vector<16x1xf32>
    %257 = vector.broadcast %249 : vector<16x1xf32> to vector<16x128xf32>
    %258 = arith.subf %243, %257 : vector<16x128xf32>
    %cst_122 = arith.constant 9.99999974E-6 : f32
    %259 = vector.broadcast %cst_122 : f32 to vector<16x1xf32>
    %260 = arith.addf %256, %259 : vector<16x1xf32>
    %261 = math.rsqrt %260 : vector<16x1xf32>
    %262 = vector.broadcast %261 : vector<16x1xf32> to vector<16x128xf32>
    %263 = arith.mulf %258, %262 : vector<16x128xf32>
    %264 = vector.broadcast %244 : vector<1x128xf32> to vector<16x128xf32>
    %265 = arith.mulf %263, %264 : vector<16x128xf32>
    %266 = vector.broadcast %245 : vector<1x128xf32> to vector<16x128xf32>
    %267 = arith.addf %265, %266 : vector<16x128xf32>
    %c0_123 = arith.constant 0 : index
    %c0_124 = arith.constant 0 : index
    %c0_125 = arith.constant 0 : index
    %c0_126 = arith.constant 0 : index
    %268 = vector.load %arg2[%c0_123, %c0_124, %c0_125, %c0_126] : memref<2x2x8x128xbf16, #tpu.memory_space<vmem>>, vector<2x2x8x128xbf16>
    %269 = arith.extf %268 : vector<2x2x8x128xbf16> to vector<2x2x8x128xf32>
    %270 = vector.shape_cast %269 : vector<2x2x8x128xf32> to vector<2x16x128xf32>
    %271 = vector.shape_cast %267 : vector<16x128xf32> to vector<1x16x128xf32>
    %272 = vector.broadcast %271 : vector<1x16x128xf32> to vector<2x16x128xf32>
    %273 = arith.mulf %272, %270 : vector<2x16x128xf32>
    %cst_127 = arith.constant dense<0.000000e+00> : vector<2x16xf32>
    %274 = vector.multi_reduction <add>, %273, %cst_127 [2] : vector<2x16x128xf32> to vector<2x16xf32>
    %c0_128 = arith.constant 0 : index
    %c0_129 = arith.constant 0 : index
    %c0_130 = arith.constant 0 : index
    %275 = vector.load %arg5[%c0_128, %c0_129, %c0_130] : memref<1x2x16xf32, #tpu.memory_space<vmem>>, vector<1x2x16xf32>
    %276 = vector.shape_cast %275 : vector<1x2x16xf32> to vector<2x16xf32>
    %277 = vector.shape_cast %274 : vector<2x16xf32> to vector<1x2x16xf32>
    tpu.vector_store %arg5[%c0_128, %c0_129, %c0_130], %277 {strides = array<i32>} : memref<1x2x16xf32, #tpu.memory_space<vmem>>, vector<1x2x16xf32>,
    return
  }
  func.func @transform_0(%arg0: i32) -> (i32, i32, i32) {
    %c0_i32 = arith.constant 0 : i32
    %c0_i32_0 = arith.constant 0 : i32
    %c0_i32_1 = arith.constant 0 : i32
    return %arg0, %c0_i32, %c0_i32_0 : i32, i32, i32
  }
  func.func @transform_1(%arg0: i32) -> (i32, i32, i32, i32) {
    %c0_i32 = arith.constant 0 : i32
    %c0_i32_0 = arith.constant 0 : i32
    %c0_i32_1 = arith.constant 0 : i32
    %c0_i32_2 = arith.constant 0 : i32
    return %c0_i32, %arg0, %c0_i32_0, %c0_i32_1 : i32, i32, i32, i32
  }
  func.func @transform_2(%arg0: i32) -> (i32, i32) {
    %c0_i32 = arith.constant 0 : i32
    %c0_i32_0 = arith.constant 0 : i32
    %c0_i32_1 = arith.constant 0 : i32
    return %c0_i32, %c0_i32_0 : i32, i32
  }
  func.func @transform_3(%arg0: i32) -> (i32, i32, i32, i32) {
    %c0_i32 = arith.constant 0 : i32
    %c0_i32_0 = arith.constant 0 : i32
    %c0_i32_1 = arith.constant 0 : i32
    %c0_i32_2 = arith.constant 0 : i32
    %c0_i32_3 = arith.constant 0 : i32
    return %c0_i32, %c0_i32_0, %c0_i32_1, %c0_i32_2 : i32, i32, i32, i32
  }
  func.func @transform_4(%arg0: i32) -> (i32, i32, i32) {
    %c0_i32 = arith.constant 0 : i32
    %c0_i32_0 = arith.constant 0 : i32
    %c0_i32_1 = arith.constant 0 : i32
    return %arg0, %c0_i32, %c0_i32_0 : i32, i32, i32
  }
}

module attributes {stable_mosaic.version = 11 : i64} {
  func.func @_sasrec_kernel(%arg0: i32, %arg1: memref<2x8x128xf32, #tpu.memory_space<vmem>>, %arg2: memref<2x2x8x128xbf16, #tpu.memory_space<vmem>>, %arg3: memref<22x128xf32, #tpu.memory_space<vmem>>, %arg4: memref<2x6x128x128xbf16, #tpu.memory_space<vmem>>, %arg5: memref<1x2x16xf32, #tpu.memory_space<vmem>>) attributes {dimension_semantics = [#tpu.dimension_semantics<parallel>], iteration_bounds = array<i64: 2>, scalar_prefetch = 0 : i64, scratch_operands = 0 : i64, tpu.core_type = #tpu.core_type<tc>, window_params = [{transform_indices = @transform_0, window_bounds = array<i64: 2, 8, 128>}, {transform_indices = @transform_1, window_bounds = array<i64: 2, 2, 8, 128>}, {pipeline_mode = #tpu.pipeline_mode<synchronous>, transform_indices = @transform_2, window_bounds = array<i64: 22, 128>}, {pipeline_mode = #tpu.pipeline_mode<synchronous>, transform_indices = @transform_3, window_bounds = array<i64: 2, 6, 128, 128>}, {transform_indices = @transform_4, window_bounds = array<i64: 1, 2, 16>}]} {
    %c0 = arith.constant 0 : index
    %c0_0 = arith.constant 0 : index
    %c0_1 = arith.constant 0 : index
    %0 = vector.load %arg1[%c0, %c0_0, %c0_1] : memref<2x8x128xf32, #tpu.memory_space<vmem>>, vector<2x8x128xf32>
    %1 = vector.shape_cast %0 : vector<2x8x128xf32> to vector<16x128xf32>
    %c0_2 = arith.constant 0 : index
    %c0_3 = arith.constant 0 : index
    %2 = vector.load %arg3[%c0_2, %c0_3] : memref<22x128xf32, #tpu.memory_space<vmem>>, vector<1x128xf32>
    %c2 = arith.constant 2 : index
    %c0_4 = arith.constant 0 : index
    %3 = vector.load %arg3[%c2, %c0_4] : memref<22x128xf32, #tpu.memory_space<vmem>>, vector<1x128xf32>
    %cst = arith.constant dense<0.000000e+00> : vector<16xf32>
    %4 = vector.multi_reduction <add>, %1, %cst [1] : vector<16x128xf32> to vector<16xf32>
    %5 = vector.shape_cast %4 : vector<16xf32> to vector<16x1xf32>
    %cst_5 = arith.constant 3.125000e-02 : f32
    %6 = vector.broadcast %cst_5 : f32 to vector<16x1xf32>
    %7 = arith.mulf %5, %6 : vector<16x1xf32>
    %8 = arith.mulf %1, %1 : vector<16x128xf32>
    %cst_6 = arith.constant dense<0.000000e+00> : vector<16xf32>
    %9 = vector.multi_reduction <add>, %8, %cst_6 [1] : vector<16x128xf32> to vector<16xf32>
    %10 = vector.shape_cast %9 : vector<16xf32> to vector<16x1xf32>
    %cst_7 = arith.constant 3.125000e-02 : f32
    %11 = vector.broadcast %cst_7 : f32 to vector<16x1xf32>
    %12 = arith.mulf %10, %11 : vector<16x1xf32>
    %13 = arith.mulf %7, %7 : vector<16x1xf32>
    %14 = arith.subf %12, %13 : vector<16x1xf32>
    %15 = vector.broadcast %7 : vector<16x1xf32> to vector<16x128xf32>
    %16 = arith.subf %1, %15 : vector<16x128xf32>
    %cst_8 = arith.constant 9.99999974E-6 : f32
    %17 = vector.broadcast %cst_8 : f32 to vector<16x1xf32>
    %18 = arith.addf %14, %17 : vector<16x1xf32>
    %19 = math.rsqrt %18 : vector<16x1xf32>
    %20 = vector.broadcast %19 : vector<16x1xf32> to vector<16x128xf32>
    %21 = arith.mulf %16, %20 : vector<16x128xf32>
    %22 = vector.broadcast %2 : vector<1x128xf32> to vector<16x128xf32>
    %23 = arith.mulf %21, %22 : vector<16x128xf32>
    %24 = vector.broadcast %3 : vector<1x128xf32> to vector<16x128xf32>
    %25 = arith.addf %23, %24 : vector<16x128xf32>
    %26 = arith.truncf %25 : vector<16x128xf32> to vector<16x128xbf16>
    %c0_9 = arith.constant 0 : index
    %c0_10 = arith.constant 0 : index
    %c0_11 = arith.constant 0 : index
    %c0_12 = arith.constant 0 : index
    %27 = vector.load %arg4[%c0_9, %c0_10, %c0_11, %c0_12] : memref<2x6x128x128xbf16, #tpu.memory_space<vmem>>, vector<1x1x128x128xbf16>
    %28 = vector.shape_cast %27 : vector<1x1x128x128xbf16> to vector<128x128xbf16>
    %cst_13 = arith.constant dense<0.000000e+00> : vector<16x128xf32>
    %29 = tpu.matmul %26, %28, %cst_13 {dimension_numbers = #tpu.dot_dimension_numbers<[1], [0], [0], [1], [0, 0, 1, 1], [], []>} : vector<16x128xbf16>, vector<128x128xbf16>, vector<16x128xf32> -> vector<16x128xf32>
    %c4 = arith.constant 4 : index
    %c0_14 = arith.constant 0 : index
    %30 = vector.load %arg3[%c4, %c0_14] : memref<22x128xf32, #tpu.memory_space<vmem>>, vector<1x128xf32>
    %31 = vector.broadcast %30 : vector<1x128xf32> to vector<16x128xf32>
    %32 = arith.addf %29, %31 : vector<16x128xf32>
    %33 = arith.truncf %32 : vector<16x128xf32> to vector<16x128xbf16>
    %34 = vector.shape_cast %33 : vector<16x128xbf16> to vector<2x8x128xbf16>
    %c0_15 = arith.constant 0 : index
    %c1 = arith.constant 1 : index
    %c0_16 = arith.constant 0 : index
    %c0_17 = arith.constant 0 : index
    %35 = vector.load %arg4[%c0_15, %c1, %c0_16, %c0_17] : memref<2x6x128x128xbf16, #tpu.memory_space<vmem>>, vector<1x1x128x128xbf16>
    %36 = vector.shape_cast %35 : vector<1x1x128x128xbf16> to vector<128x128xbf16>
    %cst_18 = arith.constant dense<0.000000e+00> : vector<16x128xf32>
    %37 = tpu.matmul %26, %36, %cst_18 {dimension_numbers = #tpu.dot_dimension_numbers<[1], [0], [0], [1], [0, 0, 1, 1], [], []>} : vector<16x128xbf16>, vector<128x128xbf16>, vector<16x128xf32> -> vector<16x128xf32>
    %c6 = arith.constant 6 : index
    %c0_19 = arith.constant 0 : index
    %38 = vector.load %arg3[%c6, %c0_19] : memref<22x128xf32, #tpu.memory_space<vmem>>, vector<1x128xf32>
    %39 = vector.broadcast %38 : vector<1x128xf32> to vector<16x128xf32>
    %40 = arith.addf %37, %39 : vector<16x128xf32>
    %41 = arith.truncf %40 : vector<16x128xf32> to vector<16x128xbf16>
    %42 = vector.shape_cast %41 : vector<16x128xbf16> to vector<2x8x128xbf16>
    %c0_20 = arith.constant 0 : index
    %c2_21 = arith.constant 2 : index
    %c0_22 = arith.constant 0 : index
    %c0_23 = arith.constant 0 : index
    %43 = vector.load %arg4[%c0_20, %c2_21, %c0_22, %c0_23] : memref<2x6x128x128xbf16, #tpu.memory_space<vmem>>, vector<1x1x128x128xbf16>
    %44 = vector.shape_cast %43 : vector<1x1x128x128xbf16> to vector<128x128xbf16>
    %cst_24 = arith.constant dense<0.000000e+00> : vector<16x128xf32>
    %45 = tpu.matmul %26, %44, %cst_24 {dimension_numbers = #tpu.dot_dimension_numbers<[1], [0], [0], [1], [0, 0, 1, 1], [], []>} : vector<16x128xbf16>, vector<128x128xbf16>, vector<16x128xf32> -> vector<16x128xf32>
    %c8 = arith.constant 8 : index
    %c0_25 = arith.constant 0 : index
    %46 = vector.load %arg3[%c8, %c0_25] : memref<22x128xf32, #tpu.memory_space<vmem>>, vector<1x128xf32>
    %47 = vector.broadcast %46 : vector<1x128xf32> to vector<16x128xf32>
    %48 = arith.addf %45, %47 : vector<16x128xf32>
    %49 = arith.truncf %48 : vector<16x128xf32> to vector<16x128xbf16>
    %50 = vector.shape_cast %49 : vector<16x128xbf16> to vector<2x8x128xbf16>
    "tpu.trace_start"() <{level = 10 : i32, message = "bqd,bkd->bqk"}> : () -> ()
    %cst_26 = arith.constant dense<0.000000e+00> : vector<2x8x8xf32>
    %51 = tpu.matmul %34, %42, %cst_26 {dimension_numbers = #tpu.dot_dimension_numbers<[2], [2], [1], [1], [0, 0, 0, 1, 1, 1], [0], [0]>} : vector<2x8x128xbf16>, vector<2x8x128xbf16>, vector<2x8x8xf32> -> vector<2x8x8xf32>
    "tpu.trace_stop"() : () -> ()
    %52 = tpu.iota {dimensions = array<i32: 0>} : vector<8x8xi32>
    %53 = tpu.iota {dimensions = array<i32: 1>} : vector<8x8xi32>
    %54 = arith.cmpi sge, %52, %53 : vector<8x8xi32>
    %cst_27 = arith.constant 0.000000e+00 : f32
    %cst_28 = arith.constant -1.000000e+09 : f32
    %55 = vector.broadcast %cst_27 : f32 to vector<8x8xf32>
    %56 = vector.broadcast %cst_28 : f32 to vector<8x8xf32>
    %57 = arith.select %54, %55, %56 : vector<8x8xi1>, vector<8x8xf32>
    %58 = vector.shape_cast %57 : vector<8x8xf32> to vector<1x8x8xf32>
    %59 = vector.broadcast %58 : vector<1x8x8xf32> to vector<2x8x8xf32>
    %60 = arith.addf %51, %59 : vector<2x8x8xf32>
    %cst_29 = arith.constant dense<0xFF800000> : vector<2x8xf32>
    %61 = vector.multi_reduction <maximumf>, %60, %cst_29 [2] : vector<2x8x8xf32> to vector<2x8xf32>
    %62 = vector.shape_cast %61 : vector<2x8xf32> to vector<2x8x1xf32>
    %63 = vector.broadcast %62 : vector<2x8x1xf32> to vector<2x8x8xf32>
    %64 = arith.subf %60, %63 : vector<2x8x8xf32>
    %65 = math.exp %64 : vector<2x8x8xf32>
    %cst_30 = arith.constant dense<0.000000e+00> : vector<2x8xf32>
    %66 = vector.multi_reduction <add>, %65, %cst_30 [2] : vector<2x8x8xf32> to vector<2x8xf32>
    %67 = vector.shape_cast %66 : vector<2x8xf32> to vector<2x8x1xf32>
    %68 = tpu.reciprocal %67 {approx = true} : vector<2x8x1xf32> -> vector<2x8x1xf32>
    %69 = vector.broadcast %68 : vector<2x8x1xf32> to vector<2x8x8xf32>
    %70 = arith.mulf %65, %69 : vector<2x8x8xf32>
    %71 = arith.truncf %70 : vector<2x8x8xf32> to vector<2x8x8xbf16>
    "tpu.trace_start"() <{level = 10 : i32, message = "bqk,bkd->bqd"}> : () -> ()
    %cst_31 = arith.constant dense<0.000000e+00> : vector<2x8x128xf32>
    %72 = tpu.matmul %71, %50, %cst_31 {dimension_numbers = #tpu.dot_dimension_numbers<[2], [1], [1], [2], [0, 0, 0, 1, 1, 2], [0], [0]>} : vector<2x8x8xbf16>, vector<2x8x128xbf16>, vector<2x8x128xf32> -> vector<2x8x128xf32>
    "tpu.trace_stop"() : () -> ()
    %73 = vector.shape_cast %72 : vector<2x8x128xf32> to vector<16x128xf32>
    %74 = arith.truncf %73 : vector<16x128xf32> to vector<16x128xbf16>
    %c0_32 = arith.constant 0 : index
    %c3 = arith.constant 3 : index
    %c0_33 = arith.constant 0 : index
    %c0_34 = arith.constant 0 : index
    %75 = vector.load %arg4[%c0_32, %c3, %c0_33, %c0_34] : memref<2x6x128x128xbf16, #tpu.memory_space<vmem>>, vector<1x1x128x128xbf16>
    %76 = vector.shape_cast %75 : vector<1x1x128x128xbf16> to vector<128x128xbf16>
    %cst_35 = arith.constant dense<0.000000e+00> : vector<16x128xf32>
    %77 = tpu.matmul %74, %76, %cst_35 {dimension_numbers = #tpu.dot_dimension_numbers<[1], [0], [0], [1], [0, 0, 1, 1], [], []>} : vector<16x128xbf16>, vector<128x128xbf16>, vector<16x128xf32> -> vector<16x128xf32>
    %78 = arith.addf %1, %77 : vector<16x128xf32>
    %c10 = arith.constant 10 : index
    %c0_36 = arith.constant 0 : index
    %79 = vector.load %arg3[%c10, %c0_36] : memref<22x128xf32, #tpu.memory_space<vmem>>, vector<1x128xf32>
    %80 = vector.broadcast %79 : vector<1x128xf32> to vector<16x128xf32>
    %81 = arith.addf %78, %80 : vector<16x128xf32>
    %c12 = arith.constant 12 : index
    %c0_37 = arith.constant 0 : index
    %82 = vector.load %arg3[%c12, %c0_37] : memref<22x128xf32, #tpu.memory_space<vmem>>, vector<1x128xf32>
    %c14 = arith.constant 14 : index
    %c0_38 = arith.constant 0 : index
    %83 = vector.load %arg3[%c14, %c0_38] : memref<22x128xf32, #tpu.memory_space<vmem>>, vector<1x128xf32>
    %cst_39 = arith.constant dense<0.000000e+00> : vector<16xf32>
    %84 = vector.multi_reduction <add>, %81, %cst_39 [1] : vector<16x128xf32> to vector<16xf32>
    %85 = vector.shape_cast %84 : vector<16xf32> to vector<16x1xf32>
    %cst_40 = arith.constant 3.125000e-02 : f32
    %86 = vector.broadcast %cst_40 : f32 to vector<16x1xf32>
    %87 = arith.mulf %85, %86 : vector<16x1xf32>
    %88 = arith.mulf %81, %81 : vector<16x128xf32>
    %cst_41 = arith.constant dense<0.000000e+00> : vector<16xf32>
    %89 = vector.multi_reduction <add>, %88, %cst_41 [1] : vector<16x128xf32> to vector<16xf32>
    %90 = vector.shape_cast %89 : vector<16xf32> to vector<16x1xf32>
    %cst_42 = arith.constant 3.125000e-02 : f32
    %91 = vector.broadcast %cst_42 : f32 to vector<16x1xf32>
    %92 = arith.mulf %90, %91 : vector<16x1xf32>
    %93 = arith.mulf %87, %87 : vector<16x1xf32>
    %94 = arith.subf %92, %93 : vector<16x1xf32>
    %95 = vector.broadcast %87 : vector<16x1xf32> to vector<16x128xf32>
    %96 = arith.subf %81, %95 : vector<16x128xf32>
    %cst_43 = arith.constant 9.99999974E-6 : f32
    %97 = vector.broadcast %cst_43 : f32 to vector<16x1xf32>
    %98 = arith.addf %94, %97 : vector<16x1xf32>
    %99 = math.rsqrt %98 : vector<16x1xf32>
    %100 = vector.broadcast %99 : vector<16x1xf32> to vector<16x128xf32>
    %101 = arith.mulf %96, %100 : vector<16x128xf32>
    %102 = vector.broadcast %82 : vector<1x128xf32> to vector<16x128xf32>
    %103 = arith.mulf %101, %102 : vector<16x128xf32>
    %104 = vector.broadcast %83 : vector<1x128xf32> to vector<16x128xf32>
    %105 = arith.addf %103, %104 : vector<16x128xf32>
    %106 = arith.truncf %105 : vector<16x128xf32> to vector<16x128xbf16>
    %c0_44 = arith.constant 0 : index
    %c4_45 = arith.constant 4 : index
    %c0_46 = arith.constant 0 : index
    %c0_47 = arith.constant 0 : index
    %107 = vector.load %arg4[%c0_44, %c4_45, %c0_46, %c0_47] : memref<2x6x128x128xbf16, #tpu.memory_space<vmem>>, vector<1x1x128x128xbf16>
    %108 = vector.shape_cast %107 : vector<1x1x128x128xbf16> to vector<128x128xbf16>
    %cst_48 = arith.constant dense<0.000000e+00> : vector<16x128xf32>
    %109 = tpu.matmul %106, %108, %cst_48 {dimension_numbers = #tpu.dot_dimension_numbers<[1], [0], [0], [1], [0, 0, 1, 1], [], []>} : vector<16x128xbf16>, vector<128x128xbf16>, vector<16x128xf32> -> vector<16x128xf32>
    %c16 = arith.constant 16 : index
    %c0_49 = arith.constant 0 : index
    %110 = vector.load %arg3[%c16, %c0_49] : memref<22x128xf32, #tpu.memory_space<vmem>>, vector<1x128xf32>
    %111 = vector.broadcast %110 : vector<1x128xf32> to vector<16x128xf32>
    %112 = arith.addf %109, %111 : vector<16x128xf32>
    %cst_50 = arith.constant 0.000000e+00 : f32
    %113 = vector.broadcast %cst_50 : f32 to vector<16x128xf32>
    %114 = arith.maximumf %112, %113 : vector<16x128xf32>
    %115 = arith.truncf %114 : vector<16x128xf32> to vector<16x128xbf16>
    %c0_51 = arith.constant 0 : index
    %c5 = arith.constant 5 : index
    %c0_52 = arith.constant 0 : index
    %c0_53 = arith.constant 0 : index
    %116 = vector.load %arg4[%c0_51, %c5, %c0_52, %c0_53] : memref<2x6x128x128xbf16, #tpu.memory_space<vmem>>, vector<1x1x128x128xbf16>
    %117 = vector.shape_cast %116 : vector<1x1x128x128xbf16> to vector<128x128xbf16>
    %cst_54 = arith.constant dense<0.000000e+00> : vector<16x128xf32>
    %118 = tpu.matmul %115, %117, %cst_54 {dimension_numbers = #tpu.dot_dimension_numbers<[1], [0], [0], [1], [0, 0, 1, 1], [], []>} : vector<16x128xbf16>, vector<128x128xbf16>, vector<16x128xf32> -> vector<16x128xf32>
    %119 = arith.addf %81, %118 : vector<16x128xf32>
    %c18 = arith.constant 18 : index
    %c0_55 = arith.constant 0 : index
    %120 = vector.load %arg3[%c18, %c0_55] : memref<22x128xf32, #tpu.memory_space<vmem>>, vector<1x128xf32>
    %121 = vector.broadcast %120 : vector<1x128xf32> to vector<16x128xf32>
    %122 = arith.addf %119, %121 : vector<16x128xf32>
    %c1_56 = arith.constant 1 : index
    %c0_57 = arith.constant 0 : index
    %123 = vector.load %arg3[%c1_56, %c0_57] : memref<22x128xf32, #tpu.memory_space<vmem>>, vector<1x128xf32>
    %c3_58 = arith.constant 3 : index
    %c0_59 = arith.constant 0 : index
    %124 = vector.load %arg3[%c3_58, %c0_59] : memref<22x128xf32, #tpu.memory_space<vmem>>, vector<1x128xf32>
    %cst_60 = arith.constant dense<0.000000e+00> : vector<16xf32>
    %125 = vector.multi_reduction <add>, %122, %cst_60 [1] : vector<16x128xf32> to vector<16xf32>
    %126 = vector.shape_cast %125 : vector<16xf32> to vector<16x1xf32>
    %cst_61 = arith.constant 3.125000e-02 : f32
    %127 = vector.broadcast %cst_61 : f32 to vector<16x1xf32>
    %128 = arith.mulf %126, %127 : vector<16x1xf32>
    %129 = arith.mulf %122, %122 : vector<16x128xf32>
    %cst_62 = arith.constant dense<0.000000e+00> : vector<16xf32>
    %130 = vector.multi_reduction <add>, %129, %cst_62 [1] : vector<16x128xf32> to vector<16xf32>
    %131 = vector.shape_cast %130 : vector<16xf32> to vector<16x1xf32>
    %cst_63 = arith.constant 3.125000e-02 : f32
    %132 = vector.broadcast %cst_63 : f32 to vector<16x1xf32>
    %133 = arith.mulf %131, %132 : vector<16x1xf32>
    %134 = arith.mulf %128, %128 : vector<16x1xf32>
    %135 = arith.subf %133, %134 : vector<16x1xf32>
    %136 = vector.broadcast %128 : vector<16x1xf32> to vector<16x128xf32>
    %137 = arith.subf %122, %136 : vector<16x128xf32>
    %cst_64 = arith.constant 9.99999974E-6 : f32
    %138 = vector.broadcast %cst_64 : f32 to vector<16x1xf32>
    %139 = arith.addf %135, %138 : vector<16x1xf32>
    %140 = math.rsqrt %139 : vector<16x1xf32>
    %141 = vector.broadcast %140 : vector<16x1xf32> to vector<16x128xf32>
    %142 = arith.mulf %137, %141 : vector<16x128xf32>
    %143 = vector.broadcast %123 : vector<1x128xf32> to vector<16x128xf32>
    %144 = arith.mulf %142, %143 : vector<16x128xf32>
    %145 = vector.broadcast %124 : vector<1x128xf32> to vector<16x128xf32>
    %146 = arith.addf %144, %145 : vector<16x128xf32>
    %147 = arith.truncf %146 : vector<16x128xf32> to vector<16x128xbf16>
    %c1_65 = arith.constant 1 : index
    %c0_66 = arith.constant 0 : index
    %c0_67 = arith.constant 0 : index
    %c0_68 = arith.constant 0 : index
    %148 = vector.load %arg4[%c1_65, %c0_66, %c0_67, %c0_68] : memref<2x6x128x128xbf16, #tpu.memory_space<vmem>>, vector<1x1x128x128xbf16>
    %149 = vector.shape_cast %148 : vector<1x1x128x128xbf16> to vector<128x128xbf16>
    %cst_69 = arith.constant dense<0.000000e+00> : vector<16x128xf32>
    %150 = tpu.matmul %147, %149, %cst_69 {dimension_numbers = #tpu.dot_dimension_numbers<[1], [0], [0], [1], [0, 0, 1, 1], [], []>} : vector<16x128xbf16>, vector<128x128xbf16>, vector<16x128xf32> -> vector<16x128xf32>
    %c5_70 = arith.constant 5 : index
    %c0_71 = arith.constant 0 : index
    %151 = vector.load %arg3[%c5_70, %c0_71] : memref<22x128xf32, #tpu.memory_space<vmem>>, vector<1x128xf32>
    %152 = vector.broadcast %151 : vector<1x128xf32> to vector<16x128xf32>
    %153 = arith.addf %150, %152 : vector<16x128xf32>
    %154 = arith.truncf %153 : vector<16x128xf32> to vector<16x128xbf16>
    %155 = vector.shape_cast %154 : vector<16x128xbf16> to vector<2x8x128xbf16>
    %c1_72 = arith.constant 1 : index
    %c1_73 = arith.constant 1 : index
    %c0_74 = arith.constant 0 : index
    %c0_75 = arith.constant 0 : index
    %156 = vector.load %arg4[%c1_72, %c1_73, %c0_74, %c0_75] : memref<2x6x128x128xbf16, #tpu.memory_space<vmem>>, vector<1x1x128x128xbf16>
    %157 = vector.shape_cast %156 : vector<1x1x128x128xbf16> to vector<128x128xbf16>
    %cst_76 = arith.constant dense<0.000000e+00> : vector<16x128xf32>
    %158 = tpu.matmul %147, %157, %cst_76 {dimension_numbers = #tpu.dot_dimension_numbers<[1], [0], [0], [1], [0, 0, 1, 1], [], []>} : vector<16x128xbf16>, vector<128x128xbf16>, vector<16x128xf32> -> vector<16x128xf32>
    %c7 = arith.constant 7 : index
    %c0_77 = arith.constant 0 : index
    %159 = vector.load %arg3[%c7, %c0_77] : memref<22x128xf32, #tpu.memory_space<vmem>>, vector<1x128xf32>
    %160 = vector.broadcast %159 : vector<1x128xf32> to vector<16x128xf32>
    %161 = arith.addf %158, %160 : vector<16x128xf32>
    %162 = arith.truncf %161 : vector<16x128xf32> to vector<16x128xbf16>
    %163 = vector.shape_cast %162 : vector<16x128xbf16> to vector<2x8x128xbf16>
    %c1_78 = arith.constant 1 : index
    %c2_79 = arith.constant 2 : index
    %c0_80 = arith.constant 0 : index
    %c0_81 = arith.constant 0 : index
    %164 = vector.load %arg4[%c1_78, %c2_79, %c0_80, %c0_81] : memref<2x6x128x128xbf16, #tpu.memory_space<vmem>>, vector<1x1x128x128xbf16>
    %165 = vector.shape_cast %164 : vector<1x1x128x128xbf16> to vector<128x128xbf16>
    %cst_82 = arith.constant dense<0.000000e+00> : vector<16x128xf32>
    %166 = tpu.matmul %147, %165, %cst_82 {dimension_numbers = #tpu.dot_dimension_numbers<[1], [0], [0], [1], [0, 0, 1, 1], [], []>} : vector<16x128xbf16>, vector<128x128xbf16>, vector<16x128xf32> -> vector<16x128xf32>
    %c9 = arith.constant 9 : index
    %c0_83 = arith.constant 0 : index
    %167 = vector.load %arg3[%c9, %c0_83] : memref<22x128xf32, #tpu.memory_space<vmem>>, vector<1x128xf32>
    %168 = vector.broadcast %167 : vector<1x128xf32> to vector<16x128xf32>
    %169 = arith.addf %166, %168 : vector<16x128xf32>
    %170 = arith.truncf %169 : vector<16x128xf32> to vector<16x128xbf16>
    %171 = vector.shape_cast %170 : vector<16x128xbf16> to vector<2x8x128xbf16>
    "tpu.trace_start"() <{level = 10 : i32, message = "bqd,bkd->bqk"}> : () -> ()
    %cst_84 = arith.constant dense<0.000000e+00> : vector<2x8x8xf32>
    %172 = tpu.matmul %155, %163, %cst_84 {dimension_numbers = #tpu.dot_dimension_numbers<[2], [2], [1], [1], [0, 0, 0, 1, 1, 1], [0], [0]>} : vector<2x8x128xbf16>, vector<2x8x128xbf16>, vector<2x8x8xf32> -> vector<2x8x8xf32>
    "tpu.trace_stop"() : () -> ()
    %173 = tpu.iota {dimensions = array<i32: 0>} : vector<8x8xi32>
    %174 = tpu.iota {dimensions = array<i32: 1>} : vector<8x8xi32>
    %175 = arith.cmpi sge, %173, %174 : vector<8x8xi32>
    %cst_85 = arith.constant 0.000000e+00 : f32
    %cst_86 = arith.constant -1.000000e+09 : f32
    %176 = vector.broadcast %cst_85 : f32 to vector<8x8xf32>
    %177 = vector.broadcast %cst_86 : f32 to vector<8x8xf32>
    %178 = arith.select %175, %176, %177 : vector<8x8xi1>, vector<8x8xf32>
    %179 = vector.shape_cast %178 : vector<8x8xf32> to vector<1x8x8xf32>
    %180 = vector.broadcast %179 : vector<1x8x8xf32> to vector<2x8x8xf32>
    %181 = arith.addf %172, %180 : vector<2x8x8xf32>
    %cst_87 = arith.constant dense<0xFF800000> : vector<2x8xf32>
    %182 = vector.multi_reduction <maximumf>, %181, %cst_87 [2] : vector<2x8x8xf32> to vector<2x8xf32>
    %183 = vector.shape_cast %182 : vector<2x8xf32> to vector<2x8x1xf32>
    %184 = vector.broadcast %183 : vector<2x8x1xf32> to vector<2x8x8xf32>
    %185 = arith.subf %181, %184 : vector<2x8x8xf32>
    %186 = math.exp %185 : vector<2x8x8xf32>
    %cst_88 = arith.constant dense<0.000000e+00> : vector<2x8xf32>
    %187 = vector.multi_reduction <add>, %186, %cst_88 [2] : vector<2x8x8xf32> to vector<2x8xf32>
    %188 = vector.shape_cast %187 : vector<2x8xf32> to vector<2x8x1xf32>
    %189 = tpu.reciprocal %188 {approx = true} : vector<2x8x1xf32> -> vector<2x8x1xf32>
    %190 = vector.broadcast %189 : vector<2x8x1xf32> to vector<2x8x8xf32>
    %191 = arith.mulf %186, %190 : vector<2x8x8xf32>
    %192 = arith.truncf %191 : vector<2x8x8xf32> to vector<2x8x8xbf16>
    "tpu.trace_start"() <{level = 10 : i32, message = "bqk,bkd->bqd"}> : () -> ()
    %cst_89 = arith.constant dense<0.000000e+00> : vector<2x8x128xf32>
    %193 = tpu.matmul %192, %171, %cst_89 {dimension_numbers = #tpu.dot_dimension_numbers<[2], [1], [1], [2], [0, 0, 0, 1, 1, 2], [0], [0]>} : vector<2x8x8xbf16>, vector<2x8x128xbf16>, vector<2x8x128xf32> -> vector<2x8x128xf32>
    "tpu.trace_stop"() : () -> ()
    %194 = vector.shape_cast %193 : vector<2x8x128xf32> to vector<16x128xf32>
    %195 = arith.truncf %194 : vector<16x128xf32> to vector<16x128xbf16>
    %c1_90 = arith.constant 1 : index
    %c3_91 = arith.constant 3 : index
    %c0_92 = arith.constant 0 : index
    %c0_93 = arith.constant 0 : index
    %196 = vector.load %arg4[%c1_90, %c3_91, %c0_92, %c0_93] : memref<2x6x128x128xbf16, #tpu.memory_space<vmem>>, vector<1x1x128x128xbf16>
    %197 = vector.shape_cast %196 : vector<1x1x128x128xbf16> to vector<128x128xbf16>
    %cst_94 = arith.constant dense<0.000000e+00> : vector<16x128xf32>
    %198 = tpu.matmul %195, %197, %cst_94 {dimension_numbers = #tpu.dot_dimension_numbers<[1], [0], [0], [1], [0, 0, 1, 1], [], []>} : vector<16x128xbf16>, vector<128x128xbf16>, vector<16x128xf32> -> vector<16x128xf32>
    %199 = arith.addf %122, %198 : vector<16x128xf32>
    %c11 = arith.constant 11 : index
    %c0_95 = arith.constant 0 : index
    %200 = vector.load %arg3[%c11, %c0_95] : memref<22x128xf32, #tpu.memory_space<vmem>>, vector<1x128xf32>
    %201 = vector.broadcast %200 : vector<1x128xf32> to vector<16x128xf32>
    %202 = arith.addf %199, %201 : vector<16x128xf32>
    %c13 = arith.constant 13 : index
    %c0_96 = arith.constant 0 : index
    %203 = vector.load %arg3[%c13, %c0_96] : memref<22x128xf32, #tpu.memory_space<vmem>>, vector<1x128xf32>
    %c15 = arith.constant 15 : index
    %c0_97 = arith.constant 0 : index
    %204 = vector.load %arg3[%c15, %c0_97] : memref<22x128xf32, #tpu.memory_space<vmem>>, vector<1x128xf32>
    %cst_98 = arith.constant dense<0.000000e+00> : vector<16xf32>
    %205 = vector.multi_reduction <add>, %202, %cst_98 [1] : vector<16x128xf32> to vector<16xf32>
    %206 = vector.shape_cast %205 : vector<16xf32> to vector<16x1xf32>
    %cst_99 = arith.constant 3.125000e-02 : f32
    %207 = vector.broadcast %cst_99 : f32 to vector<16x1xf32>
    %208 = arith.mulf %206, %207 : vector<16x1xf32>
    %209 = arith.mulf %202, %202 : vector<16x128xf32>
    %cst_100 = arith.constant dense<0.000000e+00> : vector<16xf32>
    %210 = vector.multi_reduction <add>, %209, %cst_100 [1] : vector<16x128xf32> to vector<16xf32>
    %211 = vector.shape_cast %210 : vector<16xf32> to vector<16x1xf32>
    %cst_101 = arith.constant 3.125000e-02 : f32
    %212 = vector.broadcast %cst_101 : f32 to vector<16x1xf32>
    %213 = arith.mulf %211, %212 : vector<16x1xf32>
    %214 = arith.mulf %208, %208 : vector<16x1xf32>
    %215 = arith.subf %213, %214 : vector<16x1xf32>
    %216 = vector.broadcast %208 : vector<16x1xf32> to vector<16x128xf32>
    %217 = arith.subf %202, %216 : vector<16x128xf32>
    %cst_102 = arith.constant 9.99999974E-6 : f32
    %218 = vector.broadcast %cst_102 : f32 to vector<16x1xf32>
    %219 = arith.addf %215, %218 : vector<16x1xf32>
    %220 = math.rsqrt %219 : vector<16x1xf32>
    %221 = vector.broadcast %220 : vector<16x1xf32> to vector<16x128xf32>
    %222 = arith.mulf %217, %221 : vector<16x128xf32>
    %223 = vector.broadcast %203 : vector<1x128xf32> to vector<16x128xf32>
    %224 = arith.mulf %222, %223 : vector<16x128xf32>
    %225 = vector.broadcast %204 : vector<1x128xf32> to vector<16x128xf32>
    %226 = arith.addf %224, %225 : vector<16x128xf32>
    %227 = arith.truncf %226 : vector<16x128xf32> to vector<16x128xbf16>
    %c1_103 = arith.constant 1 : index
    %c4_104 = arith.constant 4 : index
    %c0_105 = arith.constant 0 : index
    %c0_106 = arith.constant 0 : index
    %228 = vector.load %arg4[%c1_103, %c4_104, %c0_105, %c0_106] : memref<2x6x128x128xbf16, #tpu.memory_space<vmem>>, vector<1x1x128x128xbf16>
    %229 = vector.shape_cast %228 : vector<1x1x128x128xbf16> to vector<128x128xbf16>
    %cst_107 = arith.constant dense<0.000000e+00> : vector<16x128xf32>
    %230 = tpu.matmul %227, %229, %cst_107 {dimension_numbers = #tpu.dot_dimension_numbers<[1], [0], [0], [1], [0, 0, 1, 1], [], []>} : vector<16x128xbf16>, vector<128x128xbf16>, vector<16x128xf32> -> vector<16x128xf32>
    %c17 = arith.constant 17 : index
    %c0_108 = arith.constant 0 : index
    %231 = vector.load %arg3[%c17, %c0_108] : memref<22x128xf32, #tpu.memory_space<vmem>>, vector<1x128xf32>
    %232 = vector.broadcast %231 : vector<1x128xf32> to vector<16x128xf32>
    %233 = arith.addf %230, %232 : vector<16x128xf32>
    %cst_109 = arith.constant 0.000000e+00 : f32
    %234 = vector.broadcast %cst_109 : f32 to vector<16x128xf32>
    %235 = arith.maximumf %233, %234 : vector<16x128xf32>
    %236 = arith.truncf %235 : vector<16x128xf32> to vector<16x128xbf16>
    %c1_110 = arith.constant 1 : index
    %c5_111 = arith.constant 5 : index
    %c0_112 = arith.constant 0 : index
    %c0_113 = arith.constant 0 : index
    %237 = vector.load %arg4[%c1_110, %c5_111, %c0_112, %c0_113] : memref<2x6x128x128xbf16, #tpu.memory_space<vmem>>, vector<1x1x128x128xbf16>
    %238 = vector.shape_cast %237 : vector<1x1x128x128xbf16> to vector<128x128xbf16>
    %cst_114 = arith.constant dense<0.000000e+00> : vector<16x128xf32>
    %239 = tpu.matmul %236, %238, %cst_114 {dimension_numbers = #tpu.dot_dimension_numbers<[1], [0], [0], [1], [0, 0, 1, 1], [], []>} : vector<16x128xbf16>, vector<128x128xbf16>, vector<16x128xf32> -> vector<16x128xf32>
    %240 = arith.addf %202, %239 : vector<16x128xf32>
    %c19 = arith.constant 19 : index
    %c0_115 = arith.constant 0 : index
    %241 = vector.load %arg3[%c19, %c0_115] : memref<22x128xf32, #tpu.memory_space<vmem>>, vector<1x128xf32>
    %242 = vector.broadcast %241 : vector<1x128xf32> to vector<16x128xf32>
    %243 = arith.addf %240, %242 : vector<16x128xf32>
    %c20 = arith.constant 20 : index
    %c0_116 = arith.constant 0 : index
    %244 = vector.load %arg3[%c20, %c0_116] : memref<22x128xf32, #tpu.memory_space<vmem>>, vector<1x128xf32>
    %c21 = arith.constant 21 : index
    %c0_117 = arith.constant 0 : index
    %245 = vector.load %arg3[%c21, %c0_117] : memref<22x128xf32, #tpu.memory_space<vmem>>, vector<1x128xf32>
    %cst_118 = arith.constant dense<0.000000e+00> : vector<16xf32>
    %246 = vector.multi_reduction <add>, %243, %cst_118 [1] : vector<16x128xf32> to vector<16xf32>
    %247 = vector.shape_cast %246 : vector<16xf32> to vector<16x1xf32>
    %cst_119 = arith.constant 3.125000e-02 : f32
    %248 = vector.broadcast %cst_119 : f32 to vector<16x1xf32>
    %249 = arith.mulf %247, %248 : vector<16x1xf32>
    %250 = arith.mulf %243, %243 : vector<16x128xf32>
    %cst_120 = arith.constant dense<0.000000e+00> : vector<16xf32>
    %251 = vector.multi_reduction <add>, %250, %cst_120 [1] : vector<16x128xf32> to vector<16xf32>
    %252 = vector.shape_cast %251 : vector<16xf32> to vector<16x1xf32>
    %cst_121 = arith.constant 3.125000e-02 : f32
    %253 = vector.broadcast %cst_121 : f32 to vector<16x1xf32>
    %254 = arith.mulf %252, %253 : vector<16x1xf32>
    %255 = arith.mulf %249, %249 : vector<16x1xf32>
    %256 = arith.subf %254, %255 : vector<16x1xf32>
    %257 = vector.broadcast %249 : vector<16x1xf32> to vector<16x128xf32>
    %258 = arith.subf %243, %257 : vector<16x128xf32>
    %cst_122 = arith.constant 9.99999974E-6 : f32
    %259 = vector.broadcast %cst_122 : f32 to vector<16x1xf32>
    %260 = arith.addf %256, %259 : vector<16x1xf32>
    %261 = math.rsqrt %260 : vector<16x1xf32>
    %262 = vector.broadcast %261 : vector<16x1xf32> to vector<16x128xf32>
    %263 = arith.mulf %258, %262 : vector<16x128xf32>
    %264 = vector.broadcast %244 : vector<1x128xf32> to vector<16x128xf32>
    %265 = arith.mulf %263, %264 : vector<16x128xf32>
    %266 = vector.broadcast %245 : vector<1x128xf32> to vector<16x128xf32>
    %267 = arith.addf %265, %266 : vector<16x128xf32>
    %c0_123 = arith.constant 0 : index
    %c0_124 = arith.constant 0 : index
    %c0_125 = arith.constant 0 : index
    %c0_126 = arith.constant 0 : index
    %268 = vector.load %arg2[%c0_123, %c0_124, %c0_125, %c0_126] : memref<2x2x8x128xbf16, #tpu.memory_space<vmem>>, vector<2x2x8x128xbf16>
    %269 = arith.extf %268 : vector<2x2x8x128xbf16> to vector<2x2x8x128xf32>
    %270 = vector.shape_cast %269 : vector<2x2x8x128xf32> to vector<2x16x128xf32>
    %271 = vector.shape_cast %267 : vector<16x128xf32> to vector<1x16x128xf32>
    %272 = vector.broadcast %271 : vector<1x16x128xf32> to vector<2x16x128xf32>
    %273 = arith.mulf %272, %270 : vector<2x16x128xf32>
    %cst_127 = arith.constant dense<0.000000e+00> : vector<2x16xf32>
    %274 = vector.multi_reduction <add>, %273, %cst_127 [2] : vector<2x16x128xf32> to vector<2x16xf32>
    %c0_128 = arith.constant 0 : index
    %c0_129 = arith.constant 0 : index
    %c0_130 = arith.constant 0 : index
    %275 = vector.load %arg5[%c0_128, %c0_129, %c0_130] : memref<1x2x16xf32, #tpu.memory_space<vmem>>, vector<1x2x16xf32>
    %276 = vector.shape_cast %275 : vector<1x2x16xf32> to vector<2x16xf32>
    %277 = vector.shape_cast %274 : vector<2x16xf32> to vector<1x2x16xf32>
    tpu.vector_store %arg5[%c0_128, %c0_129, %c0_130], %277 {strides = array<i32>} : memref<1x2x16xf32, #tpu.memory_space<vmem>>, vector<1x2x16xf32>,
    return
  }
  func.func @transform_0(%arg0: i32) -> (i32, i32, i32) {
    %c0_i32 = arith.constant 0 : i32
    %c0_i32_0 = arith.constant 0 : i32
    %c0_i32_1 = arith.constant 0 : i32
    return %arg0, %c0_i32, %c0_i32_0 : i32, i32, i32
  }
  func.func @transform_1(%arg0: i32) -> (i32, i32, i32, i32) {
    %c0_i32 = arith.constant 0 : i32
    %c0_i32_0 = arith.constant 0 : i32
    %c0_i32_1 = arith.constant 0 : i32
    %c0_i32_2 = arith.constant 0 : i32
    return %c0_i32, %arg0, %c0_i32_0, %c0_i32_1 : i32, i32, i32, i32
  }
  func.func @transform_2(%arg0: i32) -> (i32, i32) {
    %c0_i32 = arith.constant 0 : i32
    %c0_i32_0 = arith.constant 0 : i32
    %c0_i32_1 = arith.constant 0 : i32
    return %c0_i32, %c0_i32_0 : i32, i32
  }
  func.func @transform_3(%arg0: i32) -> (i32, i32, i32, i32) {
    %c0_i32 = arith.constant 0 : i32
    %c0_i32_0 = arith.constant 0 : i32
    %c0_i32_1 = arith.constant 0 : i32
    %c0_i32_2 = arith.constant 0 : i32
    %c0_i32_3 = arith.constant 0 : i32
    return %c0_i32, %c0_i32_0, %c0_i32_1, %c0_i32_2 : i32, i32, i32, i32
  }
  func.func @transform_4(%arg0: i32) -> (i32, i32, i32) {
    %c0_i32 = arith.constant 0 : i32
    %c0_i32_0 = arith.constant 0 : i32
    %c0_i32_1 = arith.constant 0 : i32
    return %arg0, %c0_i32, %c0_i32_0 : i32, i32, i32
  }
}

</mosaic_0001>

<bundles_post_ra>
// kernel: tpu_custom_call.1
= control target key start
LH: loop header
LB: loop body
LE: loop exit
PB: predicated region body
PF: predicated region fallthrough
CT: control target
= control target key end

     0   :  { %9 = vsyncpa [#allocation3], 0  ;;  %s3959_s0 = inlined_call_operand.hbm [shape: f32[4,8,128], index: 0, kind: input, shape index: {}]   ;;  %s3960_s1 = inlined_call_operand.hbm [shape: bf16[2,4,8,128], index: 1, kind: input, shape index: {}]   ;;  %s3961_s2 = inlined_call_operand.hbm [shape: f32[22,128], index: 2, kind: input, shape index: {}]   ;;  %s3962_s3 = inlined_call_operand.hbm [shape: bf16[2,6,128,128], index: 3, kind: input, shape index: {}]   ;;  %s3963_s4 = inlined_call_operand.hbm [shape: f32[2,2,16], index: 4, kind: output, shape index: {}]  }
   0x1   :  { %11 = vsyncpa [#allocation3 + $0x1], 0 }
   0x2   :  { %12 = vsyncpa [#allocation6], 0 }
   0x3   :  { %14 = vsyncpa [#allocation6 + $0x1], 0 }
   0x4   :  { %15 = vsyncpa [#allocation9], 0 }
   0x5   :  { %16 = vsyncpa [#allocation4], 0 }
   0x6   :  { %18 = vsyncpa [#allocation4 + $0x1], 0  ;;  %s3503_s15 = smov 0   ;;  %s3505_s16 = smov 0  }
   0x7   :  { %s3507_s17 = smov 0   ;;  %s3509_s18 = smov 0  }
   0x8 LB: > { %s3524_s19 = sadd.s32 4294967295, %s3457_s18   ;;  %s2493_s20 = sadd.s32 4294967294, %s3457_s18   ;;  %s3457_s18 = sphi %s3509_s18, %s3985_s18   ;;  %s3453_s17 = sphi %s3507_s17, %s3984_s17   ;;  %s3449_s16 = sphi %s3505_s16, %s3983_s16   ;;  %s3445_s15 = sphi %s3503_s15, %s3982_s15  }
   0x9   : > { %s3528_s21 = sadd.s32 1, %s3457_s18   ;;  %s31_s22 = sadd.s32 1, %s3453_s17 }
   0xa   : > { %s28_s23 = ssub.s32 %s3457_s18, %s3528_s21  ;;  %p38_p0 = scmp.ne.s32.totalorder %s3453_s17, %s3449_s16 }
   0xb   : > { %p29_p1 = scmp.eq.s32.totalorder %s28_s23, 0  ;;  %p39_p2 = scmp.eq.s32.totalorder %s3457_s18, 0 }
   0xc   : > { %p44_p3 = scmp.ne.s32.totalorder %s3449_s16, %s3445_s15  ;;  %p3964_p4 = scmp.eq.s32.totalorder %s3524_s19, 0 }
   0xd   : > { %s3540_s24 = scalar_select %p29_p1, %s3453_s17, %s31_s22  }
   0xe   : > { %p3542_p5 = por %p39_p2, %p38_p0  ;;  %p3548_p6 = por %p3964_p4, %p44_p3 }
   0xf   : > { %p136_p7 = scmp.eq.s32.totalorder %s3524_s19, 1  ;;  %p142_p8 = scmp.eq.s32.totalorder %s2493_s20, 1 }
  0x10   : > { %s3969_s26 = scalar_select %p3548_p6, 1, 0 }
  0x11   : > { %p2494_p9 = scmp.ge.s32.totalorder %s3457_s18, 1  ;;  %p149_p10 = scmp.lt.s32.totalorder %s3457_s18, 3 }
  0x12   : > { %p3555_p11 = por %p136_p7, %p38_p0  ;;  %p3559_p12 = por %p142_p8, %p44_p3 }
  0x13   : > { %p3563_p13 = pnand %p2494_p9, %p149_p10  ;;  %s3459_s30 = smov [#allocation7]  }
  0x14   : > { %s3970_s27 = scalar_select %p3555_p11, 1, 0 }
  0x15   : > { %s3971_s28 = scalar_select %p3559_p12, 1, 0 }
  0x16   : > { %p3106_p1 = pneg %p3563_p13  ;;  %s161_s5 = sshll.u32 %s3459_s30, 4  ;;  %s162_s5 = int_to_ptr.vmem [resolvable:$true] %s161_s5 }
  0x17   : > { %s3460_s7 = smov [#allocation8]   ;;  %s3314_s9 = scalar_lea.vmem %s162_s5, 384 }
  0x18   : > { %p3571_p2 = pnand %p3106_p1, %p3964_p4  ;;  %s174_s8 = sshll.u32 %s3460_s7, 4  ;;  %s175_s8 = int_to_ptr.vmem [resolvable:$true] %s174_s8 }
  0x19   : > { %p3315_p3 = scmp.ne.s32.totalorder %s162_s5, %s3314_s9  ;;  %p3322_p9 = scmp.lt.s32.totalorder %s162_s5, %s162_s5 }
  0x1a   : > { %p3305_p0 = pneg %p3571_p2  ;;  %p3323_p10 = scmp.lt.s32.totalorder %s3314_s9, %s3314_s9 }
  0x1c   : > { %p3317_p7 = pnand %p3315_p3, %p3305_p0  ;;  %p3324_p12 = por %p3323_p10, %p3322_p9 }
  0x1e   : > { %p3318_p8 = pneg %p3317_p7 }
  0x20   : > { %p3325_p1 = pnand %p3324_p12, %p3318_p8 }
  0x22   : > { %3328 = shalt.err (!%p3325_p1)
}
  0x23   : > { %s3461_s10 = smov 128   ;;  %s3462_s11 = smov 8  }
  0x24   : > { %3109 = dma.hbm_to_vmem [thread:$0]  (!%p3571_p2), %s3961_s2, 384, %s162_s5, [#allocation6], %s3461_s10, %s3461_s10, %s3462_s11  }
  0x25   : > { %s3340_s14 = scalar_lea.vmem %s175_s8, 12288  ;;  %p3348_p11 = scmp.lt.s32.totalorder %s175_s8, %s175_s8 }
  0x26   : > { %p3341_p4 = scmp.ne.s32.totalorder %s175_s8, %s3340_s14  ;;  %p3349_p6 = scmp.lt.s32.totalorder %s3340_s14, %s3340_s14 }
  0x28   : > { %p3343_p3 = pnand %p3341_p4, %p3305_p0  ;;  %p3350_p9 = por %p3349_p6, %p3348_p11 }
  0x2a   : > { %p3344_p7 = pneg %p3343_p3 }
  0x2c   : > { %p3351_p12 = pnand %p3350_p9, %p3344_p7 }
  0x2e   : > { %3354 = shalt.err (!%p3351_p12)
}
  0x2f   : > { %s3463_s20 = smov 64   ;;  %s3464_s22 = smov 4  }
  0x30   : > { %3112 = dma.hbm_to_vmem [thread:$0]  (!%p3571_p2), %s3962_s3, 12288, %s175_s8, [#allocation9], %s3463_s20, %s3463_s20, %s3464_s22  }
  0x31   : > { %p3967_p8 = scmp.ge.s32.totalorder %s3457_s18, 2 }
  0x32   : > { %s188_s5 = sand.u32 (!%p3967_p8), 1, %s3453_s17   ;;  %s2650_s7 = sshll.u32 (!%p3967_p8), %s3457_s18, 8 }
  0x33   : > { %184 = sbr.rel (%p3967_p8) target bundleno = 89 (0x59), region = 24  ;;  %s3598_s9 = sshll.u32 (!%p3967_p8), %s188_s5, 4 }
  0x34   : > { %s3603_s6 = scalar_lea.hbm (!%p3967_p8), %s3959_s0, %s2650_s7  ;;  %s192_s8 = scalar_lea.vmem (!%p3967_p8), [#allocation2], %s3598_s9 }
  0x35   : > { %s199_s12 = sshll.u32 (!%p3967_p8), %s192_s8, 4  ;;  %s3608_s13 = scalar_lea.sflag (!%p3967_p8), [#allocation3], %s188_s5  ;;  %s3606_s12 = int_to_ptr.vmem [resolvable:$true] %s199_s12 }
  0x36   : > { %s3355_s14 = scalar_lea.hbm (!%p3967_p8), %s3603_s6, 256  ;;  %s3359_s23 = scalar_lea.hbm (!%p3967_p8), %s3959_s0, 512 }
  0x37   : > { %p3356_p4 = scmp.ne.s32.totalorder (!%p3967_p8), %s3603_s6, %s3355_s14  ;;  %p3360_p2 = scmp.lt.s32.totalorder (!%p3967_p8), %s3603_s6, %s3959_s0 }
  0x38   : > { %p3361_p0 = scmp.lt.s32.totalorder %s3359_s23, %s3355_s14 }
  0x39   : > { %p3357_p6 = pnand %p3356_p4, %p3542_p5 }
  0x3a   : > { %p3362_p10 = por %p3361_p0, %p3360_p2 }
  0x3b   : > { %p3358_p11 = pneg %p3357_p6 }
  0x3d   : > { %p3363_p1 = pnand %p3362_p10, %p3358_p11 }
  0x3f   : > { %3366 = shalt.err (!%p3363_p1)
}
  0x40   : > { %s3367_s5 = scalar_lea.vmem %s3606_s12, 256  ;;  %s3465_s10 = smov [#allocation2]  }
  0x41   : > { %p3368_p3 = scmp.ne.s32.totalorder %s3606_s12, %s3367_s5  ;;  %s3371_s11 = sshll.u32 %s3465_s10, 4  ;;  %s3372_s11 = int_to_ptr.vmem [resolvable:$false] %s3371_s11 }
  0x42   : > { %s3373_s8 = scalar_lea.vmem %s3372_s11, 512  ;;  %p3374_p12 = scmp.lt.s32.totalorder %s3606_s12, %s3372_s11 }
  0x43   : > { %p3369_p7 = pnand %p3368_p3, %p3542_p5  ;;  %p3375_p4 = scmp.lt.s32.totalorder %s3373_s8, %s3367_s5 }
  0x45   : > { %p3370_p9 = pneg %p3369_p7  ;;  %p3376_p6 = por %p3375_p4, %p3374_p12 }
  0x47   : > { %p3377_p8 = pnand %p3376_p6, %p3370_p9 }
  0x49   : > { %3380 = shalt.err (!%p3377_p8)
}
  0x4a   : > { %s3466_s14 = smov 128   ;;  %s3467_s20 = smov 8  }
  0x4b   : > { %3089 = dma.hbm_to_vmem [thread:$0]  (%p3542_p5), %s3603_s6, 256, %s3606_s12, %s3608_s13, %s3466_s14, %s3466_s14, %s3467_s20  }
  0x4c   : > { %s209_s22 = sand.u32 1, %s3457_s18   ;;  %s2651_s23 = sshll.u32 %s3457_s18, 7 }
  0x4d   : > { %s219_s5 = scalar_lea.hbm %s3960_s1, %s2651_s23  ;;  %s213_s11 = scalar_lea.vmem [#allocation5], %s3598_s9 }
  0x4e   : > { %s3090_s10 = scalar_select %p3542_p5, [#allocation0], [#allocation13] }
  0x4f   : > { %s232_s6 = sshll.u32 %s213_s11, 4  ;;  %s3468_s13 = smov 256   ;;  %s233_s6 = int_to_ptr.vmem [resolvable:$true] %s232_s6 }
  0x50   : > { %s224_s12 = sld [smem:[%s3090_s10]]   ;;  %s3469_s8 = smov 128  }
  0x51   : > { %3091 = sst [smem:[#allocation12]] (%p3542_p5), %s3468_s13  ;;  %s3470_s14 = smov 2  }
  0x52   : > { %3092 = sst [smem:[#allocation12 + $0x1]] (%p3542_p5), %s3469_s8  ;;  %s3471_s20 = smov 64  }
  0x53   : > { %3093 = sst [smem:[#allocation12 + $0x2]] (%p3542_p5), %s3470_s14  ;;  %s3472_s9 = smov 4  }
  0x54   : > { %3094 = sst [smem:[#allocation12 + $0x3]] (%p3542_p5), %s3471_s20  ;;  %s210_s7 = scalar_lea.sflag [#allocation6], %s209_s22 }
  0x55   : > { %3095 = sst [smem:[#allocation12 + $0x4]] (%p3542_p5), %s3471_s20  ;;  %s3473_s10 = smov 131072  }
  0x56   : > { %s2504_s23 = sshll.u32 %s224_s12, 26  ;;  %3096 = sst [smem:[#allocation12 + $0x5]] (%p3542_p5), %s3472_s9 }
  0x57   : > { %s2505_s30 = sadd.s32 134217728, %s2504_s23 }
  0x58   : > { %3097 = dma.general (%p3542_p5), %s219_s5, 256, %s233_s6, %s210_s7, %s3473_s10, [#allocation12], %s2505_s30, 0  }
  0x59 PF: > { %257 = sbr.rel (%p3563_p13) target bundleno = 4158 (0x103e), region = 36  ;;  %s3656_s11 = sand.u32 (!%p3563_p13), 1, %s3449_s16  }
  0x5a   : > { %s2507_s13 = sshll.u32 (!%p3563_p13), %s3656_s11, 4  ;;  %s260_s12 = scalar_lea.sflag (!%p3563_p13), [#allocation3], %s3656_s11 }
  0x5b   : > { %s263_s8 = scalar_lea.vmem (!%p3563_p13), [#allocation2], %s2507_s13  ;;  %p3974_p8 = scmp.ne.s32.totalorder (!%p3563_p13), %s3969_s26, 0 }
  0x5e   : > { %3424 = dma.done.wait (%p3974_p8), %s260_s12, 256  }
  0x5f   : > { %3426 = vsyncadd (%p3974_p8), %s260_s12, 4294967040  ;;  %s268_s25 = sand.u32 1, %s3524_s19   ;;  %s3665_s29 = scalar_lea.vmem [#allocation5], %s2507_s13 }
  0x60   : > { %s269_s22 = scalar_lea.sflag [#allocation6], %s268_s25 }
  0x61   : > { %3428 = dma.done.wait (%p3974_p8), %s269_s22, 256  }
  0x62   : > { %3430 = vsyncadd (%p3974_p8), %s269_s22, 4294967040  ;;  %p3975_p5 = scmp.eq.s32.totalorder %s3524_s19, 0 }
  0x64   : > { %3432 = dma.done.wait (%p3975_p5), [#allocation6], 384   ;;  %p3976_p13 = pmov %p3975_p5 }
  0x65   : > { %p3977_p11 = pmov %p3975_p5 }
  0x66   : > { %3434 = vsyncadd (%p3976_p13), [#allocation6], 4294966912 }
  0x67   : > { %3436 = dma.done.wait (%p3977_p11), [#allocation9], 12288   ;;  %p3978_p2 = pmov %p3975_p5 }
  0x68   : > { %v3679_v0 = vld [vmem:[%s263_s8] sm:$0xff]  ;;  %v3681_v1 = vld [vmem:[%s263_s8 + $0x8] sm:$0xff]  ;;  %v3474_v5 = vmov 0.0   ;;  %vm3475_vm0 = vmmov 0   ;;  %vm824_vm1 = vcmask 1043456   ;;  %vm796_vm3 = vcmask 64512  }
  0x69   : > { %3438 = vsyncadd (%p3978_p2), [#allocation9], 4294955008  ;;  %317 = vadd.xlane.f32.xlu0 %v3679_v0  ;;  %v323_v2 = vmul.f32 %v3679_v0, %v3679_v0  ;;  %v324_v3 = vmul.f32 %v3681_v1, %v3681_v1  ;;  %v3171_v4 = vld [vmem:[#allocation8 + $0x38] sm:$0xff]   ;;  %2797 = vmatprep.subr.bf16.mxu0 %v3474_v5  ;;  %v3173_v7 = vld [vmem:[#allocation8 + $0x30] sm:$0xff]   ;;  %s2511_s26 = sshll.u32 %s3656_s11, 1  ;;  %vm2351_vm4 = vcmask 130112  }
  0x6a   : > { %2817 = vmatprep.subr.bf16.mxu1 %v3474_v5  ;;  %v3172_v6 = vld [vmem:[#allocation8 + $0x78] sm:$0xff]   ;;  %2798 = vmatpush3.bf16.msra.mxu0 %v3171_v4  ;;  %v3174_v8 = vld [vmem:[#allocation8 + $0x70] sm:$0xff]   ;;  %v3175_v9 = vld [vmem:[#allocation8 + $0x28] sm:$0xff]   ;;  %s2647_s5 = sshll.u32 %s3524_s19, 5  ;;  %s309_s6 = scalar_lea.vmem [#allocation10], %s2511_s26  ;;  %vm2362_vm5 = vcmask 1041409  }
  0x6b   : > { %325 = vadd.xlane.f32.xlu1 %v323_v2  ;;  %2818 = vmatpush3.bf16.msra.mxu1 %v3172_v6  ;;  %v3176_v10 = vld [vmem:[#allocation8 + $0x68] sm:$0xff]   ;;  %v3177_v11 = vld [vmem:[#allocation8 + $0x20] sm:$0xff]   ;;  %v3179_v13 = vld [vmem:[#allocation8 + $0x18] sm:$0xff]   ;;  %s2381_s14 = sshll.u32 %s309_s6, 4  ;;  %vm2365_vm6 = vcmask 123904   ;;  %s3922_s9 = scalar_lea.hbm %s3963_s4, %s2647_s5  ;;  %s2382_s14 = int_to_ptr.vmem [resolvable:$true] %s2381_s14 }
  0x6c   : > { %2799 = vmatprep.subr.bf16.mxu0 %v3474_v5  ;;  %2819 = vmatprep.subr.bf16.mxu1 %v3474_v5  ;;  %v3178_v12 = vld [vmem:[#allocation8 + $0x60] sm:$0xff]   ;;  %v3180_v14 = vld [vmem:[#allocation8 + $0x58] sm:$0xff]   ;;  %v3181_v15 = vld [vmem:[#allocation8 + $0x10] sm:$0xff]   ;;  %s2368_s30 = scalar_lea.sflag [#allocation4], %s3656_s11  ;;  %s3381_s19 = scalar_lea.vmem %s2382_s14, 32 }
  0x6d   : > { %319 = vadd.xlane.f32.xlu0 %v3681_v1  ;;  %2813 = vmatprep.mubr.msk.bf16.mxu0 %vm3475_vm0, %v3474_v5  ;;  %v3182_v16 = vld [vmem:[#allocation8 + $0x50] sm:$0xff]   ;;  %v3183_v17 = vld [vmem:[#allocation8 + $0x8] sm:$0xff]   ;;  %v3185_v19 = vld [vmem:[#allocation8] sm:$0xff]   ;;  %p3382_p0 = scmp.ne.s32.totalorder %s2382_s14, %s3381_s19  ;;  %p3979_p10 = scmp.ne.s32.totalorder %s3970_s27, 0 }
  0x6e   : > { %2800 = vmatpush3.bf16.msra.mxu0 %v3173_v7  ;;  %2833 = vmatprep.mubr.msk.bf16.mxu1 %vm3475_vm0, %v3474_v5  ;;  %v3184_v18 = vld [vmem:[#allocation8 + $0x48] sm:$0xff]   ;;  %v3186_v20 = vld [vmem:[#allocation8 + $0x40] sm:$0xff]   ;;  %v3187_v47 = vld [vmem:[#allocation8 + $0xb8] sm:$0xff]   ;;  %s3477_s7 = smov [#allocation10]  }
  0x6f   : > { %327 = vadd.xlane.f32.xlu1 %v324_v3  ;;  %2820 = vmatpush3.bf16.msra.mxu1 %v3174_v8  ;;  %v2512_v38 = vld [vmem:[#allocation7] ss:$0 sm:$0xff]  ;;  %v2513_v43 = vld [vmem:[#allocation7 + $0x2] ss:$0 sm:$0xff]  ;;  %v3188_v49 = vld [vmem:[#allocation8 + $0xb0] sm:$0xff]   ;;  %p3383_p1 = pnand %p3382_p0, %p3979_p10  ;;  %s3385_s10 = sshll.u32 %s3477_s7, 4  ;;  %s3386_s10 = int_to_ptr.vmem [resolvable:$false] %s3385_s10 }
  0x70   : > { %2801 = vmatprep.subr.bf16.mxu0 %v3474_v5  ;;  %2821 = vmatprep.subr.bf16.mxu1 %v3474_v5  ;;  %v3189_v50 = vld [vmem:[#allocation8 + $0xa8] sm:$0xff]   ;;  %v3190_v51 = vld [vmem:[#allocation8 + $0xa0] sm:$0xff]   ;;  %v3191_v52 = vld [vmem:[#allocation8 + $0x98] sm:$0xff]   ;;  %s3387_s13 = scalar_lea.vmem %s3386_s10, 64  ;;  %p3388_p7 = scmp.lt.s32.totalorder %s2382_s14, %s3386_s10 }
  0x71   : > { %v3192_v53 = vld [vmem:[#allocation8 + $0x90] sm:$0xff]   ;;  %v3193_v54 = vld [vmem:[#allocation8 + $0x88] sm:$0xff]   ;;  %v3194_v55 = vld [vmem:[#allocation8 + $0x80] sm:$0xff]   ;;  %p3384_p3 = pneg %p3383_p1  ;;  %p3389_p9 = scmp.lt.s32.totalorder %s3387_s13, %s3381_s19 }
  0x72   : > { %2802 = vmatpush3.bf16.msra.mxu0 %v3175_v9  ;;  %v2525_v56 = vld [vmem:[#allocation7 + $0x6] ss:$0 sm:$0xff]  ;;  %v2514_v62 = vld [vmem:[#allocation7 + $0x4] ss:$0 sm:$0xff] }
  0x73   : > { %2822 = vmatpush3.bf16.msra.mxu1 %v3176_v10  ;;  %2803 = vmatprep.subr.bf16.mxu0 %v3474_v5  ;;  %p3390_p12 = por %p3389_p9, %p3388_p7 }
  0x74   : > { %2823 = vmatprep.subr.bf16.mxu1 %v3474_v5 }
  0x75   : > { %p3391_p4 = pnand %p3390_p12, %p3384_p3 }
  0x76   : > { %2804 = vmatpush3.bf16.msra.mxu0 %v3177_v11 }
  0x77   : > { %2824 = vmatpush3.bf16.msra.mxu1 %v3178_v12  ;;  %2805 = vmatprep.subr.bf16.mxu0 %v3474_v5 }
  0x78   : > { %2825 = vmatprep.subr.bf16.mxu1 %v3474_v5 }
  0x7a   : > { %2806 = vmatpush3.bf16.msra.mxu0 %v3179_v13  ;;  %v2536_v13 = vld [vmem:[#allocation7 + $0x8] ss:$0 sm:$0xff] }
  0x7b   : > { %2826 = vmatpush3.bf16.msra.mxu1 %v3180_v14  ;;  %2807 = vmatprep.subr.bf16.mxu0 %v3474_v5 }
  0x7c   : > { %2827 = vmatprep.subr.bf16.mxu1 %v3474_v5 }
  0x7e   : > { %2808 = vmatpush3.bf16.msra.mxu0 %v3181_v15 }
  0x7f   : > { %2828 = vmatpush3.bf16.msra.mxu1 %v3182_v16  ;;  %2809 = vmatprep.subr.bf16.mxu0 %v3474_v5 }
  0x80   : > { %2829 = vmatprep.subr.bf16.mxu1 %v3474_v5 }
  0x82   : > { %2810 = vmatpush3.bf16.msra.mxu0 %v3183_v17 }
  0x83   : > { %2830 = vmatpush3.bf16.msra.mxu1 %v3184_v18  ;;  %2811 = vmatprep.subr.bf16.mxu0 %v3474_v5 }
  0x84   : > { %2831 = vmatprep.subr.bf16.mxu1 %v3474_v5 }
  0x86   : > { %2812 = vmatpush3.bf16.msra.mxu0 %v3185_v19 }
  0x87   : > { %2832 = vmatpush3.bf16.msra.mxu1 %v3186_v20  ;;  %2837 = vmatprep.subr.bf16.mxu0 %v3474_v5 }
  0x88   : > { %2857 = vmatprep.subr.bf16.mxu1 %v3474_v5 }
  0xf2   : > { %v318_v21 = vpop.xlane.xlu0 %317 }
  0xf3   : > { %v321_v22 = vmul.f32 0.03125, %v318_v21 }
  0xf4   : > { %v326_v23 = vpop.xlane.xlu1 %325 }
  0xf5   : > { %v331_v24 = vmul.f32 %v321_v22, %v321_v22  ;;  %v329_v25 = vmul.f32 0.03125, %v326_v23  ;;  %v335_v35 = vsub.f32 %v3679_v0, %v321_v22  ;;  %v710_v22 = vlaneseq }
  0xf6   : > { %v320_v26 = vpop.xlane.xlu0 %319 }
  0xf7   : > { %v333_v27 = vsub.f32 %v329_v25, %v331_v24  ;;  %v322_v28 = vmul.f32 0.03125, %v320_v26  ;;  %v3737_v23 = vshrl.u32 %v710_v22, 7  ;;  %v3739_v24 = vand.u32 127, %v710_v22 }
  0xf8   : > { %v328_v29 = vpop.xlane.xlu1 %327  ;;  %v3476_v25 = vmov -1e+09  }
  0xf9   : > { %v337_v30 = vadd.f32 1e-05, %v333_v27  ;;  %v332_v31 = vmul.f32 %v322_v28, %v322_v28  ;;  %v330_v32 = vmul.f32 0.03125, %v328_v29  ;;  %v336_v39 = vsub.f32 %v3681_v1, %v322_v28 }
  0xfa   : > { %vm714_vm2 = vcmp.ge.s32.totalorder %v3737_v23, %v3739_v24 }
  0xfb   : > { %3267 = vrsqrt.f32 %v337_v30  ;;  %v334_v33 = vsub.f32 %v330_v32, %v332_v31  ;;  %v3743_v26 = vsel %vm714_vm2, 0.0, %v3476_v25 }
  0xfd   : > { %v338_v34 = vadd.f32 1e-05, %v334_v33 }
  0xff   : > { %3269 = vrsqrt.f32 %v338_v34 }
 0x108   : > { %v3268_v36 = vpop.eup %3267 }
 0x109   : > { %v341_v37 = vmul.f32 %v3268_v36, %v335_v35 }
 0x10b   : > { %v347_v42 = vmul.f32 %v2512_v38, %v341_v37 }
 0x10c   : > { %v3270_v40 = vpop.eup %3269 }
 0x10d   : > { %v342_v41 = vmul.f32 %v3270_v40, %v336_v39  ;;  %v353_v45 = vadd.f32 %v2513_v43, %v347_v42 }
 0x10f   : > { %v348_v44 = vmul.f32 %v2512_v38, %v342_v41 }
 0x111   : > { %v354_v46 = vadd.f32 %v2513_v43, %v348_v44 }
 0x113   : > { %v355_v48 = vpack.c.bf16 %v354_v46, %v353_v45 }
 0x115   : > { %2814 = vmatmul.mubr.bf16.vlgmr.msra.gmra.mxu0 %v355_v48  ;;  %2834 = vmatmul.mubr.bf16.vlgmr.msra.gmra.mxu1 %v355_v48 }
 0x116   : > { %2838 = vmatpush3.bf16.msra.mxu0 %v3187_v47  ;;  %2853 = vmatprep.mubr.msk.bf16.mxu0 %vm3475_vm0, %v3474_v5 }
 0x117   : > { %2839 = vmatprep.subr.bf16.mxu0 %v3474_v5  ;;  %2859 = vmatprep.mubr.msk.bf16.mxu1 %vm3475_vm0, %v3474_v5 }
 0x11a   : > { %2840 = vmatpush3.bf16.msra.mxu0 %v3188_v49  ;;  %v3195_v49 = vld [vmem:[#allocation8 + $0xf8] sm:$0xff]  }
 0x11b   : > { %2841 = vmatprep.subr.bf16.mxu0 %v3474_v5 }
 0x11e   : > { %2842 = vmatpush3.bf16.msra.mxu0 %v3189_v50  ;;  %v3196_v50 = vld [vmem:[#allocation8 + $0xf0] sm:$0xff]  }
 0x11f   : > { %2843 = vmatprep.subr.bf16.mxu0 %v3474_v5 }
 0x122   : > { %2844 = vmatpush3.bf16.msra.mxu0 %v3190_v51  ;;  %v3197_v51 = vld [vmem:[#allocation8 + $0xe8] sm:$0xff]  }
 0x123   : > { %2845 = vmatprep.subr.bf16.mxu0 %v3474_v5 }
 0x126   : > { %2846 = vmatpush3.bf16.msra.mxu0 %v3191_v52  ;;  %v3198_v52 = vld [vmem:[#allocation8 + $0xe0] sm:$0xff]  }
 0x127   : > { %2847 = vmatprep.subr.bf16.mxu0 %v3474_v5 }
 0x12a   : > { %2848 = vmatpush3.bf16.msra.mxu0 %v3192_v53  ;;  %v3199_v53 = vld [vmem:[#allocation8 + $0xd8] sm:$0xff]  }
 0x12b   : > { %2849 = vmatprep.subr.bf16.mxu0 %v3474_v5 }
 0x12e   : > { %2850 = vmatpush3.bf16.msra.mxu0 %v3193_v54 }
 0x12f   : > { %2851 = vmatprep.subr.bf16.mxu0 %v3474_v5 }
 0x132   : > { %2852 = vmatpush3.bf16.msra.mxu0 %v3194_v55 }
 0x133   : > { %2881 = vmatprep.subr.bf16.mxu0 %v3474_v5 }
 0x135   : > { %2854 = vmatmul.mubr.bf16.vlgmr.msra.gmra.mxu0 %v355_v48 }
 0x136   : > { %2897 = vmatprep.mubr.msk.bf16.mxu0 %vm3475_vm0, %v3474_v5  ;;  %2882 = vmatpush3.bf16.msra.mxu0 %v3195_v49 }
 0x137   : > { %2883 = vmatprep.subr.bf16.mxu0 %v3474_v5 }
 0x13a   : > { %2884 = vmatpush3.bf16.msra.mxu0 %v3196_v50 }
 0x13b   : > { %2885 = vmatprep.subr.bf16.mxu0 %v3474_v5 }
 0x13e   : > { %2886 = vmatpush3.bf16.msra.mxu0 %v3197_v51 }
 0x13f   : > { %2887 = vmatprep.subr.bf16.mxu0 %v3474_v5 }
 0x142   : > { %2888 = vmatpush3.bf16.msra.mxu0 %v3198_v52 }
 0x143   : > { %2889 = vmatprep.subr.bf16.mxu0 %v3474_v5 }
 0x146   : > { %2890 = vmatpush3.bf16.msra.mxu0 %v3199_v53 }
 0x147   : > { %2891 = vmatprep.subr.bf16.mxu0 %v3474_v5 }
 0x1d5   : > { %v459_v57 = vpop.f32.mrf.mxu0  ;;  %v578_v58 = vpop.f32.mrf.mxu1 }
 0x1d6   : > { %v579_v59 = vadd.f32 %v2525_v56, %v578_v58  ;;  %v460_v4 = vadd.f32 %v2514_v62, %v459_v57 }
 0x1d7   : > { %v2815_v60 = vpop.f32.mrf.mxu0  ;;  %v2835_v61 = vpop.f32.mrf.mxu1 }
 0x1d8   : > { %v2654_v63 = vpack.c.bf16 %v579_v59, %v579_v59  ;;  %v2652_v9 = vpack.c.bf16 %v460_v4, %v460_v4  ;;  %v3202_v4 = vld [vmem:[#allocation8 + $0xc0] sm:$0xff]  }
 0x1d9   : > { %v462_v2 = vpop.f32.mrf.mxu0  ;;  %v581_v3 = vpop.f32.mrf.mxu1 }
 0x1da   : > { %2858 = vmatpush3.bf16.xpose.msra.mxu1 %v2654_v63  ;;  %v582_v8 = vadd.f32 %v2525_v56, %v581_v3  ;;  %v463_v11 = vadd.f32 %v2514_v62, %v462_v2  ;;  %v3200_v2 = vld [vmem:[#allocation8 + $0xd0] sm:$0xff]   ;;  %v3201_v3 = vld [vmem:[#allocation8 + $0xc8] sm:$0xff]  }
 0x1db   : > { %v2816_v6 = vpop.f32.mrf.mxu0  ;;  %v2836_v7 = vpop.f32.mrf.mxu1  ;;  %2863 = vmatprep.subr.bf16.mxu1 %v3474_v5  ;;  %2892 = vmatpush3.bf16.msra.mxu0 %v3200_v2 }
 0x1dc   : > { %v2655_v10 = vpack.c.bf16 %v582_v8, %v582_v8  ;;  %v2653_v12 = vpack.c.bf16 %v463_v11, %v463_v11  ;;  %2893 = vmatprep.subr.bf16.mxu0 %v3474_v5 }
 0x1df   : > { %2894 = vmatpush3.bf16.msra.mxu0 %v3201_v3 }
 0x1e0   : > { %2895 = vmatprep.subr.bf16.mxu0 %v3474_v5 }
 0x1e1   : > { %2860 = vmatmul.mubr.bf16.vlgmr.msra.gmra.mxu1 %v2652_v9 }
 0x1e2   : > { %2864 = vmatpush3.bf16.xpose.msra.mxu1 %v2655_v10  ;;  %2865 = vmatprep.mubr.msk.bf16.mxu1 %vm3475_vm0, %v3474_v5 }
 0x1e3   : > { %2869 = vmatprep.subr.bf16.mxu1 %v3474_v5  ;;  %2896 = vmatpush3.bf16.msra.mxu0 %v3202_v4 }
 0x1e4   : > { %2921 = vmatprep.subr.bf16.mxu0 %v3474_v5 }
 0x1e9   : > { %2866 = vmatmul.mubr.bf16.vlgmr.msra.gmra.mxu1 %v2653_v12 }
 0x1ea   : > { %2871 = vmatprep.mubr.msk.bf16.mxu1 %vm3475_vm0, %v3474_v5 }
 0x1f5   : > { %v697_v14 = vpop.f32.mrf.mxu0 }
 0x1f6   : > { %v698_v15 = vadd.f32 %v2536_v13, %v697_v14 }
 0x1f7   : > { %v2855_v16 = vpop.f32.mrf.mxu0 }
 0x1f8   : > { %v2656_v17 = vpack.c.bf16 %v698_v15, %v698_v15  ;;  %v2557_v16 = vld [vmem:[#allocation7 + $0xa] ss:$0 sm:$0xff] }
 0x1f9   : > { %v700_v18 = vpop.f32.mrf.mxu0 }
 0x1fa   : > { %v826_v19 = vsel %vm824_vm1, %v2656_v17, 0  ;;  %v3734_v20 = vadd.f32 %v2536_v13, %v700_v18 }
 0x1fb   : > { %v2856_v21 = vpop.f32.mrf.mxu0  ;;  %2870 = vmatpush3.bf16.msra.mxu1 %v826_v19 }
 0x1fc   : > { %2875 = vmatprep.subr.bf16.mxu1 %v3474_v5  ;;  %v2657_v57 = vpack.c.bf16 %v3734_v20, %v3734_v20 }
 0x1fe   : > { %v872_v60 = vsel %vm824_vm1, %v2657_v57, 0  ;;  %v2558_v57 = vld [vmem:[#allocation7 + $0xc] ss:$0 sm:$0xff] }
 0x2a1   : > { %v750_v27 = vpop.f32.mrf.mxu1 }
 0x2a2   : > { %v751_v28 = vadd.f32 %v750_v27, %v3743_v26 }
 0x2a3   : > { %v2861_v29 = vpop.f32.mrf.mxu1 }
 0x2a4   : > { %v797_v30 = vsel %vm796_vm3, %v751_v28, -inf  ;;  %v3205_v29 = vld [vmem:[#allocation8 + $0x128] sm:$0xff]  }
 0x2a5   : > { %798 = vmax.xlane.f32.xlu0 %v797_v30  ;;  %v753_v31 = vpop.f32.mrf.mxu1  ;;  %v3206_v30 = vld [vmem:[#allocation8 + $0x120] sm:$0xff]  }
 0x2a6   : > { %v3207_v31 = vld [vmem:[#allocation8 + $0x118] sm:$0xff]  }
 0x2a7   : > { %v2862_v32 = vpop.f32.mrf.mxu1 }
 0x2a8   : > { %v3208_v32 = vld [vmem:[#allocation8 + $0x110] sm:$0xff]  }
 0x2a9   : > { %v790_v33 = vpop.f32.mrf.mxu1 }
 0x2aa   : > { %v791_v34 = vadd.f32 %v790_v33, %v3743_v26  ;;  %v3209_v33 = vld [vmem:[#allocation8 + $0x108] sm:$0xff]  }
 0x2ab   : > { %v2867_v35 = vpop.f32.mrf.mxu1 }
 0x2ac   : > { %v800_v36 = vsel %vm796_vm3, %v791_v34, -inf  ;;  %v3211_v35 = vld [vmem:[#allocation8 + $0x178] sm:$0xff]  }
 0x2ad   : > { %801 = vmax.xlane.f32.xlu1 %v800_v36  ;;  %v793_v37 = vpop.f32.mrf.mxu1  ;;  %v3212_v36 = vld [vmem:[#allocation8 + $0x170] sm:$0xff]  }
 0x2ae   : > { %v3213_v37 = vld [vmem:[#allocation8 + $0x168] sm:$0xff]  }
 0x2af   : > { %v2868_v38 = vpop.f32.mrf.mxu1 }
 0x2b0   : > { %v3214_v38 = vld [vmem:[#allocation8 + $0x160] sm:$0xff]  }
 0x32e   : > { %v799_v39 = vpop.xlane.xlu0 %798 }
 0x32f   : > { %v803_v40 = vsub.f32 %v751_v28, %v799_v39  ;;  %v3203_v28 = vld [vmem:[#allocation8 + $0x138] sm:$0xff]  }
 0x330   : > { %v3215_v39 = vld [vmem:[#allocation8 + $0x158] sm:$0xff]  }
 0x331   : > { %v805_v41 = vmul.f32 1.442695, %v803_v40 }
 0x333   : > { %3271 = vpow2.f32 %v805_v41 }
 0x336   : > { %v802_v42 = vpop.xlane.xlu1 %801 }
 0x337   : > { %v804_v43 = vsub.f32 %v791_v34, %v802_v42  ;;  %v3210_v34 = vld [vmem:[#allocation8 + $0x100] sm:$0xff]  }
 0x339   : > { %v807_v44 = vmul.f32 1.442695, %v804_v43 }
 0x33b   : > { %3273 = vpow2.f32 %v807_v44 }
 0x340   : > { %v3272_v45 = vpop.eup %3271 }
 0x341   : > { %v809_v46 = vsel %vm796_vm3, %v3272_v45, 0.0 }
 0x342   : > { %810 = vadd.xlane.f32.xlu0 %v809_v46 }
 0x348   : > { %v3274_v47 = vpop.eup %3273 }
 0x349   : > { %v812_v48 = vsel %vm796_vm3, %v3274_v47, 0.0 }
 0x34a   : > { %813 = vadd.xlane.f32.xlu1 %v812_v48 }
 0x3cb   : > { %v811_v54 = vpop.xlane.xlu0 %810 }
 0x3cc   : > { %3275 = vrcp.f32 %v811_v54 }
 0x3d3   : > { %v814_v55 = vpop.xlane.xlu1 %813 }
 0x3d4   : > { %3277 = vrcp.f32 %v814_v55 }
 0x3d9   : > { %v3276_v56 = vpop.eup %3275 }
 0x3da   : > { %v817_v58 = vmul.f32 %v3276_v56, %v3272_v45 }
 0x3dc   : > { %v819_v59 = vpack.c.bf16 %v817_v58, %v817_v58 }
 0x3de   : > { %2872 = vmatmul.mubr.msk.bf16.vlgmr.msra.gmra.mxu1 %vm796_vm3, %v819_v59 }
 0x3df   : > { %2876 = vmatpush3.bf16.msra.mxu1 %v872_v60  ;;  %2877 = vmatprep.mubr.msk.bf16.mxu1 %vm3475_vm0, %v3474_v5 }
 0x3e0   : > { %2901 = vmatprep.subr.bf16.mxu1 %v3474_v5 }
 0x3e1   : > { %v3278_v61 = vpop.eup %3277 }
 0x3e2   : > { %v818_v62 = vmul.f32 %v3278_v61, %v3274_v47 }
 0x3e4   : > { %v820_v63 = vpack.c.bf16 %v818_v62, %v818_v62  ;;  %v2559_v62 = vld [vmem:[#allocation7 + $0xe] ss:$0 sm:$0xff] }
 0x3e6   : > { %2878 = vmatmul.mubr.msk.bf16.vlgmr.msra.gmra.mxu1 %vm796_vm3, %v820_v63 }
 0x3e7   : > { %2917 = vmatprep.mubr.msk.bf16.mxu1 %vm3475_vm0, %v3474_v5  ;;  %2902 = vmatpush3.bf16.msra.mxu1 %v3203_v28 }
 0x3e8   : > { %2903 = vmatprep.subr.bf16.mxu1 %v3474_v5 }
 0x49e   : > { %v862_v6 = vpop.f32.mrf.mxu1 }
 0x4a0   : > { %v2873_v7 = vpop.f32.mrf.mxu1 }
 0x4a1   : > { %v3217_v7 = vld [vmem:[#allocation8 + $0x148] sm:$0xff]  }
 0x4a2   : > { %v865_v8 = vpop.f32.mrf.mxu1 }
 0x4a3   : > { %v3218_v8 = vld [vmem:[#allocation8 + $0x140] sm:$0xff]  }
 0x4a4   : > { %v2874_v9 = vpop.f32.mrf.mxu1 }
 0x4a5   : > { %v2560_v9 = vld [vmem:[#allocation7 + $0x10] ss:$0 sm:$0xff] }
 0x4a6   : > { %v908_v10 = vpop.f32.mrf.mxu1 }
 0x4a7   : > { %v914_v11 = vpack.c.bf16 %v908_v10, %v862_v6  ;;  %v3216_v6 = vld [vmem:[#allocation8 + $0x150] sm:$0xff]  }
 0x4a8   : > { %v2879_v12 = vpop.f32.mrf.mxu1 }
 0x4a9   : > { %2898 = vmatmul.mubr.bf16.vlgmr.msra.gmra.mxu0 %v914_v11 }
 0x4aa   : > { %v911_v13 = vpop.f32.mrf.mxu1  ;;  %2937 = vmatprep.mubr.msk.bf16.mxu0 %vm3475_vm0, %v3474_v5  ;;  %2922 = vmatpush3.bf16.msra.mxu0 %v3211_v35  ;;  %v3223_v35 = vld [vmem:[#allocation8 + $0x1a8] sm:$0xff]  }
 0x4ab   : > { %2923 = vmatprep.subr.bf16.mxu0 %v3474_v5 }
 0x4ac   : > { %v2880_v14 = vpop.f32.mrf.mxu1 }
 0x4ae   : > { %2924 = vmatpush3.bf16.msra.mxu0 %v3212_v36  ;;  %v3224_v36 = vld [vmem:[#allocation8 + $0x1e8] sm:$0xff]  }
 0x4af   : > { %2925 = vmatprep.subr.bf16.mxu0 %v3474_v5 }
 0x4b2   : > { %2926 = vmatpush3.bf16.msra.mxu0 %v3213_v37  ;;  %v3225_v37 = vld [vmem:[#allocation8 + $0x1a0] sm:$0xff]  }
 0x4b3   : > { %2927 = vmatprep.subr.bf16.mxu0 %v3474_v5 }
 0x4b6   : > { %2928 = vmatpush3.bf16.msra.mxu0 %v3214_v38  ;;  %v3226_v38 = vld [vmem:[#allocation8 + $0x1e0] sm:$0xff]  }
 0x4b7   : > { %2929 = vmatprep.subr.bf16.mxu0 %v3474_v5 }
 0x4ba   : > { %2930 = vmatpush3.bf16.msra.mxu0 %v3215_v39  ;;  %v3227_v39 = vld [vmem:[#allocation8 + $0x198] sm:$0xff]  }
 0x4bb   : > { %2931 = vmatprep.subr.bf16.mxu0 %v3474_v5 }
 0x4be   : > { %2932 = vmatpush3.bf16.msra.mxu0 %v3216_v6 }
 0x4bf   : > { %2933 = vmatprep.subr.bf16.mxu0 %v3474_v5 }
 0x4c2   : > { %2934 = vmatpush3.bf16.msra.mxu0 %v3217_v7 }
 0x4c3   : > { %2935 = vmatprep.subr.bf16.mxu0 %v3474_v5 }
 0x4c6   : > { %2936 = vmatpush3.bf16.msra.mxu0 %v3218_v8  ;;  %v2579_v8 = vld [vmem:[#allocation7 + $0x3] ss:$0 sm:$0xff] }
 0x4c7   : > { %2961 = vmatprep.subr.bf16.mxu0 %v3474_v5 }
 0x569   : > { %v1014_v15 = vpop.f32.mrf.mxu0 }
 0x56a   : > { %v1021_v17 = vadd.f32 %v1014_v15, %v3679_v0 }
 0x56b   : > { %v2899_v18 = vpop.f32.mrf.mxu0 }
 0x56c   : > { %v3772_v19 = vadd.f32 %v2557_v16, %v1021_v17 }
 0x56d   : > { %v1017_v20 = vpop.f32.mrf.mxu0 }
 0x56e   : > { %v1022_v21 = vadd.f32 %v1017_v20, %v3681_v1  ;;  %1032 = vadd.xlane.f32.xlu0 %v3772_v19  ;;  %v1038_v27 = vmul.f32 %v3772_v19, %v3772_v19  ;;  %v3204_v1 = vld [vmem:[#allocation8 + $0x130] sm:$0xff]  }
 0x56f   : > { %v2900_v22 = vpop.f32.mrf.mxu0  ;;  %2904 = vmatpush3.bf16.msra.mxu1 %v3204_v1 }
 0x570   : > { %v3776_v25 = vadd.f32 %v2557_v16, %v1022_v21  ;;  %2905 = vmatprep.subr.bf16.mxu1 %v3474_v5  ;;  %v2577_v21 = vld [vmem:[#allocation7 + $0x12] ss:$0 sm:$0xff] }
 0x572   : > { %1040 = vadd.xlane.f32.xlu0 %v1038_v27  ;;  %1034 = vadd.xlane.f32.xlu1 %v3776_v25  ;;  %v1039_v0 = vmul.f32 %v3776_v25, %v3776_v25 }
 0x573   : > { %2906 = vmatpush3.bf16.msra.mxu1 %v3205_v29 }
 0x574   : > { %2907 = vmatprep.subr.bf16.mxu1 %v3474_v5 }
 0x576   : > { %1042 = vadd.xlane.f32.xlu1 %v1039_v0 }
 0x577   : > { %2908 = vmatpush3.bf16.msra.mxu1 %v3206_v30 }
 0x578   : > { %2909 = vmatprep.subr.bf16.mxu1 %v3474_v5 }
 0x57b   : > { %2910 = vmatpush3.bf16.msra.mxu1 %v3207_v31 }
 0x57c   : > { %2911 = vmatprep.subr.bf16.mxu1 %v3474_v5 }
 0x57f   : > { %2912 = vmatpush3.bf16.msra.mxu1 %v3208_v32  ;;  %v3219_v32 = vld [vmem:[#allocation8 + $0x1b8] sm:$0xff]  }
 0x580   : > { %2913 = vmatprep.subr.bf16.mxu1 %v3474_v5 }
 0x583   : > { %2914 = vmatpush3.bf16.msra.mxu1 %v3209_v33  ;;  %v3220_v33 = vld [vmem:[#allocation8 + $0x1f8] sm:$0xff]  }
 0x584   : > { %2915 = vmatprep.subr.bf16.mxu1 %v3474_v5 }
 0x587   : > { %2916 = vmatpush3.bf16.msra.mxu1 %v3210_v34  ;;  %v3222_v34 = vld [vmem:[#allocation8 + $0x1f0] sm:$0xff]  }
 0x588   : > { %2941 = vmatprep.subr.bf16.mxu1 %v3474_v5 }
 0x5f7   : > { %v1033_v40 = vpop.xlane.xlu0 %1032 }
 0x5f8   : > { %v1036_v41 = vmul.f32 0.03125, %v1033_v40  ;;  %v3228_v40 = vld [vmem:[#allocation8 + $0x1d8] sm:$0xff]  }
 0x5fa   : > { %v1046_v44 = vmul.f32 %v1036_v41, %v1036_v41  ;;  %v1050_v54 = vsub.f32 %v3772_v19, %v1036_v41  ;;  %v3229_v41 = vld [vmem:[#allocation8 + $0x190] sm:$0xff]  }
 0x5fb   : > { %v1041_v42 = vpop.xlane.xlu0 %1040  ;;  %v1035_v43 = vpop.xlane.xlu1 %1034 }
 0x5fc   : > { %v1044_v45 = vmul.f32 0.03125, %v1041_v42  ;;  %v1037_v46 = vmul.f32 0.03125, %v1035_v43  ;;  %v3230_v42 = vld [vmem:[#allocation8 + $0x1d0] sm:$0xff]   ;;  %v3231_v43 = vld [vmem:[#allocation8 + $0x188] sm:$0xff]  }
 0x5fe   : > { %v1048_v47 = vsub.f32 %v1044_v45, %v1046_v44  ;;  %v1047_v50 = vmul.f32 %v1037_v46, %v1037_v46  ;;  %v1051_v58 = vsub.f32 %v3776_v25, %v1037_v46  ;;  %v3232_v44 = vld [vmem:[#allocation8 + $0x1c8] sm:$0xff]   ;;  %v3233_v45 = vld [vmem:[#allocation8 + $0x180] sm:$0xff]  }
 0x5ff   : > { %v1043_v48 = vpop.xlane.xlu1 %1042  ;;  %v3234_v46 = vld [vmem:[#allocation8 + $0x1c0] sm:$0xff]  }
 0x600   : > { %v1052_v49 = vadd.f32 1e-05, %v1048_v47  ;;  %v1045_v51 = vmul.f32 0.03125, %v1043_v48 }
 0x602   : > { %3279 = vrsqrt.f32 %v1052_v49  ;;  %v1049_v52 = vsub.f32 %v1045_v51, %v1047_v50 }
 0x604   : > { %v1053_v53 = vadd.f32 1e-05, %v1049_v52 }
 0x606   : > { %3281 = vrsqrt.f32 %v1053_v53 }
 0x60f   : > { %v3280_v55 = vpop.eup %3279 }
 0x610   : > { %v1056_v56 = vmul.f32 %v3280_v55, %v1050_v54 }
 0x612   : > { %v1062_v61 = vmul.f32 %v2558_v57, %v1056_v56 }
 0x613   : > { %v3282_v59 = vpop.eup %3281 }
 0x614   : > { %v1057_v60 = vmul.f32 %v3282_v59, %v1051_v58  ;;  %v1068_v2 = vadd.f32 %v2559_v62, %v1062_v61 }
 0x616   : > { %v1063_v63 = vmul.f32 %v2558_v57, %v1057_v60 }
 0x618   : > { %v1069_v3 = vadd.f32 %v2559_v62, %v1063_v63 }
 0x61a   : > { %v1070_v4 = vpack.c.bf16 %v1069_v3, %v1068_v2  ;;  %v2578_v2 = vld [vmem:[#allocation7 + $0x1] ss:$0 sm:$0xff] }
 0x61c   : > { %2918 = vmatmul.mubr.bf16.vlgmr.msra.gmra.mxu1 %v1070_v4 }
 0x61d   : > { %2957 = vmatprep.mubr.msk.bf16.mxu1 %vm3475_vm0, %v3474_v5  ;;  %2942 = vmatpush3.bf16.msra.mxu1 %v3219_v32 }
 0x61e   : > { %2943 = vmatprep.subr.bf16.mxu1 %v3474_v5 }
 0x6dc   : > { %v1175_v10 = vpop.f32.mrf.mxu1 }
 0x6dd   : > { %v1176_v12 = vadd.f32 %v2560_v9, %v1175_v10 }
 0x6de   : > { %v2919_v11 = vpop.f32.mrf.mxu1 }
 0x6df   : > { %v1182_v16 = vmax.f32 %v1176_v12, 0.0  ;;  %v3235_v12 = vld [vmem:[#allocation8 + $0x238] sm:$0xff]  }
 0x6e0   : > { %v1178_v13 = vpop.f32.mrf.mxu1 }
 0x6e1   : > { %v1179_v14 = vadd.f32 %v2560_v9, %v1178_v13 }
 0x6e2   : > { %v2920_v15 = vpop.f32.mrf.mxu1 }
 0x6e3   : > { %v1183_v17 = vmax.f32 %v1179_v14, 0.0  ;;  %v3236_v14 = vld [vmem:[#allocation8 + $0x230] sm:$0xff]   ;;  %v3237_v15 = vld [vmem:[#allocation8 + $0x228] sm:$0xff]  }
 0x6e5   : > { %v1184_v18 = vpack.c.bf16 %v1183_v17, %v1182_v16  ;;  %v3238_v16 = vld [vmem:[#allocation8 + $0x220] sm:$0xff]   ;;  %v3239_v17 = vld [vmem:[#allocation8 + $0x218] sm:$0xff]  }
 0x6e7   : > { %2938 = vmatmul.mubr.bf16.vlgmr.msra.gmra.mxu0 %v1184_v18  ;;  %v3240_v18 = vld [vmem:[#allocation8 + $0x210] sm:$0xff]  }
 0x6e8   : > { %2977 = vmatprep.mubr.msk.bf16.mxu0 %vm3475_vm0, %v3474_v5  ;;  %2962 = vmatpush3.bf16.msra.mxu0 %v3220_v33 }
 0x6e9   : > { %2963 = vmatprep.subr.bf16.mxu0 %v3474_v5 }
 0x6ec   : > { %2964 = vmatpush3.bf16.msra.mxu0 %v3222_v34 }
 0x6ed   : > { %2965 = vmatprep.subr.bf16.mxu0 %v3474_v5 }
 0x6f0   : > { %2966 = vmatpush3.bf16.msra.mxu0 %v3224_v36 }
 0x6f1   : > { %2967 = vmatprep.subr.bf16.mxu0 %v3474_v5 }
 0x6f4   : > { %2968 = vmatpush3.bf16.msra.mxu0 %v3226_v38 }
 0x6f5   : > { %2969 = vmatprep.subr.bf16.mxu0 %v3474_v5 }
 0x6f8   : > { %2970 = vmatpush3.bf16.msra.mxu0 %v3228_v40 }
 0x6f9   : > { %2971 = vmatprep.subr.bf16.mxu0 %v3474_v5 }
 0x6fc   : > { %2972 = vmatpush3.bf16.msra.mxu0 %v3230_v42  ;;  %v2602_v42 = vld [vmem:[#allocation7 + $0x9] ss:$0 sm:$0xff] }
 0x6fd   : > { %2973 = vmatprep.subr.bf16.mxu0 %v3474_v5 }
 0x700   : > { %2974 = vmatpush3.bf16.msra.mxu0 %v3232_v44 }
 0x701   : > { %2975 = vmatprep.subr.bf16.mxu0 %v3474_v5 }
 0x704   : > { %2976 = vmatpush3.bf16.msra.mxu0 %v3234_v46 }
 0x705   : > { %3025 = vmatprep.subr.bf16.mxu0 %v3474_v5 }
 0x7a7   : > { %v1284_v20 = vpop.f32.mrf.mxu0 }
 0x7a8   : > { %v1291_v22 = vadd.f32 %v1284_v20, %v3772_v19  ;;  %v3241_v20 = vld [vmem:[#allocation8 + $0x208] sm:$0xff]  }
 0x7a9   : > { %v2939_v27 = vpop.f32.mrf.mxu0 }
 0x7aa   : > { %v3806_v0 = vadd.f32 %v2577_v21, %v1291_v22  ;;  %v2591_v22 = vld [vmem:[#allocation7 + $0x7] ss:$0 sm:$0xff] }
 0x7ab   : > { %v1287_v28 = vpop.f32.mrf.mxu0 }
 0x7ac   : > { %v1292_v1 = vadd.f32 %v1287_v28, %v3776_v25  ;;  %1302 = vadd.xlane.f32.xlu0 %v3806_v0  ;;  %v1308_v31 = vmul.f32 %v3806_v0, %v3806_v0  ;;  %v3221_v25 = vld [vmem:[#allocation8 + $0x1b0] sm:$0xff]  }
 0x7ad   : > { %v2940_v29 = vpop.f32.mrf.mxu0  ;;  %2944 = vmatpush3.bf16.msra.mxu1 %v3221_v25 }
 0x7ae   : > { %v3810_v30 = vadd.f32 %v2577_v21, %v1292_v1  ;;  %2945 = vmatprep.subr.bf16.mxu1 %v3474_v5  ;;  %v3242_v21 = vld [vmem:[#allocation8 + $0x200] sm:$0xff]  }
 0x7b0   : > { %1310 = vadd.xlane.f32.xlu0 %v1308_v31  ;;  %1304 = vadd.xlane.f32.xlu1 %v3810_v30  ;;  %v1309_v19 = vmul.f32 %v3810_v30, %v3810_v30 }
 0x7b1   : > { %2946 = vmatpush3.bf16.msra.mxu1 %v3223_v35 }
 0x7b2   : > { %2947 = vmatprep.subr.bf16.mxu1 %v3474_v5 }
 0x7b4   : > { %1312 = vadd.xlane.f32.xlu1 %v1309_v19  ;;  %v2580_v19 = vld [vmem:[#allocation7 + $0x5] ss:$0 sm:$0xff] }
 0x7b5   : > { %2948 = vmatpush3.bf16.msra.mxu1 %v3225_v37 }
 0x7b6   : > { %2949 = vmatprep.subr.bf16.mxu1 %v3474_v5 }
 0x7b9   : > { %2950 = vmatpush3.bf16.msra.mxu1 %v3227_v39 }
 0x7ba   : > { %2951 = vmatprep.subr.bf16.mxu1 %v3474_v5 }
 0x7bd   : > { %2952 = vmatpush3.bf16.msra.mxu1 %v3229_v41 }
 0x7be   : > { %2953 = vmatprep.subr.bf16.mxu1 %v3474_v5 }
 0x7c1   : > { %2954 = vmatpush3.bf16.msra.mxu1 %v3231_v43 }
 0x7c2   : > { %2955 = vmatprep.subr.bf16.mxu1 %v3474_v5 }
 0x7c5   : > { %2956 = vmatpush3.bf16.msra.mxu1 %v3233_v45 }
 0x7c6   : > { %2981 = vmatprep.subr.bf16.mxu1 %v3474_v5 }
 0x835   : > { %v1303_v47 = vpop.xlane.xlu0 %1302 }
 0x836   : > { %v1306_v48 = vmul.f32 0.03125, %v1303_v47 }
 0x838   : > { %v1316_v51 = vmul.f32 %v1306_v48, %v1306_v48  ;;  %v1320_v61 = vsub.f32 %v3806_v0, %v1306_v48 }
 0x839   : > { %v1311_v49 = vpop.xlane.xlu0 %1310  ;;  %v1305_v50 = vpop.xlane.xlu1 %1304 }
 0x83a   : > { %v1314_v52 = vmul.f32 0.03125, %v1311_v49  ;;  %v1307_v53 = vmul.f32 0.03125, %v1305_v50 }
 0x83c   : > { %v1318_v54 = vsub.f32 %v1314_v52, %v1316_v51  ;;  %v1317_v57 = vmul.f32 %v1307_v53, %v1307_v53  ;;  %v1321_v3 = vsub.f32 %v3810_v30, %v1307_v53 }
 0x83d   : > { %v1313_v55 = vpop.xlane.xlu1 %1312 }
 0x83e   : > { %v1322_v56 = vadd.f32 1e-05, %v1318_v54  ;;  %v1315_v58 = vmul.f32 0.03125, %v1313_v55 }
 0x840   : > { %3283 = vrsqrt.f32 %v1322_v56  ;;  %v1319_v59 = vsub.f32 %v1315_v58, %v1317_v57 }
 0x842   : > { %v1323_v60 = vadd.f32 1e-05, %v1319_v59 }
 0x844   : > { %3285 = vrsqrt.f32 %v1323_v60 }
 0x84d   : > { %v3284_v62 = vpop.eup %3283 }
 0x84e   : > { %v1326_v63 = vmul.f32 %v3284_v62, %v1320_v61 }
 0x850   : > { %v1332_v7 = vmul.f32 %v2578_v2, %v1326_v63 }
 0x851   : > { %v3286_v4 = vpop.eup %3285 }
 0x852   : > { %v1327_v6 = vmul.f32 %v3286_v4, %v1321_v3  ;;  %v1338_v10 = vadd.f32 %v2579_v8, %v1332_v7 }
 0x854   : > { %v1333_v9 = vmul.f32 %v2578_v2, %v1327_v6 }
 0x856   : > { %v1339_v11 = vadd.f32 %v2579_v8, %v1333_v9 }
 0x858   : > { %v1340_v13 = vpack.c.bf16 %v1339_v11, %v1338_v10  ;;  %v3243_v11 = vld [vmem:[#allocation8 + $0x278] sm:$0xff]  }
 0x85a   : > { %2958 = vmatmul.mubr.bf16.vlgmr.msra.gmra.mxu1 %v1340_v13  ;;  %2978 = vmatmul.mubr.bf16.vlgmr.msra.gmra.mxu0 %v1340_v13 }
 0x85b   : > { %2982 = vmatpush3.bf16.msra.mxu1 %v3235_v12  ;;  %2997 = vmatprep.mubr.msk.bf16.mxu1 %vm3475_vm0, %v3474_v5  ;;  %v3244_v12 = vld [vmem:[#allocation8 + $0x270] sm:$0xff]  }
 0x85c   : > { %2983 = vmatprep.subr.bf16.mxu1 %v3474_v5  ;;  %3041 = vmatprep.mubr.msk.bf16.mxu0 %vm3475_vm0, %v3474_v5 }
 0x85d   : > { %3026 = vmatpush3.bf16.msra.mxu0 %v3243_v11 }
 0x85e   : > { %3027 = vmatprep.subr.bf16.mxu0 %v3474_v5 }
 0x85f   : > { %2984 = vmatpush3.bf16.msra.mxu1 %v3236_v14  ;;  %v3246_v14 = vld [vmem:[#allocation8 + $0x260] sm:$0xff]  }
 0x860   : > { %2985 = vmatprep.subr.bf16.mxu1 %v3474_v5 }
 0x861   : > { %3028 = vmatpush3.bf16.msra.mxu0 %v3244_v12 }
 0x862   : > { %3029 = vmatprep.subr.bf16.mxu0 %v3474_v5 }
 0x863   : > { %2986 = vmatpush3.bf16.msra.mxu1 %v3237_v15  ;;  %v3247_v15 = vld [vmem:[#allocation8 + $0x258] sm:$0xff]  }
 0x864   : > { %2987 = vmatprep.subr.bf16.mxu1 %v3474_v5 }
 0x867   : > { %2988 = vmatpush3.bf16.msra.mxu1 %v3238_v16 }
 0x868   : > { %2989 = vmatprep.subr.bf16.mxu1 %v3474_v5 }
 0x86b   : > { %2990 = vmatpush3.bf16.msra.mxu1 %v3239_v17 }
 0x86c   : > { %2991 = vmatprep.subr.bf16.mxu1 %v3474_v5 }
 0x86f   : > { %2992 = vmatpush3.bf16.msra.mxu1 %v3240_v18 }
 0x870   : > { %2993 = vmatprep.subr.bf16.mxu1 %v3474_v5 }
 0x873   : > { %2994 = vmatpush3.bf16.msra.mxu1 %v3241_v20 }
 0x874   : > { %2995 = vmatprep.subr.bf16.mxu1 %v3474_v5 }
 0x877   : > { %2996 = vmatpush3.bf16.msra.mxu1 %v3242_v21 }
 0x878   : > { %3001 = vmatprep.subr.bf16.mxu1 %v3474_v5 }
 0x87a   : > { %2998 = vmatmul.mubr.bf16.vlgmr.msra.gmra.mxu1 %v1340_v13  ;;  %v3245_v13 = vld [vmem:[#allocation8 + $0x268] sm:$0xff]  }
 0x87b   : > { %3003 = vmatprep.mubr.msk.bf16.mxu1 %vm3475_vm0, %v3474_v5  ;;  %3030 = vmatpush3.bf16.msra.mxu0 %v3245_v13 }
 0x87c   : > { %3031 = vmatprep.subr.bf16.mxu0 %v3474_v5 }
 0x87f   : > { %3032 = vmatpush3.bf16.msra.mxu0 %v3246_v14 }
 0x880   : > { %3033 = vmatprep.subr.bf16.mxu0 %v3474_v5 }
 0x883   : > { %3034 = vmatpush3.bf16.msra.mxu0 %v3247_v15 }
 0x884   : > { %3035 = vmatprep.subr.bf16.mxu0 %v3474_v5 }
 0x91a   : > { %v1445_v27 = vpop.f32.mrf.mxu1  ;;  %v1564_v28 = vpop.f32.mrf.mxu0 }
 0x91b   : > { %v1565_v1 = vadd.f32 %v2591_v22, %v1564_v28  ;;  %v1446_v34 = vadd.f32 %v2580_v19, %v1445_v27 }
 0x91c   : > { %v2959_v29 = vpop.f32.mrf.mxu1  ;;  %v2979_v31 = vpop.f32.mrf.mxu0 }
 0x91d   : > { %v2660_v32 = vpack.c.bf16 %v1565_v1, %v1565_v1  ;;  %v2658_v38 = vpack.c.bf16 %v1446_v34, %v1446_v34  ;;  %v3248_v31 = vld [vmem:[#allocation8 + $0x250] sm:$0xff]  }
 0x91e   : > { %v1448_v33 = vpop.f32.mrf.mxu1  ;;  %v1567_v25 = vpop.f32.mrf.mxu0  ;;  %3036 = vmatpush3.bf16.msra.mxu0 %v3248_v31 }
 0x91f   : > { %3002 = vmatpush3.bf16.xpose.msra.mxu1 %v2660_v32  ;;  %v1568_v37 = vadd.f32 %v2591_v22, %v1567_v25  ;;  %v1449_v40 = vadd.f32 %v2580_v19, %v1448_v33  ;;  %3037 = vmatprep.subr.bf16.mxu0 %v3474_v5  ;;  %v3249_v19 = vld [vmem:[#allocation8 + $0x248] sm:$0xff]   ;;  %v3250_v32 = vld [vmem:[#allocation8 + $0x240] sm:$0xff]  }
 0x920   : > { %v2960_v35 = vpop.f32.mrf.mxu1  ;;  %v2980_v36 = vpop.f32.mrf.mxu0  ;;  %3007 = vmatprep.subr.bf16.mxu1 %v3474_v5 }
 0x921   : > { %v2661_v39 = vpack.c.bf16 %v1568_v37, %v1568_v37  ;;  %v2659_v41 = vpack.c.bf16 %v1449_v40, %v1449_v40 }
 0x922   : > { %3038 = vmatpush3.bf16.msra.mxu0 %v3249_v19 }
 0x923   : > { %3039 = vmatprep.subr.bf16.mxu0 %v3474_v5 }
 0x926   : > { %3004 = vmatmul.mubr.bf16.vlgmr.msra.gmra.mxu1 %v2658_v38  ;;  %3040 = vmatpush3.bf16.msra.mxu0 %v3250_v32  ;;  %v3264_v32 = vld [vmem:[#allocation8 + $0x2d0] sm:$0xff]  }
 0x927   : > { %3008 = vmatpush3.bf16.xpose.msra.mxu1 %v2661_v39  ;;  %3009 = vmatprep.mubr.msk.bf16.mxu1 %vm3475_vm0, %v3474_v5 }
 0x928   : > { %3013 = vmatprep.subr.bf16.mxu1 %v3474_v5  ;;  %3065 = vmatprep.subr.bf16.mxu0 %v3474_v5 }
 0x92e   : > { %3010 = vmatmul.mubr.bf16.vlgmr.msra.gmra.mxu1 %v2659_v41 }
 0x92f   : > { %3015 = vmatprep.mubr.msk.bf16.mxu1 %vm3475_vm0, %v3474_v5 }
 0x93a   : > { %v1683_v43 = vpop.f32.mrf.mxu1 }
 0x93b   : > { %v1684_v44 = vadd.f32 %v2602_v42, %v1683_v43 }
 0x93c   : > { %v2999_v45 = vpop.f32.mrf.mxu1 }
 0x93d   : > { %v2662_v46 = vpack.c.bf16 %v1684_v44, %v1684_v44 }
 0x93e   : > { %v1686_v47 = vpop.f32.mrf.mxu1 }
 0x93f   : > { %v1804_v48 = vsel %vm824_vm1, %v2662_v46, 0  ;;  %v1687_v49 = vadd.f32 %v2602_v42, %v1686_v47  ;;  %v2623_v42 = vld [vmem:[#allocation7 + $0xb] ss:$0 sm:$0xff] }
 0x940   : > { %v3000_v50 = vpop.f32.mrf.mxu1  ;;  %3014 = vmatpush3.bf16.msra.mxu1 %v1804_v48 }
 0x941   : > { %3019 = vmatprep.subr.bf16.mxu1 %v3474_v5  ;;  %v2663_v20 = vpack.c.bf16 %v1687_v49, %v1687_v49 }
 0x943   : > { %v1850_v27 = vsel %vm824_vm1, %v2663_v20, 0 }
 0x9e6   : > { %v1730_v51 = vpop.f32.mrf.mxu1 }
 0x9e7   : > { %v1731_v52 = vadd.f32 %v1730_v51, %v3743_v26  ;;  %v3251_v51 = vld [vmem:[#allocation8 + $0x2b8] sm:$0xff]  }
 0x9e8   : > { %v3005_v53 = vpop.f32.mrf.mxu1 }
 0x9e9   : > { %v1776_v54 = vsel %vm796_vm3, %v1731_v52, -inf  ;;  %v3254_v53 = vld [vmem:[#allocation8 + $0x2a0] sm:$0xff]  }
 0x9ea   : > { %1777 = vmax.xlane.f32.xlu0 %v1776_v54  ;;  %v1733_v55 = vpop.f32.mrf.mxu1  ;;  %v3255_v54 = vld [vmem:[#allocation8 + $0x298] sm:$0xff]  }
 0x9eb   : > { %v3256_v55 = vld [vmem:[#allocation8 + $0x290] sm:$0xff]  }
 0x9ec   : > { %v3006_v56 = vpop.f32.mrf.mxu1 }
 0x9ed   : > { %v3257_v56 = vld [vmem:[#allocation8 + $0x288] sm:$0xff]  }
 0x9ee   : > { %v1770_v57 = vpop.f32.mrf.mxu1 }
 0x9ef   : > { %v1771_v58 = vadd.f32 %v1770_v57, %v3743_v26  ;;  %v3258_v57 = vld [vmem:[#allocation8 + $0x280] sm:$0xff]  }
 0x9f0   : > { %v3011_v59 = vpop.f32.mrf.mxu1 }
 0x9f1   : > { %v1779_v60 = vsel %vm796_vm3, %v1771_v58, -inf  ;;  %v3260_v59 = vld [vmem:[#allocation8 + $0x2f0] sm:$0xff]  }
 0x9f2   : > { %1780 = vmax.xlane.f32.xlu1 %v1779_v60  ;;  %v1773_v61 = vpop.f32.mrf.mxu1  ;;  %v3261_v60 = vld [vmem:[#allocation8 + $0x2e8] sm:$0xff]  }
 0x9f3   : > { %v3262_v61 = vld [vmem:[#allocation8 + $0x2e0] sm:$0xff]  }
 0x9f4   : > { %v3012_v62 = vpop.f32.mrf.mxu1 }
 0x9f5   : > { %v3263_v62 = vld [vmem:[#allocation8 + $0x2d8] sm:$0xff]  }
 0xa73   : > { %v1778_v63 = vpop.xlane.xlu0 %1777 }
 0xa74   : > { %v1782_v2 = vsub.f32 %v1731_v52, %v1778_v63  ;;  %v3253_v52 = vld [vmem:[#allocation8 + $0x2a8] sm:$0xff]  }
 0xa76   : > { %v1784_v3 = vmul.f32 1.442695, %v1782_v2 }
 0xa78   : > { %3287 = vpow2.f32 %v1784_v3 }
 0xa7b   : > { %v1781_v4 = vpop.xlane.xlu1 %1780 }
 0xa7c   : > { %v1783_v6 = vsub.f32 %v1771_v58, %v1781_v4  ;;  %v3259_v58 = vld [vmem:[#allocation8 + $0x2f8] sm:$0xff]  }
 0xa7e   : > { %v1786_v7 = vmul.f32 1.442695, %v1783_v6 }
 0xa80   : > { %3289 = vpow2.f32 %v1786_v7 }
 0xa85   : > { %v3288_v8 = vpop.eup %3287 }
 0xa86   : > { %v1788_v9 = vsel %vm796_vm3, %v3288_v8, 0.0 }
 0xa87   : > { %1789 = vadd.xlane.f32.xlu0 %v1788_v9 }
 0xa8d   : > { %v3290_v10 = vpop.eup %3289 }
 0xa8e   : > { %v1791_v26 = vsel %vm796_vm3, %v3290_v10, 0.0 }
 0xa8f   : > { %1792 = vadd.xlane.f32.xlu1 %v1791_v26 }
 0xb10   : > { %v1790_v16 = vpop.xlane.xlu0 %1789 }
 0xb11   : > { %3291 = vrcp.f32 %v1790_v16 }
 0xb18   : > { %v1793_v17 = vpop.xlane.xlu1 %1792 }
 0xb19   : > { %3293 = vrcp.f32 %v1793_v17 }
 0xb1e   : > { %v3292_v18 = vpop.eup %3291 }
 0xb1f   : > { %v1796_v21 = vmul.f32 %v3292_v18, %v3288_v8  ;;  %v2624_v18 = vld [vmem:[#allocation7 + $0xd] ss:$0 sm:$0xff] }
 0xb21   : > { %v1798_v22 = vpack.c.bf16 %v1796_v21, %v1796_v21 }
 0xb23   : > { %3016 = vmatmul.mubr.msk.bf16.vlgmr.msra.gmra.mxu1 %vm796_vm3, %v1798_v22 }
 0xb24   : > { %3020 = vmatpush3.bf16.msra.mxu1 %v1850_v27  ;;  %3021 = vmatprep.mubr.msk.bf16.mxu1 %vm3475_vm0, %v3474_v5 }
 0xb25   : > { %3045 = vmatprep.subr.bf16.mxu1 %v3474_v5 }
 0xb26   : > { %v3294_v28 = vpop.eup %3293 }
 0xb27   : > { %v1797_v1 = vmul.f32 %v3294_v28, %v3290_v10  ;;  %v2625_v28 = vld [vmem:[#allocation7 + $0xf] ss:$0 sm:$0xff] }
 0xb29   : > { %v1799_v29 = vpack.c.bf16 %v1797_v1, %v1797_v1 }
 0xb2b   : > { %3022 = vmatmul.mubr.msk.bf16.vlgmr.msra.gmra.mxu1 %vm796_vm3, %v1799_v29 }
 0xb2c   : > { %3061 = vmatprep.mubr.msk.bf16.mxu1 %vm3475_vm0, %v3474_v5  ;;  %3046 = vmatpush3.bf16.msra.mxu1 %v3251_v51 }
 0xb2d   : > { %3047 = vmatprep.subr.bf16.mxu1 %v3474_v5 }
 0xbe3   : > { %v1840_v33 = vpop.f32.mrf.mxu1 }
 0xbe5   : > { %v3017_v25 = vpop.f32.mrf.mxu1 }
 0xbe6   : > { %v3266_v25 = vld [vmem:[#allocation8 + $0x2c0] sm:$0xff]  }
 0xbe7   : > { %v1843_v34 = vpop.f32.mrf.mxu1 }
 0xbe8   : > { %v2626_v34 = vld [vmem:[#allocation7 + $0x11] ss:$0 sm:$0xff] }
 0xbe9   : > { %v3018_v35 = vpop.f32.mrf.mxu1 }
 0xbeb   : > { %v1886_v36 = vpop.f32.mrf.mxu1 }
 0xbec   : > { %v1892_v37 = vpack.c.bf16 %v1886_v36, %v1840_v33  ;;  %v3265_v33 = vld [vmem:[#allocation8 + $0x2c8] sm:$0xff]  }
 0xbed   : > { %v3023_v38 = vpop.f32.mrf.mxu1 }
 0xbee   : > { %3042 = vmatmul.mubr.bf16.vlgmr.msra.gmra.mxu0 %v1892_v37 }
 0xbef   : > { %v1889_v39 = vpop.f32.mrf.mxu1  ;;  %3081 = vmatprep.mubr.msk.bf16.mxu0 %vm3475_vm0, %v3474_v5  ;;  %3066 = vmatpush3.bf16.msra.mxu0 %v3259_v58 }
 0xbf0   : > { %3067 = vmatprep.subr.bf16.mxu0 %v3474_v5 }
 0xbf1   : > { %v3024_v40 = vpop.f32.mrf.mxu1 }
 0xbf3   : > { %3068 = vmatpush3.bf16.msra.mxu0 %v3260_v59 }
 0xbf4   : > { %3069 = vmatprep.subr.bf16.mxu0 %v3474_v5 }
 0xbf7   : > { %3070 = vmatpush3.bf16.msra.mxu0 %v3261_v60 }
 0xbf8   : > { %3071 = vmatprep.subr.bf16.mxu0 %v3474_v5 }
 0xbfb   : > { %3072 = vmatpush3.bf16.msra.mxu0 %v3262_v61 }
 0xbfc   : > { %3073 = vmatprep.subr.bf16.mxu0 %v3474_v5 }
 0xbff   : > { %3074 = vmatpush3.bf16.msra.mxu0 %v3263_v62 }
 0xc00   : > { %3075 = vmatprep.subr.bf16.mxu0 %v3474_v5 }
 0xc03   : > { %3076 = vmatpush3.bf16.msra.mxu0 %v3264_v32 }
 0xc04   : > { %3077 = vmatprep.subr.bf16.mxu0 %v3474_v5 }
 0xc07   : > { %3078 = vmatpush3.bf16.msra.mxu0 %v3265_v33 }
 0xc08   : > { %3079 = vmatprep.subr.bf16.mxu0 %v3474_v5 }
 0xc0b   : > { %3080 = vmatpush3.bf16.msra.mxu0 %v3266_v25  ;;  %v2344_v25 = vsub.s32 %v3739_v24, %v3737_v23 }
 0xcae   : > { %v1992_v41 = vpop.f32.mrf.mxu0 }
 0xcaf   : > { %v1999_v43 = vadd.f32 %v1992_v41, %v3806_v0 }
 0xcb0   : > { %v3043_v44 = vpop.f32.mrf.mxu0 }
 0xcb1   : > { %v3882_v45 = vadd.f32 %v2623_v42, %v1999_v43 }
 0xcb2   : > { %v1995_v46 = vpop.f32.mrf.mxu0 }
 0xcb3   : > { %v2000_v47 = vadd.f32 %v1995_v46, %v3810_v30  ;;  %2010 = vadd.xlane.f32.xlu0 %v3882_v45  ;;  %v2016_v50 = vmul.f32 %v3882_v45, %v3882_v45  ;;  %v3252_v30 = vld [vmem:[#allocation8 + $0x2b0] sm:$0xff]   ;;  %v2643_v46 = vld [vmem:[#allocation7 + $0x13] ss:$0 sm:$0xff] }
 0xcb4   : > { %v3044_v48 = vpop.f32.mrf.mxu0  ;;  %3048 = vmatpush3.bf16.msra.mxu1 %v3252_v30 }
 0xcb5   : > { %v3886_v49 = vadd.f32 %v2623_v42, %v2000_v47  ;;  %3049 = vmatprep.subr.bf16.mxu1 %v3474_v5 }
 0xcb7   : > { %2018 = vadd.xlane.f32.xlu0 %v2016_v50  ;;  %2012 = vadd.xlane.f32.xlu1 %v3886_v49  ;;  %v2017_v0 = vmul.f32 %v3886_v49, %v3886_v49 }
 0xcb8   : > { %3050 = vmatpush3.bf16.msra.mxu1 %v3253_v52 }
 0xcb9   : > { %3051 = vmatprep.subr.bf16.mxu1 %v3474_v5 }
 0xcbb   : > { %2020 = vadd.xlane.f32.xlu1 %v2017_v0 }
 0xcbc   : > { %3052 = vmatpush3.bf16.msra.mxu1 %v3254_v53 }
 0xcbd   : > { %3053 = vmatprep.subr.bf16.mxu1 %v3474_v5 }
 0xcc0   : > { %3054 = vmatpush3.bf16.msra.mxu1 %v3255_v54 }
 0xcc1   : > { %3055 = vmatprep.subr.bf16.mxu1 %v3474_v5 }
 0xcc4   : > { %3056 = vmatpush3.bf16.msra.mxu1 %v3256_v55 }
 0xcc5   : > { %3057 = vmatprep.subr.bf16.mxu1 %v3474_v5 }
 0xcc8   : > { %3058 = vmatpush3.bf16.msra.mxu1 %v3257_v56 }
 0xcc9   : > { %3059 = vmatprep.subr.bf16.mxu1 %v3474_v5 }
 0xccc   : > { %3060 = vmatpush3.bf16.msra.mxu1 %v3258_v57 }
 0xd3c   : > { %v2011_v63 = vpop.xlane.xlu0 %2010 }
 0xd3d   : > { %v2014_v2 = vmul.f32 0.03125, %v2011_v63 }
 0xd3f   : > { %v2024_v6 = vmul.f32 %v2014_v2, %v2014_v2  ;;  %v2028_v15 = vsub.f32 %v3882_v45, %v2014_v2 }
 0xd40   : > { %v2019_v3 = vpop.xlane.xlu0 %2018  ;;  %v2013_v4 = vpop.xlane.xlu1 %2012 }
 0xd41   : > { %v2022_v7 = vmul.f32 0.03125, %v2019_v3  ;;  %v2015_v8 = vmul.f32 0.03125, %v2013_v4 }
 0xd43   : > { %v2026_v9 = vsub.f32 %v2022_v7, %v2024_v6  ;;  %v2025_v11 = vmul.f32 %v2015_v8, %v2015_v8  ;;  %v2029_v20 = vsub.f32 %v3886_v49, %v2015_v8  ;;  %v2644_v7 = vld [vmem:[#allocation7 + $0x14] ss:$0 sm:$0xff] }
 0xd44   : > { %v2021_v10 = vpop.xlane.xlu1 %2020  ;;  %v2665_v8 = vld [vmem:[%s3665_s29] sm:$0xff]  }
 0xd45   : > { %v2030_v26 = vadd.f32 1e-05, %v2026_v9  ;;  %v2023_v12 = vmul.f32 0.03125, %v2021_v10  ;;  %v2645_v10 = vld [vmem:[#allocation7 + $0x15] ss:$0 sm:$0xff] }
 0xd47   : > { %3295 = vrsqrt.f32 %v2030_v26  ;;  %v2027_v13 = vsub.f32 %v2023_v12, %v2025_v11  ;;  %v2666_v12 = vunpack.c.l.bf16 %v2665_v8 }
 0xd49   : > { %v2031_v14 = vadd.f32 1e-05, %v2027_v13 }
 0xd4b   : > { %3297 = vrsqrt.f32 %v2031_v14  ;;  %v2672_v14 = vld [vmem:[%s3665_s29 + $0x8] sm:$0xff]  }
 0xd54   : > { %v3296_v16 = vpop.eup %3295 }
 0xd55   : > { %v2034_v17 = vmul.f32 %v3296_v16, %v2028_v15 }
 0xd57   : > { %v2040_v27 = vmul.f32 %v2624_v18, %v2034_v17 }
 0xd58   : > { %v3298_v21 = vpop.eup %3297 }
 0xd59   : > { %v2035_v22 = vmul.f32 %v3298_v21, %v2029_v20  ;;  %v2046_v29 = vadd.f32 %v2625_v28, %v2040_v27  ;;  %v2667_v21 = vunpack.c.h.bf16 %v2665_v8 }
 0xd5b   : > { %v2041_v1 = vmul.f32 %v2624_v18, %v2035_v22  ;;  %v2670_v18 = vunpack.c.l.bf16 %v2672_v14 }
 0xd5d   : > { %v2047_v31 = vadd.f32 %v2625_v28, %v2041_v1  ;;  %v2671_v1 = vunpack.c.h.bf16 %v2672_v14 }
 0xd5f   : > { %v2048_v19 = vpack.c.bf16 %v2047_v31, %v2046_v29  ;;  %v2346_v31 = vadd.s32 4294967288, %v3739_v24 }
 0xd61   : > { %3062 = vmatmul.mubr.bf16.vlgmr.msra.gmra.mxu1 %v2048_v19  ;;  %v2349_v32 = vsub.s32 %v2346_v31, %v3737_v23 }
 0xe21   : > { %v2153_v35 = vpop.f32.mrf.mxu1 }
 0xe22   : > { %v2154_v37 = vadd.f32 %v2626_v34, %v2153_v35 }
 0xe23   : > { %v3063_v36 = vpop.f32.mrf.mxu1 }
 0xe24   : > { %v2160_v41 = vmax.f32 %v2154_v37, 0.0 }
 0xe25   : > { %v2156_v38 = vpop.f32.mrf.mxu1 }
 0xe26   : > { %v2157_v39 = vadd.f32 %v2626_v34, %v2156_v38 }
 0xe27   : > { %v3064_v40 = vpop.f32.mrf.mxu1 }
 0xe28   : > { %v2161_v42 = vmax.f32 %v2157_v39, 0.0 }
 0xe2a   : > { %v2162_v43 = vpack.c.bf16 %v2161_v42, %v2160_v41 }
 0xe2c   : > { %3082 = vmatmul.mubr.bf16.vlgmr.msra.gmra.mxu0 %v2162_v43 }
 0xeec   : > { %v2262_v44 = vpop.f32.mrf.mxu0 }
 0xeed   : > { %v2269_v47 = vadd.f32 %v2262_v44, %v3882_v45 }
 0xeee   : > { %v3083_v48 = vpop.f32.mrf.mxu0 }
 0xeef   : > { %v2276_v50 = vadd.f32 %v2643_v46, %v2269_v47 }
 0xef0   : > { %v2265_v5 = vpop.f32.mrf.mxu0 }
 0xef1   : > { %v2270_v0 = vadd.f32 %v2265_v5, %v3886_v49  ;;  %2280 = vadd.xlane.f32.xlu0 %v2276_v50  ;;  %v2286_v52 = vmul.f32 %v2276_v50, %v2276_v50 }
 0xef2   : > { %v3084_v51 = vpop.f32.mrf.mxu0 }
 0xef3   : > { %v2277_v30 = vadd.f32 %v2643_v46, %v2270_v0 }
 0xef5   : > { %2288 = vadd.xlane.f32.xlu0 %v2286_v52  ;;  %2282 = vadd.xlane.f32.xlu1 %v2277_v30  ;;  %v2287_v53 = vmul.f32 %v2277_v30, %v2277_v30 }
 0xef9   : > { %2290 = vadd.xlane.f32.xlu1 %v2287_v53 }
 0xf7a   : > { %v2281_v54 = vpop.xlane.xlu0 %2280 }
 0xf7b   : > { %v2284_v55 = vmul.f32 0.03125, %v2281_v54 }
 0xf7d   : > { %v2294_v58 = vmul.f32 %v2284_v55, %v2284_v55  ;;  %v2298_v4 = vsub.f32 %v2276_v50, %v2284_v55 }
 0xf7e   : > { %v2289_v56 = vpop.xlane.xlu0 %2288  ;;  %v2283_v57 = vpop.xlane.xlu1 %2282 }
 0xf7f   : > { %v2292_v45 = vmul.f32 0.03125, %v2289_v56  ;;  %v2285_v59 = vmul.f32 0.03125, %v2283_v57 }
 0xf81   : > { %v2296_v60 = vsub.f32 %v2292_v45, %v2294_v58  ;;  %v2295_v49 = vmul.f32 %v2285_v59, %v2285_v59  ;;  %v2299_v26 = vsub.f32 %v2277_v30, %v2285_v59 }
 0xf82   : > { %v2291_v61 = vpop.xlane.xlu1 %2290 }
 0xf83   : > { %v2300_v62 = vadd.f32 1e-05, %v2296_v60  ;;  %v2293_v63 = vmul.f32 0.03125, %v2291_v61 }
 0xf85   : > { %3299 = vrsqrt.f32 %v2300_v62  ;;  %v2297_v2 = vsub.f32 %v2293_v63, %v2295_v49 }
 0xf87   : > { %v2301_v3 = vadd.f32 1e-05, %v2297_v2 }
 0xf89   : > { %3301 = vrsqrt.f32 %v2301_v3 }
 0xf92   : > { %v3300_v6 = vpop.eup %3299 }
 0xf93   : > { %v2304_v9 = vmul.f32 %v3300_v6, %v2298_v4 }
 0xf95   : > { %v2310_v11 = vmul.f32 %v2644_v7, %v2304_v9 }
 0xf96   : > { %v3302_v13 = vpop.eup %3301 }
 0xf97   : > { %v2316_v15 = vadd.f32 %v2645_v10, %v2310_v11  ;;  %v2305_v16 = vmul.f32 %v3302_v13, %v2299_v26 }
 0xf99   : > { %v2326_v17 = vmul.f32 %v2666_v12, %v2316_v15  ;;  %v2311_v20 = vmul.f32 %v2644_v7, %v2305_v16  ;;  %v2328_v27 = vmul.f32 %v2670_v18, %v2316_v15 }
 0xf9b   : > { %2330 = vadd.xlane.f32.xlu0 %v2326_v17  ;;  %v2317_v22 = vadd.f32 %v2645_v10, %v2311_v20 }
 0xf9d   : > { %v2327_v28 = vmul.f32 %v2667_v21, %v2317_v22  ;;  %v2329_v29 = vmul.f32 %v2671_v1, %v2317_v22 }
 0xf9f   : > { %2334 = vadd.xlane.f32.xlu0 %v2328_v27  ;;  %2332 = vadd.xlane.f32.xlu1 %v2327_v28 }
 0xfa3   : > { %2336 = vadd.xlane.f32.xlu1 %v2329_v29 }
0x1024   : > { %v2331_v19 = vpop.xlane.xlu0 %2330 }
0x1025   : > { %v2345_v37 = vrot.slane %v2331_v19, %v2344_v25 }
0x1028   : > { %v2333_v33 = vpop.xlane.xlu1 %2332  ;;  %v2335_v34 = vpop.xlane.xlu0 %2334 }
0x1029   : > { %v2350_v35 = vrot.slane %v2333_v33, %v2349_v32  ;;  %v2356_v38 = vrot.slane %v2335_v34, %v2344_v25 }
0x102b   : > { %v2352_v40 = vsel %vm2351_vm4, %v2350_v35, %v2345_v37 }
0x102c   : > { %v2337_v36 = vpop.xlane.xlu1 %2336 }
0x102d   : > { %v2360_v39 = vrot.slane %v2337_v36, %v2349_v32 }
0x102f   : > { %v2361_v41 = vsel %vm2351_vm4, %v2360_v39, %v2356_v38 }
0x1030   : > { %v2363_v23 = vsel %vm2362_vm5, %v2361_v41, %v2352_v40 }
0x1031   : > { %2366 = vst.msk [vmem:[%s309_s6] sm:$0x3] %vm2365_vm6, %v2363_v23 }
0x1032   : > { %3394 = shalt.err (!%p3391_p4)
}
0x1033   : > { %s3395_s12 = scalar_lea.hbm %s3922_s9, 32  ;;  %s3399_s25 = scalar_lea.hbm %s3963_s4, 64 }
0x1034   : > { %p3396_p6 = scmp.ne.s32.totalorder %s3922_s9, %s3395_s12  ;;  %p3400_p13 = scmp.lt.s32.totalorder %s3922_s9, %s3963_s4 }
0x1035   : > { %p3401_p11 = scmp.lt.s32.totalorder %s3399_s25, %s3395_s12 }
0x1036   : > { %p3397_p8 = pnand %p3396_p6, %p3979_p10 }
0x1037   : > { %p3402_p2 = por %p3401_p11, %p3400_p13 }
0x1038   : > { %p3398_p5 = pneg %p3397_p8 }
0x103a   : > { %p3403_p0 = pnand %p3402_p2, %p3398_p5 }
0x103c   : > { %3406 = shalt.err (!%p3403_p0)
}
0x103d   : > { %3104 = dma.vmem_to_hbm [thread:$0]  (%p3979_p10), %s2382_s14, 32, %s3922_s9, %s2368_s30  }
0x103e PF: > { %s2393_s26 = sand.u32 1, %s3445_s15   ;;  %p3980_p1 = scmp.ne.s32.totalorder %s3971_s28, 0 }
0x103f   : > { %p3981_p3 = scmp.ge.s32.totalorder %s3457_s18, 2  ;;  %s2394_s5 = scalar_lea.sflag [#allocation4], %s2393_s26 }
0x1041   : > { %p3114_p7 = pnand %p3981_p3, %p3980_p1 }
0x1043   : > { %p3115_p9 = pneg %p3114_p7 }
0x1045   : > { %3440 = dma.done.wait (%p3115_p9), %s2394_s5, 32  }
0x1046   : > { %3442 = vsyncadd (%p3115_p9), %s2394_s5, 4294967264  ;;  %p21_p12 = scmp.ge.s32.totalorder %s3528_s21, 4   ;;  %s3982_s15 = smov %s3449_s16 }
0x1047   : > { %s3983_s16 = smov %s3453_s17  ;;  %s3984_s17 = smov %s3540_s24 }
0x1048   : > { %s3985_s18 = smov %s3528_s21  ;;  %23 = sbr.rel (!%p21_p12) target bundleno = 8 (0x8), region = 118 }
0x104d   :  { %2399 = vsyncpa [#allocation3], 1 }
0x104e   :  { %2401 = vsyncpa [#allocation3 + $0x1], 1 }
0x104f   :  { %2402 = vsyncpa [#allocation6], 1 }
0x1050   :  { %2404 = vsyncpa [#allocation6 + $0x1], 1 }
0x1051   :  { %2405 = vsyncpa [#allocation9], 1 }
0x1052   :  { %2406 = vsyncpa [#allocation4], 1 }
0x1053   :  { %2408 = vsyncpa [#allocation4 + $0x1], 1 }

// kernel: tpu_custom_call.1
= control target key start
LH: loop header
LB: loop body
LE: loop exit
PB: predicated region body
PF: predicated region fallthrough
CT: control target
= control target key end

     0   :  { %9 = vsyncpa [#allocation3], 0  ;;  %s3959_s0 = inlined_call_operand.hbm [shape: f32[4,8,128], index: 0, kind: input, shape index: {}]   ;;  %s3960_s1 = inlined_call_operand.hbm [shape: bf16[2,4,8,128], index: 1, kind: input, shape index: {}]   ;;  %s3961_s2 = inlined_call_operand.hbm [shape: f32[22,128], index: 2, kind: input, shape index: {}]   ;;  %s3962_s3 = inlined_call_operand.hbm [shape: bf16[2,6,128,128], index: 3, kind: input, shape index: {}]   ;;  %s3963_s4 = inlined_call_operand.hbm [shape: f32[2,2,16], index: 4, kind: output, shape index: {}]  }
   0x1   :  { %11 = vsyncpa [#allocation3 + $0x1], 0 }
   0x2   :  { %12 = vsyncpa [#allocation6], 0 }
   0x3   :  { %14 = vsyncpa [#allocation6 + $0x1], 0 }
   0x4   :  { %15 = vsyncpa [#allocation9], 0 }
   0x5   :  { %16 = vsyncpa [#allocation4], 0 }
   0x6   :  { %18 = vsyncpa [#allocation4 + $0x1], 0  ;;  %s3503_s15 = smov 0   ;;  %s3505_s16 = smov 0  }
   0x7   :  { %s3507_s17 = smov 0   ;;  %s3509_s18 = smov 0  }
   0x8 LB: > { %s3524_s19 = sadd.s32 4294967295, %s3457_s18   ;;  %s2493_s20 = sadd.s32 4294967294, %s3457_s18   ;;  %s3457_s18 = sphi %s3509_s18, %s3985_s18   ;;  %s3453_s17 = sphi %s3507_s17, %s3984_s17   ;;  %s3449_s16 = sphi %s3505_s16, %s3983_s16   ;;  %s3445_s15 = sphi %s3503_s15, %s3982_s15  }
   0x9   : > { %s3528_s21 = sadd.s32 1, %s3457_s18   ;;  %s31_s22 = sadd.s32 1, %s3453_s17 }
   0xa   : > { %s28_s23 = ssub.s32 %s3457_s18, %s3528_s21  ;;  %p38_p0 = scmp.ne.s32.totalorder %s3453_s17, %s3449_s16 }
   0xb   : > { %p29_p1 = scmp.eq.s32.totalorder %s28_s23, 0  ;;  %p39_p2 = scmp.eq.s32.totalorder %s3457_s18, 0 }
   0xc   : > { %p44_p3 = scmp.ne.s32.totalorder %s3449_s16, %s3445_s15  ;;  %p3964_p4 = scmp.eq.s32.totalorder %s3524_s19, 0 }
   0xd   : > { %s3540_s24 = scalar_select %p29_p1, %s3453_s17, %s31_s22  }
   0xe   : > { %p3542_p5 = por %p39_p2, %p38_p0  ;;  %p3548_p6 = por %p3964_p4, %p44_p3 }
   0xf   : > { %p136_p7 = scmp.eq.s32.totalorder %s3524_s19, 1  ;;  %p142_p8 = scmp.eq.s32.totalorder %s2493_s20, 1 }
  0x10   : > { %s3969_s26 = scalar_select %p3548_p6, 1, 0 }
  0x11   : > { %p2494_p9 = scmp.ge.s32.totalorder %s3457_s18, 1  ;;  %p149_p10 = scmp.lt.s32.totalorder %s3457_s18, 3 }
  0x12   : > { %p3555_p11 = por %p136_p7, %p38_p0  ;;  %p3559_p12 = por %p142_p8, %p44_p3 }
  0x13   : > { %p3563_p13 = pnand %p2494_p9, %p149_p10  ;;  %s3459_s30 = smov [#allocation7]  }
  0x14   : > { %s3970_s27 = scalar_select %p3555_p11, 1, 0 }
  0x15   : > { %s3971_s28 = scalar_select %p3559_p12, 1, 0 }
  0x16   : > { %p3106_p1 = pneg %p3563_p13  ;;  %s161_s5 = sshll.u32 %s3459_s30, 4  ;;  %s162_s5 = int_to_ptr.vmem [resolvable:$true] %s161_s5 }
  0x17   : > { %s3460_s7 = smov [#allocation8]   ;;  %s3314_s9 = scalar_lea.vmem %s162_s5, 384 }
  0x18   : > { %p3571_p2 = pnand %p3106_p1, %p3964_p4  ;;  %s174_s8 = sshll.u32 %s3460_s7, 4  ;;  %s175_s8 = int_to_ptr.vmem [resolvable:$true] %s174_s8 }
  0x19   : > { %p3315_p3 = scmp.ne.s32.totalorder %s162_s5, %s3314_s9  ;;  %p3322_p9 = scmp.lt.s32.totalorder %s162_s5, %s162_s5 }
  0x1a   : > { %p3305_p0 = pneg %p3571_p2  ;;  %p3323_p10 = scmp.lt.s32.totalorder %s3314_s9, %s3314_s9 }
  0x1c   : > { %p3317_p7 = pnand %p3315_p3, %p3305_p0  ;;  %p3324_p12 = por %p3323_p10, %p3322_p9 }
  0x1e   : > { %p3318_p8 = pneg %p3317_p7 }
  0x20   : > { %p3325_p1 = pnand %p3324_p12, %p3318_p8 }
  0x22   : > { %3328 = shalt.err (!%p3325_p1)
}
  0x23   : > { %s3461_s10 = smov 128   ;;  %s3462_s11 = smov 8  }
  0x24   : > { %3109 = dma.hbm_to_vmem [thread:$0]  (!%p3571_p2), %s3961_s2, 384, %s162_s5, [#allocation6], %s3461_s10, %s3461_s10, %s3462_s11  }
  0x25   : > { %s3340_s14 = scalar_lea.vmem %s175_s8, 12288  ;;  %p3348_p11 = scmp.lt.s32.totalorder %s175_s8, %s175_s8 }
  0x26   : > { %p3341_p4 = scmp.ne.s32.totalorder %s175_s8, %s3340_s14  ;;  %p3349_p6 = scmp.lt.s32.totalorder %s3340_s14, %s3340_s14 }
  0x28   : > { %p3343_p3 = pnand %p3341_p4, %p3305_p0  ;;  %p3350_p9 = por %p3349_p6, %p3348_p11 }
  0x2a   : > { %p3344_p7 = pneg %p3343_p3 }
  0x2c   : > { %p3351_p12 = pnand %p3350_p9, %p3344_p7 }
  0x2e   : > { %3354 = shalt.err (!%p3351_p12)
}
  0x2f   : > { %s3463_s20 = smov 64   ;;  %s3464_s22 = smov 4  }
  0x30   : > { %3112 = dma.hbm_to_vmem [thread:$0]  (!%p3571_p2), %s3962_s3, 12288, %s175_s8, [#allocation9], %s3463_s20, %s3463_s20, %s3464_s22  }
  0x31   : > { %p3967_p8 = scmp.ge.s32.totalorder %s3457_s18, 2 }
  0x32   : > { %s188_s5 = sand.u32 (!%p3967_p8), 1, %s3453_s17   ;;  %s2650_s7 = sshll.u32 (!%p3967_p8), %s3457_s18, 8 }
  0x33   : > { %184 = sbr.rel (%p3967_p8) target bundleno = 89 (0x59), region = 24  ;;  %s3598_s9 = sshll.u32 (!%p3967_p8), %s188_s5, 4 }
  0x34   : > { %s3603_s6 = scalar_lea.hbm (!%p3967_p8), %s3959_s0, %s2650_s7  ;;  %s192_s8 = scalar_lea.vmem (!%p3967_p8), [#allocation2], %s3598_s9 }
  0x35   : > { %s199_s12 = sshll.u32 (!%p3967_p8), %s192_s8, 4  ;;  %s3608_s13 = scalar_lea.sflag (!%p3967_p8), [#allocation3], %s188_s5  ;;  %s3606_s12 = int_to_ptr.vmem [resolvable:$true] %s199_s12 }
  0x36   : > { %s3355_s14 = scalar_lea.hbm (!%p3967_p8), %s3603_s6, 256  ;;  %s3359_s23 = scalar_lea.hbm (!%p3967_p8), %s3959_s0, 512 }
  0x37   : > { %p3356_p4 = scmp.ne.s32.totalorder (!%p3967_p8), %s3603_s6, %s3355_s14  ;;  %p3360_p2 = scmp.lt.s32.totalorder (!%p3967_p8), %s3603_s6, %s3959_s0 }
  0x38   : > { %p3361_p0 = scmp.lt.s32.totalorder %s3359_s23, %s3355_s14 }
  0x39   : > { %p3357_p6 = pnand %p3356_p4, %p3542_p5 }
  0x3a   : > { %p3362_p10 = por %p3361_p0, %p3360_p2 }
  0x3b   : > { %p3358_p11 = pneg %p3357_p6 }
  0x3d   : > { %p3363_p1 = pnand %p3362_p10, %p3358_p11 }
  0x3f   : > { %3366 = shalt.err (!%p3363_p1)
}
  0x40   : > { %s3367_s5 = scalar_lea.vmem %s3606_s12, 256  ;;  %s3465_s10 = smov [#allocation2]  }
  0x41   : > { %p3368_p3 = scmp.ne.s32.totalorder %s3606_s12, %s3367_s5  ;;  %s3371_s11 = sshll.u32 %s3465_s10, 4  ;;  %s3372_s11 = int_to_ptr.vmem [resolvable:$false] %s3371_s11 }
  0x42   : > { %s3373_s8 = scalar_lea.vmem %s3372_s11, 512  ;;  %p3374_p12 = scmp.lt.s32.totalorder %s3606_s12, %s3372_s11 }
  0x43   : > { %p3369_p7 = pnand %p3368_p3, %p3542_p5  ;;  %p3375_p4 = scmp.lt.s32.totalorder %s3373_s8, %s3367_s5 }
  0x45   : > { %p3370_p9 = pneg %p3369_p7  ;;  %p3376_p6 = por %p3375_p4, %p3374_p12 }
  0x47   : > { %p3377_p8 = pnand %p3376_p6, %p3370_p9 }
  0x49   : > { %3380 = shalt.err (!%p3377_p8)
}
  0x4a   : > { %s3466_s14 = smov 128   ;;  %s3467_s20 = smov 8  }
  0x4b   : > { %3089 = dma.hbm_to_vmem [thread:$0]  (%p3542_p5), %s3603_s6, 256, %s3606_s12, %s3608_s13, %s3466_s14, %s3466_s14, %s3467_s20  }
  0x4c   : > { %s209_s22 = sand.u32 1, %s3457_s18   ;;  %s2651_s23 = sshll.u32 %s3457_s18, 7 }
  0x4d   : > { %s219_s5 = scalar_lea.hbm %s3960_s1, %s2651_s23  ;;  %s213_s11 = scalar_lea.vmem [#allocation5], %s3598_s9 }
  0x4e   : > { %s3090_s10 = scalar_select %p3542_p5, [#allocation0], [#allocation13] }
  0x4f   : > { %s232_s6 = sshll.u32 %s213_s11, 4  ;;  %s3468_s13 = smov 256   ;;  %s233_s6 = int_to_ptr.vmem [resolvable:$true] %s232_s6 }
  0x50   : > { %s224_s12 = sld [smem:[%s3090_s10]]   ;;  %s3469_s8 = smov 128  }
  0x51   : > { %3091 = sst [smem:[#allocation12]] (%p3542_p5), %s3468_s13  ;;  %s3470_s14 = smov 2  }
  0x52   : > { %3092 = sst [smem:[#allocation12 + $0x1]] (%p3542_p5), %s3469_s8  ;;  %s3471_s20 = smov 64  }
  0x53   : > { %3093 = sst [smem:[#allocation12 + $0x2]] (%p3542_p5), %s3470_s14  ;;  %s3472_s9 = smov 4  }
  0x54   : > { %3094 = sst [smem:[#allocation12 + $0x3]] (%p3542_p5), %s3471_s20  ;;  %s210_s7 = scalar_lea.sflag [#allocation6], %s209_s22 }
  0x55   : > { %3095 = sst [smem:[#allocation12 + $0x4]] (%p3542_p5), %s3471_s20  ;;  %s3473_s10 = smov 131072  }
  0x56   : > { %s2504_s23 = sshll.u32 %s224_s12, 26  ;;  %3096 = sst [smem:[#allocation12 + $0x5]] (%p3542_p5), %s3472_s9 }
  0x57   : > { %s2505_s30 = sadd.s32 134217728, %s2504_s23 }
  0x58   : > { %3097 = dma.general (%p3542_p5), %s219_s5, 256, %s233_s6, %s210_s7, %s3473_s10, [#allocation12], %s2505_s30, 0  }
  0x59 PF: > { %257 = sbr.rel (%p3563_p13) target bundleno = 4158 (0x103e), region = 36  ;;  %s3656_s11 = sand.u32 (!%p3563_p13), 1, %s3449_s16  }
  0x5a   : > { %s2507_s13 = sshll.u32 (!%p3563_p13), %s3656_s11, 4  ;;  %s260_s12 = scalar_lea.sflag (!%p3563_p13), [#allocation3], %s3656_s11 }
  0x5b   : > { %s263_s8 = scalar_lea.vmem (!%p3563_p13), [#allocation2], %s2507_s13  ;;  %p3974_p8 = scmp.ne.s32.totalorder (!%p3563_p13), %s3969_s26, 0 }
  0x5e   : > { %3424 = dma.done.wait (%p3974_p8), %s260_s12, 256  }
  0x5f   : > { %3426 = vsyncadd (%p3974_p8), %s260_s12, 4294967040  ;;  %s268_s25 = sand.u32 1, %s3524_s19   ;;  %s3665_s29 = scalar_lea.vmem [#allocation5], %s2507_s13 }
  0x60   : > { %s269_s22 = scalar_lea.sflag [#allocation6], %s268_s25 }
  0x61   : > { %3428 = dma.done.wait (%p3974_p8), %s269_s22, 256  }
  0x62   : > { %3430 = vsyncadd (%p3974_p8), %s269_s22, 4294967040  ;;  %p3975_p5 = scmp.eq.s32.totalorder %s3524_s19, 0 }
  0x64   : > { %3432 = dma.done.wait (%p3975_p5), [#allocation6], 384   ;;  %p3976_p13 = pmov %p3975_p5 }
  0x65   : > { %p3977_p11 = pmov %p3975_p5 }
  0x66   : > { %3434 = vsyncadd (%p3976_p13), [#allocation6], 4294966912 }
  0x67   : > { %3436 = dma.done.wait (%p3977_p11), [#allocation9], 12288   ;;  %p3978_p2 = pmov %p3975_p5 }
  0x68   : > { %v3679_v0 = vld [vmem:[%s263_s8] sm:$0xff]  ;;  %v3681_v1 = vld [vmem:[%s263_s8 + $0x8] sm:$0xff]  ;;  %v3474_v5 = vmov 0.0   ;;  %vm3475_vm0 = vmmov 0   ;;  %vm824_vm1 = vcmask 1043456   ;;  %vm796_vm3 = vcmask 64512  }
  0x69   : > { %3438 = vsyncadd (%p3978_p2), [#allocation9], 4294955008  ;;  %317 = vadd.xlane.f32.xlu0 %v3679_v0  ;;  %v323_v2 = vmul.f32 %v3679_v0, %v3679_v0  ;;  %v324_v3 = vmul.f32 %v3681_v1, %v3681_v1  ;;  %v3171_v4 = vld [vmem:[#allocation8 + $0x38] sm:$0xff]   ;;  %2797 = vmatprep.subr.bf16.mxu0 %v3474_v5  ;;  %v3173_v7 = vld [vmem:[#allocation8 + $0x30] sm:$0xff]   ;;  %s2511_s26 = sshll.u32 %s3656_s11, 1  ;;  %vm2351_vm4 = vcmask 130112  }
  0x6a   : > { %2817 = vmatprep.subr.bf16.mxu1 %v3474_v5  ;;  %v3172_v6 = vld [vmem:[#allocation8 + $0x78] sm:$0xff]   ;;  %2798 = vmatpush3.bf16.msra.mxu0 %v3171_v4  ;;  %v3174_v8 = vld [vmem:[#allocation8 + $0x70] sm:$0xff]   ;;  %v3175_v9 = vld [vmem:[#allocation8 + $0x28] sm:$0xff]   ;;  %s2647_s5 = sshll.u32 %s3524_s19, 5  ;;  %s309_s6 = scalar_lea.vmem [#allocation10], %s2511_s26  ;;  %vm2362_vm5 = vcmask 1041409  }
  0x6b   : > { %325 = vadd.xlane.f32.xlu1 %v323_v2  ;;  %2818 = vmatpush3.bf16.msra.mxu1 %v3172_v6  ;;  %v3176_v10 = vld [vmem:[#allocation8 + $0x68] sm:$0xff]   ;;  %v3177_v11 = vld [vmem:[#allocation8 + $0x20] sm:$0xff]   ;;  %v3179_v13 = vld [vmem:[#allocation8 + $0x18] sm:$0xff]   ;;  %s2381_s14 = sshll.u32 %s309_s6, 4  ;;  %vm2365_vm6 = vcmask 123904   ;;  %s3922_s9 = scalar_lea.hbm %s3963_s4, %s2647_s5  ;;  %s2382_s14 = int_to_ptr.vmem [resolvable:$true] %s2381_s14 }
  0x6c   : > { %2799 = vmatprep.subr.bf16.mxu0 %v3474_v5  ;;  %2819 = vmatprep.subr.bf16.mxu1 %v3474_v5  ;;  %v3178_v12 = vld [vmem:[#allocation8 + $0x60] sm:$0xff]   ;;  %v3180_v14 = vld [vmem:[#allocation8 + $0x58] sm:$0xff]   ;;  %v3181_v15 = vld [vmem:[#allocation8 + $0x10] sm:$0xff]   ;;  %s2368_s30 = scalar_lea.sflag [#allocation4], %s3656_s11  ;;  %s3381_s19 = scalar_lea.vmem %s2382_s14, 32 }
  0x6d   : > { %319 = vadd.xlane.f32.xlu0 %v3681_v1  ;;  %2813 = vmatprep.mubr.msk.bf16.mxu0 %vm3475_vm0, %v3474_v5  ;;  %v3182_v16 = vld [vmem:[#allocation8 + $0x50] sm:$0xff]   ;;  %v3183_v17 = vld [vmem:[#allocation8 + $0x8] sm:$0xff]   ;;  %v3185_v19 = vld [vmem:[#allocation8] sm:$0xff]   ;;  %p3382_p0 = scmp.ne.s32.totalorder %s2382_s14, %s3381_s19  ;;  %p3979_p10 = scmp.ne.s32.totalorder %s3970_s27, 0 }
  0x6e   : > { %2800 = vmatpush3.bf16.msra.mxu0 %v3173_v7  ;;  %2833 = vmatprep.mubr.msk.bf16.mxu1 %vm3475_vm0, %v3474_v5  ;;  %v3184_v18 = vld [vmem:[#allocation8 + $0x48] sm:$0xff]   ;;  %v3186_v20 = vld [vmem:[#allocation8 + $0x40] sm:$0xff]   ;;  %v3187_v47 = vld [vmem:[#allocation8 + $0xb8] sm:$0xff]   ;;  %s3477_s7 = smov [#allocation10]  }
  0x6f   : > { %327 = vadd.xlane.f32.xlu1 %v324_v3  ;;  %2820 = vmatpush3.bf16.msra.mxu1 %v3174_v8  ;;  %v2512_v38 = vld [vmem:[#allocation7] ss:$0 sm:$0xff]  ;;  %v2513_v43 = vld [vmem:[#allocation7 + $0x2] ss:$0 sm:$0xff]  ;;  %v3188_v49 = vld [vmem:[#allocation8 + $0xb0] sm:$0xff]   ;;  %p3383_p1 = pnand %p3382_p0, %p3979_p10  ;;  %s3385_s10 = sshll.u32 %s3477_s7, 4  ;;  %s3386_s10 = int_to_ptr.vmem [resolvable:$false] %s3385_s10 }
  0x70   : > { %2801 = vmatprep.subr.bf16.mxu0 %v3474_v5  ;;  %2821 = vmatprep.subr.bf16.mxu1 %v3474_v5  ;;  %v3189_v50 = vld [vmem:[#allocation8 + $0xa8] sm:$0xff]   ;;  %v3190_v51 = vld [vmem:[#allocation8 + $0xa0] sm:$0xff]   ;;  %v3191_v52 = vld [vmem:[#allocation8 + $0x98] sm:$0xff]   ;;  %s3387_s13 = scalar_lea.vmem %s3386_s10, 64  ;;  %p3388_p7 = scmp.lt.s32.totalorder %s2382_s14, %s3386_s10 }
  0x71   : > { %v3192_v53 = vld [vmem:[#allocation8 + $0x90] sm:$0xff]   ;;  %v3193_v54 = vld [vmem:[#allocation8 + $0x88] sm:$0xff]   ;;  %v3194_v55 = vld [vmem:[#allocation8 + $0x80] sm:$0xff]   ;;  %p3384_p3 = pneg %p3383_p1  ;;  %p3389_p9 = scmp.lt.s32.totalorder %s3387_s13, %s3381_s19 }
  0x72   : > { %2802 = vmatpush3.bf16.msra.mxu0 %v3175_v9  ;;  %v2525_v56 = vld [vmem:[#allocation7 + $0x6] ss:$0 sm:$0xff]  ;;  %v2514_v62 = vld [vmem:[#allocation7 + $0x4] ss:$0 sm:$0xff] }
  0x73   : > { %2822 = vmatpush3.bf16.msra.mxu1 %v3176_v10  ;;  %2803 = vmatprep.subr.bf16.mxu0 %v3474_v5  ;;  %p3390_p12 = por %p3389_p9, %p3388_p7 }
  0x74   : > { %2823 = vmatprep.subr.bf16.mxu1 %v3474_v5 }
  0x75   : > { %p3391_p4 = pnand %p3390_p12, %p3384_p3 }
  0x76   : > { %2804 = vmatpush3.bf16.msra.mxu0 %v3177_v11 }
  0x77   : > { %2824 = vmatpush3.bf16.msra.mxu1 %v3178_v12  ;;  %2805 = vmatprep.subr.bf16.mxu0 %v3474_v5 }
  0x78   : > { %2825 = vmatprep.subr.bf16.mxu1 %v3474_v5 }
  0x7a   : > { %2806 = vmatpush3.bf16.msra.mxu0 %v3179_v13  ;;  %v2536_v13 = vld [vmem:[#allocation7 + $0x8] ss:$0 sm:$0xff] }
  0x7b   : > { %2826 = vmatpush3.bf16.msra.mxu1 %v3180_v14  ;;  %2807 = vmatprep.subr.bf16.mxu0 %v3474_v5 }
  0x7c   : > { %2827 = vmatprep.subr.bf16.mxu1 %v3474_v5 }
  0x7e   : > { %2808 = vmatpush3.bf16.msra.mxu0 %v3181_v15 }
  0x7f   : > { %2828 = vmatpush3.bf16.msra.mxu1 %v3182_v16  ;;  %2809 = vmatprep.subr.bf16.mxu0 %v3474_v5 }
  0x80   : > { %2829 = vmatprep.subr.bf16.mxu1 %v3474_v5 }
  0x82   : > { %2810 = vmatpush3.bf16.msra.mxu0 %v3183_v17 }
  0x83   : > { %2830 = vmatpush3.bf16.msra.mxu1 %v3184_v18  ;;  %2811 = vmatprep.subr.bf16.mxu0 %v3474_v5 }
  0x84   : > { %2831 = vmatprep.subr.bf16.mxu1 %v3474_v5 }
  0x86   : > { %2812 = vmatpush3.bf16.msra.mxu0 %v3185_v19 }
  0x87   : > { %2832 = vmatpush3.bf16.msra.mxu1 %v3186_v20  ;;  %2837 = vmatprep.subr.bf16.mxu0 %v3474_v5 }
  0x88   : > { %2857 = vmatprep.subr.bf16.mxu1 %v3474_v5 }
  0xf2   : > { %v318_v21 = vpop.xlane.xlu0 %317 }
  0xf3   : > { %v321_v22 = vmul.f32 0.03125, %v318_v21 }
  0xf4   : > { %v326_v23 = vpop.xlane.xlu1 %325 }
  0xf5   : > { %v331_v24 = vmul.f32 %v321_v22, %v321_v22  ;;  %v329_v25 = vmul.f32 0.03125, %v326_v23  ;;  %v335_v35 = vsub.f32 %v3679_v0, %v321_v22  ;;  %v710_v22 = vlaneseq }
  0xf6   : > { %v320_v26 = vpop.xlane.xlu0 %319 }
  0xf7   : > { %v333_v27 = vsub.f32 %v329_v25, %v331_v24  ;;  %v322_v28 = vmul.f32 0.03125, %v320_v26  ;;  %v3737_v23 = vshrl.u32 %v710_v22, 7  ;;  %v3739_v24 = vand.u32 127, %v710_v22 }
  0xf8   : > { %v328_v29 = vpop.xlane.xlu1 %327  ;;  %v3476_v25 = vmov -1e+09  }
  0xf9   : > { %v337_v30 = vadd.f32 1e-05, %v333_v27  ;;  %v332_v31 = vmul.f32 %v322_v28, %v322_v28  ;;  %v330_v32 = vmul.f32 0.03125, %v328_v29  ;;  %v336_v39 = vsub.f32 %v3681_v1, %v322_v28 }
  0xfa   : > { %vm714_vm2 = vcmp.ge.s32.totalorder %v3737_v23, %v3739_v24 }
  0xfb   : > { %3267 = vrsqrt.f32 %v337_v30  ;;  %v334_v33 = vsub.f32 %v330_v32, %v332_v31  ;;  %v3743_v26 = vsel %vm714_vm2, 0.0, %v3476_v25 }
  0xfd   : > { %v338_v34 = vadd.f32 1e-05, %v334_v33 }
  0xff   : > { %3269 = vrsqrt.f32 %v338_v34 }
 0x108   : > { %v3268_v36 = vpop.eup %3267 }
 0x109   : > { %v341_v37 = vmul.f32 %v3268_v36, %v335_v35 }
 0x10b   : > { %v347_v42 = vmul.f32 %v2512_v38, %v341_v37 }
 0x10c   : > { %v3270_v40 = vpop.eup %3269 }
 0x10d   : > { %v342_v41 = vmul.f32 %v3270_v40, %v336_v39  ;;  %v353_v45 = vadd.f32 %v2513_v43, %v347_v42 }
 0x10f   : > { %v348_v44 = vmul.f32 %v2512_v38, %v342_v41 }
 0x111   : > { %v354_v46 = vadd.f32 %v2513_v43, %v348_v44 }
 0x113   : > { %v355_v48 = vpack.c.bf16 %v354_v46, %v353_v45 }
 0x115   : > { %2814 = vmatmul.mubr.bf16.vlgmr.msra.gmra.mxu0 %v355_v48  ;;  %2834 = vmatmul.mubr.bf16.vlgmr.msra.gmra.mxu1 %v355_v48 }
 0x116   : > { %2838 = vmatpush3.bf16.msra.mxu0 %v3187_v47  ;;  %2853 = vmatprep.mubr.msk.bf16.mxu0 %vm3475_vm0, %v3474_v5 }
 0x117   : > { %2839 = vmatprep.subr.bf16.mxu0 %v3474_v5  ;;  %2859 = vmatprep.mubr.msk.bf16.mxu1 %vm3475_vm0, %v3474_v5 }
 0x11a   : > { %2840 = vmatpush3.bf16.msra.mxu0 %v3188_v49  ;;  %v3195_v49 = vld [vmem:[#allocation8 + $0xf8] sm:$0xff]  }
 0x11b   : > { %2841 = vmatprep.subr.bf16.mxu0 %v3474_v5 }
 0x11e   : > { %2842 = vmatpush3.bf16.msra.mxu0 %v3189_v50  ;;  %v3196_v50 = vld [vmem:[#allocation8 + $0xf0] sm:$0xff]  }
 0x11f   : > { %2843 = vmatprep.subr.bf16.mxu0 %v3474_v5 }
 0x122   : > { %2844 = vmatpush3.bf16.msra.mxu0 %v3190_v51  ;;  %v3197_v51 = vld [vmem:[#allocation8 + $0xe8] sm:$0xff]  }
 0x123   : > { %2845 = vmatprep.subr.bf16.mxu0 %v3474_v5 }
 0x126   : > { %2846 = vmatpush3.bf16.msra.mxu0 %v3191_v52  ;;  %v3198_v52 = vld [vmem:[#allocation8 + $0xe0] sm:$0xff]  }
 0x127   : > { %2847 = vmatprep.subr.bf16.mxu0 %v3474_v5 }
 0x12a   : > { %2848 = vmatpush3.bf16.msra.mxu0 %v3192_v53  ;;  %v3199_v53 = vld [vmem:[#allocation8 + $0xd8] sm:$0xff]  }
 0x12b   : > { %2849 = vmatprep.subr.bf16.mxu0 %v3474_v5 }
 0x12e   : > { %2850 = vmatpush3.bf16.msra.mxu0 %v3193_v54 }
 0x12f   : > { %2851 = vmatprep.subr.bf16.mxu0 %v3474_v5 }
 0x132   : > { %2852 = vmatpush3.bf16.msra.mxu0 %v3194_v55 }
 0x133   : > { %2881 = vmatprep.subr.bf16.mxu0 %v3474_v5 }
 0x135   : > { %2854 = vmatmul.mubr.bf16.vlgmr.msra.gmra.mxu0 %v355_v48 }
 0x136   : > { %2897 = vmatprep.mubr.msk.bf16.mxu0 %vm3475_vm0, %v3474_v5  ;;  %2882 = vmatpush3.bf16.msra.mxu0 %v3195_v49 }
 0x137   : > { %2883 = vmatprep.subr.bf16.mxu0 %v3474_v5 }
 0x13a   : > { %2884 = vmatpush3.bf16.msra.mxu0 %v3196_v50 }
 0x13b   : > { %2885 = vmatprep.subr.bf16.mxu0 %v3474_v5 }
 0x13e   : > { %2886 = vmatpush3.bf16.msra.mxu0 %v3197_v51 }
 0x13f   : > { %2887 = vmatprep.subr.bf16.mxu0 %v3474_v5 }
 0x142   : > { %2888 = vmatpush3.bf16.msra.mxu0 %v3198_v52 }
 0x143   : > { %2889 = vmatprep.subr.bf16.mxu0 %v3474_v5 }
 0x146   : > { %2890 = vmatpush3.bf16.msra.mxu0 %v3199_v53 }
 0x147   : > { %2891 = vmatprep.subr.bf16.mxu0 %v3474_v5 }
 0x1d5   : > { %v459_v57 = vpop.f32.mrf.mxu0  ;;  %v578_v58 = vpop.f32.mrf.mxu1 }
 0x1d6   : > { %v579_v59 = vadd.f32 %v2525_v56, %v578_v58  ;;  %v460_v4 = vadd.f32 %v2514_v62, %v459_v57 }
 0x1d7   : > { %v2815_v60 = vpop.f32.mrf.mxu0  ;;  %v2835_v61 = vpop.f32.mrf.mxu1 }
 0x1d8   : > { %v2654_v63 = vpack.c.bf16 %v579_v59, %v579_v59  ;;  %v2652_v9 = vpack.c.bf16 %v460_v4, %v460_v4  ;;  %v3202_v4 = vld [vmem:[#allocation8 + $0xc0] sm:$0xff]  }
 0x1d9   : > { %v462_v2 = vpop.f32.mrf.mxu0  ;;  %v581_v3 = vpop.f32.mrf.mxu1 }
 0x1da   : > { %2858 = vmatpush3.bf16.xpose.msra.mxu1 %v2654_v63  ;;  %v582_v8 = vadd.f32 %v2525_v56, %v581_v3  ;;  %v463_v11 = vadd.f32 %v2514_v62, %v462_v2  ;;  %v3200_v2 = vld [vmem:[#allocation8 + $0xd0] sm:$0xff]   ;;  %v3201_v3 = vld [vmem:[#allocation8 + $0xc8] sm:$0xff]  }
 0x1db   : > { %v2816_v6 = vpop.f32.mrf.mxu0  ;;  %v2836_v7 = vpop.f32.mrf.mxu1  ;;  %2863 = vmatprep.subr.bf16.mxu1 %v3474_v5  ;;  %2892 = vmatpush3.bf16.msra.mxu0 %v3200_v2 }
 0x1dc   : > { %v2655_v10 = vpack.c.bf16 %v582_v8, %v582_v8  ;;  %v2653_v12 = vpack.c.bf16 %v463_v11, %v463_v11  ;;  %2893 = vmatprep.subr.bf16.mxu0 %v3474_v5 }
 0x1df   : > { %2894 = vmatpush3.bf16.msra.mxu0 %v3201_v3 }
 0x1e0   : > { %2895 = vmatprep.subr.bf16.mxu0 %v3474_v5 }
 0x1e1   : > { %2860 = vmatmul.mubr.bf16.vlgmr.msra.gmra.mxu1 %v2652_v9 }
 0x1e2   : > { %2864 = vmatpush3.bf16.xpose.msra.mxu1 %v2655_v10  ;;  %2865 = vmatprep.mubr.msk.bf16.mxu1 %vm3475_vm0, %v3474_v5 }
 0x1e3   : > { %2869 = vmatprep.subr.bf16.mxu1 %v3474_v5  ;;  %2896 = vmatpush3.bf16.msra.mxu0 %v3202_v4 }
 0x1e4   : > { %2921 = vmatprep.subr.bf16.mxu0 %v3474_v5 }
 0x1e9   : > { %2866 = vmatmul.mubr.bf16.vlgmr.msra.gmra.mxu1 %v2653_v12 }
 0x1ea   : > { %2871 = vmatprep.mubr.msk.bf16.mxu1 %vm3475_vm0, %v3474_v5 }
 0x1f5   : > { %v697_v14 = vpop.f32.mrf.mxu0 }
 0x1f6   : > { %v698_v15 = vadd.f32 %v2536_v13, %v697_v14 }
 0x1f7   : > { %v2855_v16 = vpop.f32.mrf.mxu0 }
 0x1f8   : > { %v2656_v17 = vpack.c.bf16 %v698_v15, %v698_v15  ;;  %v2557_v16 = vld [vmem:[#allocation7 + $0xa] ss:$0 sm:$0xff] }
 0x1f9   : > { %v700_v18 = vpop.f32.mrf.mxu0 }
 0x1fa   : > { %v826_v19 = vsel %vm824_vm1, %v2656_v17, 0  ;;  %v3734_v20 = vadd.f32 %v2536_v13, %v700_v18 }
 0x1fb   : > { %v2856_v21 = vpop.f32.mrf.mxu0  ;;  %2870 = vmatpush3.bf16.msra.mxu1 %v826_v19 }
 0x1fc   : > { %2875 = vmatprep.subr.bf16.mxu1 %v3474_v5  ;;  %v2657_v57 = vpack.c.bf16 %v3734_v20, %v3734_v20 }
 0x1fe   : > { %v872_v60 = vsel %vm824_vm1, %v2657_v57, 0  ;;  %v2558_v57 = vld [vmem:[#allocation7 + $0xc] ss:$0 sm:$0xff] }
 0x2a1   : > { %v750_v27 = vpop.f32.mrf.mxu1 }
 0x2a2   : > { %v751_v28 = vadd.f32 %v750_v27, %v3743_v26 }
 0x2a3   : > { %v2861_v29 = vpop.f32.mrf.mxu1 }
 0x2a4   : > { %v797_v30 = vsel %vm796_vm3, %v751_v28, -inf  ;;  %v3205_v29 = vld [vmem:[#allocation8 + $0x128] sm:$0xff]  }
 0x2a5   : > { %798 = vmax.xlane.f32.xlu0 %v797_v30  ;;  %v753_v31 = vpop.f32.mrf.mxu1  ;;  %v3206_v30 = vld [vmem:[#allocation8 + $0x120] sm:$0xff]  }
 0x2a6   : > { %v3207_v31 = vld [vmem:[#allocation8 + $0x118] sm:$0xff]  }
 0x2a7   : > { %v2862_v32 = vpop.f32.mrf.mxu1 }
 0x2a8   : > { %v3208_v32 = vld [vmem:[#allocation8 + $0x110] sm:$0xff]  }
 0x2a9   : > { %v790_v33 = vpop.f32.mrf.mxu1 }
 0x2aa   : > { %v791_v34 = vadd.f32 %v790_v33, %v3743_v26  ;;  %v3209_v33 = vld [vmem:[#allocation8 + $0x108] sm:$0xff]  }
 0x2ab   : > { %v2867_v35 = vpop.f32.mrf.mxu1 }
 0x2ac   : > { %v800_v36 = vsel %vm796_vm3, %v791_v34, -inf  ;;  %v3211_v35 = vld [vmem:[#allocation8 + $0x178] sm:$0xff]  }
 0x2ad   : > { %801 = vmax.xlane.f32.xlu1 %v800_v36  ;;  %v793_v37 = vpop.f32.mrf.mxu1  ;;  %v3212_v36 = vld [vmem:[#allocation8 + $0x170] sm:$0xff]  }
 0x2ae   : > { %v3213_v37 = vld [vmem:[#allocation8 + $0x168] sm:$0xff]  }
 0x2af   : > { %v2868_v38 = vpop.f32.mrf.mxu1 }
 0x2b0   : > { %v3214_v38 = vld [vmem:[#allocation8 + $0x160] sm:$0xff]  }
 0x32e   : > { %v799_v39 = vpop.xlane.xlu0 %798 }
 0x32f   : > { %v803_v40 = vsub.f32 %v751_v28, %v799_v39  ;;  %v3203_v28 = vld [vmem:[#allocation8 + $0x138] sm:$0xff]  }
 0x330   : > { %v3215_v39 = vld [vmem:[#allocation8 + $0x158] sm:$0xff]  }
 0x331   : > { %v805_v41 = vmul.f32 1.442695, %v803_v40 }
 0x333   : > { %3271 = vpow2.f32 %v805_v41 }
 0x336   : > { %v802_v42 = vpop.xlane.xlu1 %801 }
 0x337   : > { %v804_v43 = vsub.f32 %v791_v34, %v802_v42  ;;  %v3210_v34 = vld [vmem:[#allocation8 + $0x100] sm:$0xff]  }
 0x339   : > { %v807_v44 = vmul.f32 1.442695, %v804_v43 }
 0x33b   : > { %3273 = vpow2.f32 %v807_v44 }
 0x340   : > { %v3272_v45 = vpop.eup %3271 }
 0x341   : > { %v809_v46 = vsel %vm796_vm3, %v3272_v45, 0.0 }
 0x342   : > { %810 = vadd.xlane.f32.xlu0 %v809_v46 }
 0x348   : > { %v3274_v47 = vpop.eup %3273 }
 0x349   : > { %v812_v48 = vsel %vm796_vm3, %v3274_v47, 0.0 }
 0x34a   : > { %813 = vadd.xlane.f32.xlu1 %v812_v48 }
 0x3cb   : > { %v811_v54 = vpop.xlane.xlu0 %810 }
 0x3cc   : > { %3275 = vrcp.f32 %v811_v54 }
 0x3d3   : > { %v814_v55 = vpop.xlane.xlu1 %813 }
 0x3d4   : > { %3277 = vrcp.f32 %v814_v55 }
 0x3d9   : > { %v3276_v56 = vpop.eup %3275 }
 0x3da   : > { %v817_v58 = vmul.f32 %v3276_v56, %v3272_v45 }
 0x3dc   : > { %v819_v59 = vpack.c.bf16 %v817_v58, %v817_v58 }
 0x3de   : > { %2872 = vmatmul.mubr.msk.bf16.vlgmr.msra.gmra.mxu1 %vm796_vm3, %v819_v59 }
 0x3df   : > { %2876 = vmatpush3.bf16.msra.mxu1 %v872_v60  ;;  %2877 = vmatprep.mubr.msk.bf16.mxu1 %vm3475_vm0, %v3474_v5 }
 0x3e0   : > { %2901 = vmatprep.subr.bf16.mxu1 %v3474_v5 }
 0x3e1   : > { %v3278_v61 = vpop.eup %3277 }
 0x3e2   : > { %v818_v62 = vmul.f32 %v3278_v61, %v3274_v47 }
 0x3e4   : > { %v820_v63 = vpack.c.bf16 %v818_v62, %v818_v62  ;;  %v2559_v62 = vld [vmem:[#allocation7 + $0xe] ss:$0 sm:$0xff] }
 0x3e6   : > { %2878 = vmatmul.mubr.msk.bf16.vlgmr.msra.gmra.mxu1 %vm796_vm3, %v820_v63 }
 0x3e7   : > { %2917 = vmatprep.mubr.msk.bf16.mxu1 %vm3475_vm0, %v3474_v5  ;;  %2902 = vmatpush3.bf16.msra.mxu1 %v3203_v28 }
 0x3e8   : > { %2903 = vmatprep.subr.bf16.mxu1 %v3474_v5 }
 0x49e   : > { %v862_v6 = vpop.f32.mrf.mxu1 }
 0x4a0   : > { %v2873_v7 = vpop.f32.mrf.mxu1 }
 0x4a1   : > { %v3217_v7 = vld [vmem:[#allocation8 + $0x148] sm:$0xff]  }
 0x4a2   : > { %v865_v8 = vpop.f32.mrf.mxu1 }
 0x4a3   : > { %v3218_v8 = vld [vmem:[#allocation8 + $0x140] sm:$0xff]  }
 0x4a4   : > { %v2874_v9 = vpop.f32.mrf.mxu1 }
 0x4a5   : > { %v2560_v9 = vld [vmem:[#allocation7 + $0x10] ss:$0 sm:$0xff] }
 0x4a6   : > { %v908_v10 = vpop.f32.mrf.mxu1 }
 0x4a7   : > { %v914_v11 = vpack.c.bf16 %v908_v10, %v862_v6  ;;  %v3216_v6 = vld [vmem:[#allocation8 + $0x150] sm:$0xff]  }
 0x4a8   : > { %v2879_v12 = vpop.f32.mrf.mxu1 }
 0x4a9   : > { %2898 = vmatmul.mubr.bf16.vlgmr.msra.gmra.mxu0 %v914_v11 }
 0x4aa   : > { %v911_v13 = vpop.f32.mrf.mxu1  ;;  %2937 = vmatprep.mubr.msk.bf16.mxu0 %vm3475_vm0, %v3474_v5  ;;  %2922 = vmatpush3.bf16.msra.mxu0 %v3211_v35  ;;  %v3223_v35 = vld [vmem:[#allocation8 + $0x1a8] sm:$0xff]  }
 0x4ab   : > { %2923 = vmatprep.subr.bf16.mxu0 %v3474_v5 }
 0x4ac   : > { %v2880_v14 = vpop.f32.mrf.mxu1 }
 0x4ae   : > { %2924 = vmatpush3.bf16.msra.mxu0 %v3212_v36  ;;  %v3224_v36 = vld [vmem:[#allocation8 + $0x1e8] sm:$0xff]  }
 0x4af   : > { %2925 = vmatprep.subr.bf16.mxu0 %v3474_v5 }
 0x4b2   : > { %2926 = vmatpush3.bf16.msra.mxu0 %v3213_v37  ;;  %v3225_v37 = vld [vmem:[#allocation8 + $0x1a0] sm:$0xff]  }
 0x4b3   : > { %2927 = vmatprep.subr.bf16.mxu0 %v3474_v5 }
 0x4b6   : > { %2928 = vmatpush3.bf16.msra.mxu0 %v3214_v38  ;;  %v3226_v38 = vld [vmem:[#allocation8 + $0x1e0] sm:$0xff]  }
 0x4b7   : > { %2929 = vmatprep.subr.bf16.mxu0 %v3474_v5 }
 0x4ba   : > { %2930 = vmatpush3.bf16.msra.mxu0 %v3215_v39  ;;  %v3227_v39 = vld [vmem:[#allocation8 + $0x198] sm:$0xff]  }
 0x4bb   : > { %2931 = vmatprep.subr.bf16.mxu0 %v3474_v5 }
 0x4be   : > { %2932 = vmatpush3.bf16.msra.mxu0 %v3216_v6 }
 0x4bf   : > { %2933 = vmatprep.subr.bf16.mxu0 %v3474_v5 }
 0x4c2   : > { %2934 = vmatpush3.bf16.msra.mxu0 %v3217_v7 }
 0x4c3   : > { %2935 = vmatprep.subr.bf16.mxu0 %v3474_v5 }
 0x4c6   : > { %2936 = vmatpush3.bf16.msra.mxu0 %v3218_v8  ;;  %v2579_v8 = vld [vmem:[#allocation7 + $0x3] ss:$0 sm:$0xff] }
 0x4c7   : > { %2961 = vmatprep.subr.bf16.mxu0 %v3474_v5 }
 0x569   : > { %v1014_v15 = vpop.f32.mrf.mxu0 }
 0x56a   : > { %v1021_v17 = vadd.f32 %v1014_v15, %v3679_v0 }
 0x56b   : > { %v2899_v18 = vpop.f32.mrf.mxu0 }
 0x56c   : > { %v3772_v19 = vadd.f32 %v2557_v16, %v1021_v17 }
 0x56d   : > { %v1017_v20 = vpop.f32.mrf.mxu0 }
 0x56e   : > { %v1022_v21 = vadd.f32 %v1017_v20, %v3681_v1  ;;  %1032 = vadd.xlane.f32.xlu0 %v3772_v19  ;;  %v1038_v27 = vmul.f32 %v3772_v19, %v3772_v19  ;;  %v3204_v1 = vld [vmem:[#allocation8 + $0x130] sm:$0xff]  }
 0x56f   : > { %v2900_v22 = vpop.f32.mrf.mxu0  ;;  %2904 = vmatpush3.bf16.msra.mxu1 %v3204_v1 }
 0x570   : > { %v3776_v25 = vadd.f32 %v2557_v16, %v1022_v21  ;;  %2905 = vmatprep.subr.bf16.mxu1 %v3474_v5  ;;  %v2577_v21 = vld [vmem:[#allocation7 + $0x12] ss:$0 sm:$0xff] }
 0x572   : > { %1040 = vadd.xlane.f32.xlu0 %v1038_v27  ;;  %1034 = vadd.xlane.f32.xlu1 %v3776_v25  ;;  %v1039_v0 = vmul.f32 %v3776_v25, %v3776_v25 }
 0x573   : > { %2906 = vmatpush3.bf16.msra.mxu1 %v3205_v29 }
 0x574   : > { %2907 = vmatprep.subr.bf16.mxu1 %v3474_v5 }
 0x576   : > { %1042 = vadd.xlane.f32.xlu1 %v1039_v0 }
 0x577   : > { %2908 = vmatpush3.bf16.msra.mxu1 %v3206_v30 }
 0x578   : > { %2909 = vmatprep.subr.bf16.mxu1 %v3474_v5 }
 0x57b   : > { %2910 = vmatpush3.bf16.msra.mxu1 %v3207_v31 }
 0x57c   : > { %2911 = vmatprep.subr.bf16.mxu1 %v3474_v5 }
 0x57f   : > { %2912 = vmatpush3.bf16.msra.mxu1 %v3208_v32  ;;  %v3219_v32 = vld [vmem:[#allocation8 + $0x1b8] sm:$0xff]  }
 0x580   : > { %2913 = vmatprep.subr.bf16.mxu1 %v3474_v5 }
 0x583   : > { %2914 = vmatpush3.bf16.msra.mxu1 %v3209_v33  ;;  %v3220_v33 = vld [vmem:[#allocation8 + $0x1f8] sm:$0xff]  }
 0x584   : > { %2915 = vmatprep.subr.bf16.mxu1 %v3474_v5 }
 0x587   : > { %2916 = vmatpush3.bf16.msra.mxu1 %v3210_v34  ;;  %v3222_v34 = vld [vmem:[#allocation8 + $0x1f0] sm:$0xff]  }
 0x588   : > { %2941 = vmatprep.subr.bf16.mxu1 %v3474_v5 }
 0x5f7   : > { %v1033_v40 = vpop.xlane.xlu0 %1032 }
 0x5f8   : > { %v1036_v41 = vmul.f32 0.03125, %v1033_v40  ;;  %v3228_v40 = vld [vmem:[#allocation8 + $0x1d8] sm:$0xff]  }
 0x5fa   : > { %v1046_v44 = vmul.f32 %v1036_v41, %v1036_v41  ;;  %v1050_v54 = vsub.f32 %v3772_v19, %v1036_v41  ;;  %v3229_v41 = vld [vmem:[#allocation8 + $0x190] sm:$0xff]  }
 0x5fb   : > { %v1041_v42 = vpop.xlane.xlu0 %1040  ;;  %v1035_v43 = vpop.xlane.xlu1 %1034 }
 0x5fc   : > { %v1044_v45 = vmul.f32 0.03125, %v1041_v42  ;;  %v1037_v46 = vmul.f32 0.03125, %v1035_v43  ;;  %v3230_v42 = vld [vmem:[#allocation8 + $0x1d0] sm:$0xff]   ;;  %v3231_v43 = vld [vmem:[#allocation8 + $0x188] sm:$0xff]  }
 0x5fe   : > { %v1048_v47 = vsub.f32 %v1044_v45, %v1046_v44  ;;  %v1047_v50 = vmul.f32 %v1037_v46, %v1037_v46  ;;  %v1051_v58 = vsub.f32 %v3776_v25, %v1037_v46  ;;  %v3232_v44 = vld [vmem:[#allocation8 + $0x1c8] sm:$0xff]   ;;  %v3233_v45 = vld [vmem:[#allocation8 + $0x180] sm:$0xff]  }
 0x5ff   : > { %v1043_v48 = vpop.xlane.xlu1 %1042  ;;  %v3234_v46 = vld [vmem:[#allocation8 + $0x1c0] sm:$0xff]  }
 0x600   : > { %v1052_v49 = vadd.f32 1e-05, %v1048_v47  ;;  %v1045_v51 = vmul.f32 0.03125, %v1043_v48 }
 0x602   : > { %3279 = vrsqrt.f32 %v1052_v49  ;;  %v1049_v52 = vsub.f32 %v1045_v51, %v1047_v50 }
 0x604   : > { %v1053_v53 = vadd.f32 1e-05, %v1049_v52 }
 0x606   : > { %3281 = vrsqrt.f32 %v1053_v53 }
 0x60f   : > { %v3280_v55 = vpop.eup %3279 }
 0x610   : > { %v1056_v56 = vmul.f32 %v3280_v55, %v1050_v54 }
 0x612   : > { %v1062_v61 = vmul.f32 %v2558_v57, %v1056_v56 }
 0x613   : > { %v3282_v59 = vpop.eup %3281 }
 0x614   : > { %v1057_v60 = vmul.f32 %v3282_v59, %v1051_v58  ;;  %v1068_v2 = vadd.f32 %v2559_v62, %v1062_v61 }
 0x616   : > { %v1063_v63 = vmul.f32 %v2558_v57, %v1057_v60 }
 0x618   : > { %v1069_v3 = vadd.f32 %v2559_v62, %v1063_v63 }
 0x61a   : > { %v1070_v4 = vpack.c.bf16 %v1069_v3, %v1068_v2  ;;  %v2578_v2 = vld [vmem:[#allocation7 + $0x1] ss:$0 sm:$0xff] }
 0x61c   : > { %2918 = vmatmul.mubr.bf16.vlgmr.msra.gmra.mxu1 %v1070_v4 }
 0x61d   : > { %2957 = vmatprep.mubr.msk.bf16.mxu1 %vm3475_vm0, %v3474_v5  ;;  %2942 = vmatpush3.bf16.msra.mxu1 %v3219_v32 }
 0x61e   : > { %2943 = vmatprep.subr.bf16.mxu1 %v3474_v5 }
 0x6dc   : > { %v1175_v10 = vpop.f32.mrf.mxu1 }
 0x6dd   : > { %v1176_v12 = vadd.f32 %v2560_v9, %v1175_v10 }
 0x6de   : > { %v2919_v11 = vpop.f32.mrf.mxu1 }
 0x6df   : > { %v1182_v16 = vmax.f32 %v1176_v12, 0.0  ;;  %v3235_v12 = vld [vmem:[#allocation8 + $0x238] sm:$0xff]  }
 0x6e0   : > { %v1178_v13 = vpop.f32.mrf.mxu1 }
 0x6e1   : > { %v1179_v14 = vadd.f32 %v2560_v9, %v1178_v13 }
 0x6e2   : > { %v2920_v15 = vpop.f32.mrf.mxu1 }
 0x6e3   : > { %v1183_v17 = vmax.f32 %v1179_v14, 0.0  ;;  %v3236_v14 = vld [vmem:[#allocation8 + $0x230] sm:$0xff]   ;;  %v3237_v15 = vld [vmem:[#allocation8 + $0x228] sm:$0xff]  }
 0x6e5   : > { %v1184_v18 = vpack.c.bf16 %v1183_v17, %v1182_v16  ;;  %v3238_v16 = vld [vmem:[#allocation8 + $0x220] sm:$0xff]   ;;  %v3239_v17 = vld [vmem:[#allocation8 + $0x218] sm:$0xff]  }
 0x6e7   : > { %2938 = vmatmul.mubr.bf16.vlgmr.msra.gmra.mxu0 %v1184_v18  ;;  %v3240_v18 = vld [vmem:[#allocation8 + $0x210] sm:$0xff]  }
 0x6e8   : > { %2977 = vmatprep.mubr.msk.bf16.mxu0 %vm3475_vm0, %v3474_v5  ;;  %2962 = vmatpush3.bf16.msra.mxu0 %v3220_v33 }
 0x6e9   : > { %2963 = vmatprep.subr.bf16.mxu0 %v3474_v5 }
 0x6ec   : > { %2964 = vmatpush3.bf16.msra.mxu0 %v3222_v34 }
 0x6ed   : > { %2965 = vmatprep.subr.bf16.mxu0 %v3474_v5 }
 0x6f0   : > { %2966 = vmatpush3.bf16.msra.mxu0 %v3224_v36 }
 0x6f1   : > { %2967 = vmatprep.subr.bf16.mxu0 %v3474_v5 }
 0x6f4   : > { %2968 = vmatpush3.bf16.msra.mxu0 %v3226_v38 }
 0x6f5   : > { %2969 = vmatprep.subr.bf16.mxu0 %v3474_v5 }
 0x6f8   : > { %2970 = vmatpush3.bf16.msra.mxu0 %v3228_v40 }
 0x6f9   : > { %2971 = vmatprep.subr.bf16.mxu0 %v3474_v5 }
 0x6fc   : > { %2972 = vmatpush3.bf16.msra.mxu0 %v3230_v42  ;;  %v2602_v42 = vld [vmem:[#allocation7 + $0x9] ss:$0 sm:$0xff] }
 0x6fd   : > { %2973 = vmatprep.subr.bf16.mxu0 %v3474_v5 }
 0x700   : > { %2974 = vmatpush3.bf16.msra.mxu0 %v3232_v44 }
 0x701   : > { %2975 = vmatprep.subr.bf16.mxu0 %v3474_v5 }
 0x704   : > { %2976 = vmatpush3.bf16.msra.mxu0 %v3234_v46 }
 0x705   : > { %3025 = vmatprep.subr.bf16.mxu0 %v3474_v5 }
 0x7a7   : > { %v1284_v20 = vpop.f32.mrf.mxu0 }
 0x7a8   : > { %v1291_v22 = vadd.f32 %v1284_v20, %v3772_v19  ;;  %v3241_v20 = vld [vmem:[#allocation8 + $0x208] sm:$0xff]  }
 0x7a9   : > { %v2939_v27 = vpop.f32.mrf.mxu0 }
 0x7aa   : > { %v3806_v0 = vadd.f32 %v2577_v21, %v1291_v22  ;;  %v2591_v22 = vld [vmem:[#allocation7 + $0x7] ss:$0 sm:$0xff] }
 0x7ab   : > { %v1287_v28 = vpop.f32.mrf.mxu0 }
 0x7ac   : > { %v1292_v1 = vadd.f32 %v1287_v28, %v3776_v25  ;;  %1302 = vadd.xlane.f32.xlu0 %v3806_v0  ;;  %v1308_v31 = vmul.f32 %v3806_v0, %v3806_v0  ;;  %v3221_v25 = vld [vmem:[#allocation8 + $0x1b0] sm:$0xff]  }
 0x7ad   : > { %v2940_v29 = vpop.f32.mrf.mxu0  ;;  %2944 = vmatpush3.bf16.msra.mxu1 %v3221_v25 }
 0x7ae   : > { %v3810_v30 = vadd.f32 %v2577_v21, %v1292_v1  ;;  %2945 = vmatprep.subr.bf16.mxu1 %v3474_v5  ;;  %v3242_v21 = vld [vmem:[#allocation8 + $0x200] sm:$0xff]  }
 0x7b0   : > { %1310 = vadd.xlane.f32.xlu0 %v1308_v31  ;;  %1304 = vadd.xlane.f32.xlu1 %v3810_v30  ;;  %v1309_v19 = vmul.f32 %v3810_v30, %v3810_v30 }
 0x7b1   : > { %2946 = vmatpush3.bf16.msra.mxu1 %v3223_v35 }
 0x7b2   : > { %2947 = vmatprep.subr.bf16.mxu1 %v3474_v5 }
 0x7b4   : > { %1312 = vadd.xlane.f32.xlu1 %v1309_v19  ;;  %v2580_v19 = vld [vmem:[#allocation7 + $0x5] ss:$0 sm:$0xff] }
 0x7b5   : > { %2948 = vmatpush3.bf16.msra.mxu1 %v3225_v37 }
 0x7b6   : > { %2949 = vmatprep.subr.bf16.mxu1 %v3474_v5 }
 0x7b9   : > { %2950 = vmatpush3.bf16.msra.mxu1 %v3227_v39 }
 0x7ba   : > { %2951 = vmatprep.subr.bf16.mxu1 %v3474_v5 }
 0x7bd   : > { %2952 = vmatpush3.bf16.msra.mxu1 %v3229_v41 }
 0x7be   : > { %2953 = vmatprep.subr.bf16.mxu1 %v3474_v5 }
 0x7c1   : > { %2954 = vmatpush3.bf16.msra.mxu1 %v3231_v43 }
 0x7c2   : > { %2955 = vmatprep.subr.bf16.mxu1 %v3474_v5 }
 0x7c5   : > { %2956 = vmatpush3.bf16.msra.mxu1 %v3233_v45 }
 0x7c6   : > { %2981 = vmatprep.subr.bf16.mxu1 %v3474_v5 }
 0x835   : > { %v1303_v47 = vpop.xlane.xlu0 %1302 }
 0x836   : > { %v1306_v48 = vmul.f32 0.03125, %v1303_v47 }
 0x838   : > { %v1316_v51 = vmul.f32 %v1306_v48, %v1306_v48  ;;  %v1320_v61 = vsub.f32 %v3806_v0, %v1306_v48 }
 0x839   : > { %v1311_v49 = vpop.xlane.xlu0 %1310  ;;  %v1305_v50 = vpop.xlane.xlu1 %1304 }
 0x83a   : > { %v1314_v52 = vmul.f32 0.03125, %v1311_v49  ;;  %v1307_v53 = vmul.f32 0.03125, %v1305_v50 }
 0x83c   : > { %v1318_v54 = vsub.f32 %v1314_v52, %v1316_v51  ;;  %v1317_v57 = vmul.f32 %v1307_v53, %v1307_v53  ;;  %v1321_v3 = vsub.f32 %v3810_v30, %v1307_v53 }
 0x83d   : > { %v1313_v55 = vpop.xlane.xlu1 %1312 }
 0x83e   : > { %v1322_v56 = vadd.f32 1e-05, %v1318_v54  ;;  %v1315_v58 = vmul.f32 0.03125, %v1313_v55 }
 0x840   : > { %3283 = vrsqrt.f32 %v1322_v56  ;;  %v1319_v59 = vsub.f32 %v1315_v58, %v1317_v57 }
 0x842   : > { %v1323_v60 = vadd.f32 1e-05, %v1319_v59 }
 0x844   : > { %3285 = vrsqrt.f32 %v1323_v60 }
 0x84d   : > { %v3284_v62 = vpop.eup %3283 }
 0x84e   : > { %v1326_v63 = vmul.f32 %v3284_v62, %v1320_v61 }
 0x850   : > { %v1332_v7 = vmul.f32 %v2578_v2, %v1326_v63 }
 0x851   : > { %v3286_v4 = vpop.eup %3285 }
 0x852   : > { %v1327_v6 = vmul.f32 %v3286_v4, %v1321_v3  ;;  %v1338_v10 = vadd.f32 %v2579_v8, %v1332_v7 }
 0x854   : > { %v1333_v9 = vmul.f32 %v2578_v2, %v1327_v6 }
 0x856   : > { %v1339_v11 = vadd.f32 %v2579_v8, %v1333_v9 }
 0x858   : > { %v1340_v13 = vpack.c.bf16 %v1339_v11, %v1338_v10  ;;  %v3243_v11 = vld [vmem:[#allocation8 + $0x278] sm:$0xff]  }
 0x85a   : > { %2958 = vmatmul.mubr.bf16.vlgmr.msra.gmra.mxu1 %v1340_v13  ;;  %2978 = vmatmul.mubr.bf16.vlgmr.msra.gmra.mxu0 %v1340_v13 }
 0x85b   : > { %2982 = vmatpush3.bf16.msra.mxu1 %v3235_v12  ;;  %2997 = vmatprep.mubr.msk.bf16.mxu1 %vm3475_vm0, %v3474_v5  ;;  %v3244_v12 = vld [vmem:[#allocation8 + $0x270] sm:$0xff]  }
 0x85c   : > { %2983 = vmatprep.subr.bf16.mxu1 %v3474_v5  ;;  %3041 = vmatprep.mubr.msk.bf16.mxu0 %vm3475_vm0, %v3474_v5 }
 0x85d   : > { %3026 = vmatpush3.bf16.msra.mxu0 %v3243_v11 }
 0x85e   : > { %3027 = vmatprep.subr.bf16.mxu0 %v3474_v5 }
 0x85f   : > { %2984 = vmatpush3.bf16.msra.mxu1 %v3236_v14  ;;  %v3246_v14 = vld [vmem:[#allocation8 + $0x260] sm:$0xff]  }
 0x860   : > { %2985 = vmatprep.subr.bf16.mxu1 %v3474_v5 }
 0x861   : > { %3028 = vmatpush3.bf16.msra.mxu0 %v3244_v12 }
 0x862   : > { %3029 = vmatprep.subr.bf16.mxu0 %v3474_v5 }
 0x863   : > { %2986 = vmatpush3.bf16.msra.mxu1 %v3237_v15  ;;  %v3247_v15 = vld [vmem:[#allocation8 + $0x258] sm:$0xff]  }
 0x864   : > { %2987 = vmatprep.subr.bf16.mxu1 %v3474_v5 }
 0x867   : > { %2988 = vmatpush3.bf16.msra.mxu1 %v3238_v16 }
 0x868   : > { %2989 = vmatprep.subr.bf16.mxu1 %v3474_v5 }
 0x86b   : > { %2990 = vmatpush3.bf16.msra.mxu1 %v3239_v17 }
 0x86c   : > { %2991 = vmatprep.subr.bf16.mxu1 %v3474_v5 }
 0x86f   : > { %2992 = vmatpush3.bf16.msra.mxu1 %v3240_v18 }
 0x870   : > { %2993 = vmatprep.subr.bf16.mxu1 %v3474_v5 }
 0x873   : > { %2994 = vmatpush3.bf16.msra.mxu1 %v3241_v20 }
 0x874   : > { %2995 = vmatprep.subr.bf16.mxu1 %v3474_v5 }
 0x877   : > { %2996 = vmatpush3.bf16.msra.mxu1 %v3242_v21 }
 0x878   : > { %3001 = vmatprep.subr.bf16.mxu1 %v3474_v5 }
 0x87a   : > { %2998 = vmatmul.mubr.bf16.vlgmr.msra.gmra.mxu1 %v1340_v13  ;;  %v3245_v13 = vld [vmem:[#allocation8 + $0x268] sm:$0xff]  }
 0x87b   : > { %3003 = vmatprep.mubr.msk.bf16.mxu1 %vm3475_vm0, %v3474_v5  ;;  %3030 = vmatpush3.bf16.msra.mxu0 %v3245_v13 }
 0x87c   : > { %3031 = vmatprep.subr.bf16.mxu0 %v3474_v5 }
 0x87f   : > { %3032 = vmatpush3.bf16.msra.mxu0 %v3246_v14 }
 0x880   : > { %3033 = vmatprep.subr.bf16.mxu0 %v3474_v5 }
 0x883   : > { %3034 = vmatpush3.bf16.msra.mxu0 %v3247_v15 }
 0x884   : > { %3035 = vmatprep.subr.bf16.mxu0 %v3474_v5 }
 0x91a   : > { %v1445_v27 = vpop.f32.mrf.mxu1  ;;  %v1564_v28 = vpop.f32.mrf.mxu0 }
 0x91b   : > { %v1565_v1 = vadd.f32 %v2591_v22, %v1564_v28  ;;  %v1446_v34 = vadd.f32 %v2580_v19, %v1445_v27 }
 0x91c   : > { %v2959_v29 = vpop.f32.mrf.mxu1  ;;  %v2979_v31 = vpop.f32.mrf.mxu0 }
 0x91d   : > { %v2660_v32 = vpack.c.bf16 %v1565_v1, %v1565_v1  ;;  %v2658_v38 = vpack.c.bf16 %v1446_v34, %v1446_v34  ;;  %v3248_v31 = vld [vmem:[#allocation8 + $0x250] sm:$0xff]  }
 0x91e   : > { %v1448_v33 = vpop.f32.mrf.mxu1  ;;  %v1567_v25 = vpop.f32.mrf.mxu0  ;;  %3036 = vmatpush3.bf16.msra.mxu0 %v3248_v31 }
 0x91f   : > { %3002 = vmatpush3.bf16.xpose.msra.mxu1 %v2660_v32  ;;  %v1568_v37 = vadd.f32 %v2591_v22, %v1567_v25  ;;  %v1449_v40 = vadd.f32 %v2580_v19, %v1448_v33  ;;  %3037 = vmatprep.subr.bf16.mxu0 %v3474_v5  ;;  %v3249_v19 = vld [vmem:[#allocation8 + $0x248] sm:$0xff]   ;;  %v3250_v32 = vld [vmem:[#allocation8 + $0x240] sm:$0xff]  }
 0x920   : > { %v2960_v35 = vpop.f32.mrf.mxu1  ;;  %v2980_v36 = vpop.f32.mrf.mxu0  ;;  %3007 = vmatprep.subr.bf16.mxu1 %v3474_v5 }
 0x921   : > { %v2661_v39 = vpack.c.bf16 %v1568_v37, %v1568_v37  ;;  %v2659_v41 = vpack.c.bf16 %v1449_v40, %v1449_v40 }
 0x922   : > { %3038 = vmatpush3.bf16.msra.mxu0 %v3249_v19 }
 0x923   : > { %3039 = vmatprep.subr.bf16.mxu0 %v3474_v5 }
 0x926   : > { %3004 = vmatmul.mubr.bf16.vlgmr.msra.gmra.mxu1 %v2658_v38  ;;  %3040 = vmatpush3.bf16.msra.mxu0 %v3250_v32  ;;  %v3264_v32 = vld [vmem:[#allocation8 + $0x2d0] sm:$0xff]  }
 0x927   : > { %3008 = vmatpush3.bf16.xpose.msra.mxu1 %v2661_v39  ;;  %3009 = vmatprep.mubr.msk.bf16.mxu1 %vm3475_vm0, %v3474_v5 }
 0x928   : > { %3013 = vmatprep.subr.bf16.mxu1 %v3474_v5  ;;  %3065 = vmatprep.subr.bf16.mxu0 %v3474_v5 }
 0x92e   : > { %3010 = vmatmul.mubr.bf16.vlgmr.msra.gmra.mxu1 %v2659_v41 }
 0x92f   : > { %3015 = vmatprep.mubr.msk.bf16.mxu1 %vm3475_vm0, %v3474_v5 }
 0x93a   : > { %v1683_v43 = vpop.f32.mrf.mxu1 }
 0x93b   : > { %v1684_v44 = vadd.f32 %v2602_v42, %v1683_v43 }
 0x93c   : > { %v2999_v45 = vpop.f32.mrf.mxu1 }
 0x93d   : > { %v2662_v46 = vpack.c.bf16 %v1684_v44, %v1684_v44 }
 0x93e   : > { %v1686_v47 = vpop.f32.mrf.mxu1 }
 0x93f   : > { %v1804_v48 = vsel %vm824_vm1, %v2662_v46, 0  ;;  %v1687_v49 = vadd.f32 %v2602_v42, %v1686_v47  ;;  %v2623_v42 = vld [vmem:[#allocation7 + $0xb] ss:$0 sm:$0xff] }
 0x940   : > { %v3000_v50 = vpop.f32.mrf.mxu1  ;;  %3014 = vmatpush3.bf16.msra.mxu1 %v1804_v48 }
 0x941   : > { %3019 = vmatprep.subr.bf16.mxu1 %v3474_v5  ;;  %v2663_v20 = vpack.c.bf16 %v1687_v49, %v1687_v49 }
 0x943   : > { %v1850_v27 = vsel %vm824_vm1, %v2663_v20, 0 }
 0x9e6   : > { %v1730_v51 = vpop.f32.mrf.mxu1 }
 0x9e7   : > { %v1731_v52 = vadd.f32 %v1730_v51, %v3743_v26  ;;  %v3251_v51 = vld [vmem:[#allocation8 + $0x2b8] sm:$0xff]  }
 0x9e8   : > { %v3005_v53 = vpop.f32.mrf.mxu1 }
 0x9e9   : > { %v1776_v54 = vsel %vm796_vm3, %v1731_v52, -inf  ;;  %v3254_v53 = vld [vmem:[#allocation8 + $0x2a0] sm:$0xff]  }
 0x9ea   : > { %1777 = vmax.xlane.f32.xlu0 %v1776_v54  ;;  %v1733_v55 = vpop.f32.mrf.mxu1  ;;  %v3255_v54 = vld [vmem:[#allocation8 + $0x298] sm:$0xff]  }
 0x9eb   : > { %v3256_v55 = vld [vmem:[#allocation8 + $0x290] sm:$0xff]  }
 0x9ec   : > { %v3006_v56 = vpop.f32.mrf.mxu1 }
 0x9ed   : > { %v3257_v56 = vld [vmem:[#allocation8 + $0x288] sm:$0xff]  }
 0x9ee   : > { %v1770_v57 = vpop.f32.mrf.mxu1 }
 0x9ef   : > { %v1771_v58 = vadd.f32 %v1770_v57, %v3743_v26  ;;  %v3258_v57 = vld [vmem:[#allocation8 + $0x280] sm:$0xff]  }
 0x9f0   : > { %v3011_v59 = vpop.f32.mrf.mxu1 }
 0x9f1   : > { %v1779_v60 = vsel %vm796_vm3, %v1771_v58, -inf  ;;  %v3260_v59 = vld [vmem:[#allocation8 + $0x2f0] sm:$0xff]  }
 0x9f2   : > { %1780 = vmax.xlane.f32.xlu1 %v1779_v60  ;;  %v1773_v61 = vpop.f32.mrf.mxu1  ;;  %v3261_v60 = vld [vmem:[#allocation8 + $0x2e8] sm:$0xff]  }
 0x9f3   : > { %v3262_v61 = vld [vmem:[#allocation8 + $0x2e0] sm:$0xff]  }
 0x9f4   : > { %v3012_v62 = vpop.f32.mrf.mxu1 }
 0x9f5   : > { %v3263_v62 = vld [vmem:[#allocation8 + $0x2d8] sm:$0xff]  }
 0xa73   : > { %v1778_v63 = vpop.xlane.xlu0 %1777 }
 0xa74   : > { %v1782_v2 = vsub.f32 %v1731_v52, %v1778_v63  ;;  %v3253_v52 = vld [vmem:[#allocation8 + $0x2a8] sm:$0xff]  }
 0xa76   : > { %v1784_v3 = vmul.f32 1.442695, %v1782_v2 }
 0xa78   : > { %3287 = vpow2.f32 %v1784_v3 }
 0xa7b   : > { %v1781_v4 = vpop.xlane.xlu1 %1780 }
 0xa7c   : > { %v1783_v6 = vsub.f32 %v1771_v58, %v1781_v4  ;;  %v3259_v58 = vld [vmem:[#allocation8 + $0x2f8] sm:$0xff]  }
 0xa7e   : > { %v1786_v7 = vmul.f32 1.442695, %v1783_v6 }
 0xa80   : > { %3289 = vpow2.f32 %v1786_v7 }
 0xa85   : > { %v3288_v8 = vpop.eup %3287 }
 0xa86   : > { %v1788_v9 = vsel %vm796_vm3, %v3288_v8, 0.0 }
 0xa87   : > { %1789 = vadd.xlane.f32.xlu0 %v1788_v9 }
 0xa8d   : > { %v3290_v10 = vpop.eup %3289 }
 0xa8e   : > { %v1791_v26 = vsel %vm796_vm3, %v3290_v10, 0.0 }
 0xa8f   : > { %1792 = vadd.xlane.f32.xlu1 %v1791_v26 }
 0xb10   : > { %v1790_v16 = vpop.xlane.xlu0 %1789 }
 0xb11   : > { %3291 = vrcp.f32 %v1790_v16 }
 0xb18   : > { %v1793_v17 = vpop.xlane.xlu1 %1792 }
 0xb19   : > { %3293 = vrcp.f32 %v1793_v17 }
 0xb1e   : > { %v3292_v18 = vpop.eup %3291 }
 0xb1f   : > { %v1796_v21 = vmul.f32 %v3292_v18, %v3288_v8  ;;  %v2624_v18 = vld [vmem:[#allocation7 + $0xd] ss:$0 sm:$0xff] }
 0xb21   : > { %v1798_v22 = vpack.c.bf16 %v1796_v21, %v1796_v21 }
 0xb23   : > { %3016 = vmatmul.mubr.msk.bf16.vlgmr.msra.gmra.mxu1 %vm796_vm3, %v1798_v22 }
 0xb24   : > { %3020 = vmatpush3.bf16.msra.mxu1 %v1850_v27  ;;  %3021 = vmatprep.mubr.msk.bf16.mxu1 %vm3475_vm0, %v3474_v5 }
 0xb25   : > { %3045 = vmatprep.subr.bf16.mxu1 %v3474_v5 }
 0xb26   : > { %v3294_v28 = vpop.eup %3293 }
 0xb27   : > { %v1797_v1 = vmul.f32 %v3294_v28, %v3290_v10  ;;  %v2625_v28 = vld [vmem:[#allocation7 + $0xf] ss:$0 sm:$0xff] }
 0xb29   : > { %v1799_v29 = vpack.c.bf16 %v1797_v1, %v1797_v1 }
 0xb2b   : > { %3022 = vmatmul.mubr.msk.bf16.vlgmr.msra.gmra.mxu1 %vm796_vm3, %v1799_v29 }
 0xb2c   : > { %3061 = vmatprep.mubr.msk.bf16.mxu1 %vm3475_vm0, %v3474_v5  ;;  %3046 = vmatpush3.bf16.msra.mxu1 %v3251_v51 }
 0xb2d   : > { %3047 = vmatprep.subr.bf16.mxu1 %v3474_v5 }
 0xbe3   : > { %v1840_v33 = vpop.f32.mrf.mxu1 }
 0xbe5   : > { %v3017_v25 = vpop.f32.mrf.mxu1 }
 0xbe6   : > { %v3266_v25 = vld [vmem:[#allocation8 + $0x2c0] sm:$0xff]  }
 0xbe7   : > { %v1843_v34 = vpop.f32.mrf.mxu1 }
 0xbe8   : > { %v2626_v34 = vld [vmem:[#allocation7 + $0x11] ss:$0 sm:$0xff] }
 0xbe9   : > { %v3018_v35 = vpop.f32.mrf.mxu1 }
 0xbeb   : > { %v1886_v36 = vpop.f32.mrf.mxu1 }
 0xbec   : > { %v1892_v37 = vpack.c.bf16 %v1886_v36, %v1840_v33  ;;  %v3265_v33 = vld [vmem:[#allocation8 + $0x2c8] sm:$0xff]  }
 0xbed   : > { %v3023_v38 = vpop.f32.mrf.mxu1 }
 0xbee   : > { %3042 = vmatmul.mubr.bf16.vlgmr.msra.gmra.mxu0 %v1892_v37 }
 0xbef   : > { %v1889_v39 = vpop.f32.mrf.mxu1  ;;  %3081 = vmatprep.mubr.msk.bf16.mxu0 %vm3475_vm0, %v3474_v5  ;;  %3066 = vmatpush3.bf16.msra.mxu0 %v3259_v58 }
 0xbf0   : > { %3067 = vmatprep.subr.bf16.mxu0 %v3474_v5 }
 0xbf1   : > { %v3024_v40 = vpop.f32.mrf.mxu1 }
 0xbf3   : > { %3068 = vmatpush3.bf16.msra.mxu0 %v3260_v59 }
 0xbf4   : > { %3069 = vmatprep.subr.bf16.mxu0 %v3474_v5 }
 0xbf7   : > { %3070 = vmatpush3.bf16.msra.mxu0 %v3261_v60 }
 0xbf8   : > { %3071 = vmatprep.subr.bf16.mxu0 %v3474_v5 }
 0xbfb   : > { %3072 = vmatpush3.bf16.msra.mxu0 %v3262_v61 }
 0xbfc   : > { %3073 = vmatprep.subr.bf16.mxu0 %v3474_v5 }
 0xbff   : > { %3074 = vmatpush3.bf16.msra.mxu0 %v3263_v62 }
 0xc00   : > { %3075 = vmatprep.subr.bf16.mxu0 %v3474_v5 }
 0xc03   : > { %3076 = vmatpush3.bf16.msra.mxu0 %v3264_v32 }
 0xc04   : > { %3077 = vmatprep.subr.bf16.mxu0 %v3474_v5 }
 0xc07   : > { %3078 = vmatpush3.bf16.msra.mxu0 %v3265_v33 }
 0xc08   : > { %3079 = vmatprep.subr.bf16.mxu0 %v3474_v5 }
 0xc0b   : > { %3080 = vmatpush3.bf16.msra.mxu0 %v3266_v25  ;;  %v2344_v25 = vsub.s32 %v3739_v24, %v3737_v23 }
 0xcae   : > { %v1992_v41 = vpop.f32.mrf.mxu0 }
 0xcaf   : > { %v1999_v43 = vadd.f32 %v1992_v41, %v3806_v0 }
 0xcb0   : > { %v3043_v44 = vpop.f32.mrf.mxu0 }
 0xcb1   : > { %v3882_v45 = vadd.f32 %v2623_v42, %v1999_v43 }
 0xcb2   : > { %v1995_v46 = vpop.f32.mrf.mxu0 }
 0xcb3   : > { %v2000_v47 = vadd.f32 %v1995_v46, %v3810_v30  ;;  %2010 = vadd.xlane.f32.xlu0 %v3882_v45  ;;  %v2016_v50 = vmul.f32 %v3882_v45, %v3882_v45  ;;  %v3252_v30 = vld [vmem:[#allocation8 + $0x2b0] sm:$0xff]   ;;  %v2643_v46 = vld [vmem:[#allocation7 + $0x13] ss:$0 sm:$0xff] }
 0xcb4   : > { %v3044_v48 = vpop.f32.mrf.mxu0  ;;  %3048 = vmatpush3.bf16.msra.mxu1 %v3252_v30 }
 0xcb5   : > { %v3886_v49 = vadd.f32 %v2623_v42, %v2000_v47  ;;  %3049 = vmatprep.subr.bf16.mxu1 %v3474_v5 }
 0xcb7   : > { %2018 = vadd.xlane.f32.xlu0 %v2016_v50  ;;  %2012 = vadd.xlane.f32.xlu1 %v3886_v49  ;;  %v2017_v0 = vmul.f32 %v3886_v49, %v3886_v49 }
 0xcb8   : > { %3050 = vmatpush3.bf16.msra.mxu1 %v3253_v52 }
 0xcb9   : > { %3051 = vmatprep.subr.bf16.mxu1 %v3474_v5 }
 0xcbb   : > { %2020 = vadd.xlane.f32.xlu1 %v2017_v0 }
 0xcbc   : > { %3052 = vmatpush3.bf16.msra.mxu1 %v3254_v53 }
 0xcbd   : > { %3053 = vmatprep.subr.bf16.mxu1 %v3474_v5 }
 0xcc0   : > { %3054 = vmatpush3.bf16.msra.mxu1 %v3255_v54 }
 0xcc1   : > { %3055 = vmatprep.subr.bf16.mxu1 %v3474_v5 }
 0xcc4   : > { %3056 = vmatpush3.bf16.msra.mxu1 %v3256_v55 }
 0xcc5   : > { %3057 = vmatprep.subr.bf16.mxu1 %v3474_v5 }
 0xcc8   : > { %3058 = vmatpush3.bf16.msra.mxu1 %v3257_v56 }
 0xcc9   : > { %3059 = vmatprep.subr.bf16.mxu1 %v3474_v5 }
 0xccc   : > { %3060 = vmatpush3.bf16.msra.mxu1 %v3258_v57 }
 0xd3c   : > { %v2011_v63 = vpop.xlane.xlu0 %2010 }
 0xd3d   : > { %v2014_v2 = vmul.f32 0.03125, %v2011_v63 }
 0xd3f   : > { %v2024_v6 = vmul.f32 %v2014_v2, %v2014_v2  ;;  %v2028_v15 = vsub.f32 %v3882_v45, %v2014_v2 }
 0xd40   : > { %v2019_v3 = vpop.xlane.xlu0 %2018  ;;  %v2013_v4 = vpop.xlane.xlu1 %2012 }
 0xd41   : > { %v2022_v7 = vmul.f32 0.03125, %v2019_v3  ;;  %v2015_v8 = vmul.f32 0.03125, %v2013_v4 }
 0xd43   : > { %v2026_v9 = vsub.f32 %v2022_v7, %v2024_v6  ;;  %v2025_v11 = vmul.f32 %v2015_v8, %v2015_v8  ;;  %v2029_v20 = vsub.f32 %v3886_v49, %v2015_v8  ;;  %v2644_v7 = vld [vmem:[#allocation7 + $0x14] ss:$0 sm:$0xff] }
 0xd44   : > { %v2021_v10 = vpop.xlane.xlu1 %2020  ;;  %v2665_v8 = vld [vmem:[%s3665_s29] sm:$0xff]  }
 0xd45   : > { %v2030_v26 = vadd.f32 1e-05, %v2026_v9  ;;  %v2023_v12 = vmul.f32 0.03125, %v2021_v10  ;;  %v2645_v10 = vld [vmem:[#allocation7 + $0x15] ss:$0 sm:$0xff] }
 0xd47   : > { %3295 = vrsqrt.f32 %v2030_v26  ;;  %v2027_v13 = vsub.f32 %v2023_v12, %v2025_v11  ;;  %v2666_v12 = vunpack.c.l.bf16 %v2665_v8 }
 0xd49   : > { %v2031_v14 = vadd.f32 1e-05, %v2027_v13 }
 0xd4b   : > { %3297 = vrsqrt.f32 %v2031_v14  ;;  %v2672_v14 = vld [vmem:[%s3665_s29 + $0x8] sm:$0xff]  }
 0xd54   : > { %v3296_v16 = vpop.eup %3295 }
 0xd55   : > { %v2034_v17 = vmul.f32 %v3296_v16, %v2028_v15 }
 0xd57   : > { %v2040_v27 = vmul.f32 %v2624_v18, %v2034_v17 }
 0xd58   : > { %v3298_v21 = vpop.eup %3297 }
 0xd59   : > { %v2035_v22 = vmul.f32 %v3298_v21, %v2029_v20  ;;  %v2046_v29 = vadd.f32 %v2625_v28, %v2040_v27  ;;  %v2667_v21 = vunpack.c.h.bf16 %v2665_v8 }
 0xd5b   : > { %v2041_v1 = vmul.f32 %v2624_v18, %v2035_v22  ;;  %v2670_v18 = vunpack.c.l.bf16 %v2672_v14 }
 0xd5d   : > { %v2047_v31 = vadd.f32 %v2625_v28, %v2041_v1  ;;  %v2671_v1 = vunpack.c.h.bf16 %v2672_v14 }
 0xd5f   : > { %v2048_v19 = vpack.c.bf16 %v2047_v31, %v2046_v29  ;;  %v2346_v31 = vadd.s32 4294967288, %v3739_v24 }
 0xd61   : > { %3062 = vmatmul.mubr.bf16.vlgmr.msra.gmra.mxu1 %v2048_v19  ;;  %v2349_v32 = vsub.s32 %v2346_v31, %v3737_v23 }
 0xe21   : > { %v2153_v35 = vpop.f32.mrf.mxu1 }
 0xe22   : > { %v2154_v37 = vadd.f32 %v2626_v34, %v2153_v35 }
 0xe23   : > { %v3063_v36 = vpop.f32.mrf.mxu1 }
 0xe24   : > { %v2160_v41 = vmax.f32 %v2154_v37, 0.0 }
 0xe25   : > { %v2156_v38 = vpop.f32.mrf.mxu1 }
 0xe26   : > { %v2157_v39 = vadd.f32 %v2626_v34, %v2156_v38 }
 0xe27   : > { %v3064_v40 = vpop.f32.mrf.mxu1 }
 0xe28   : > { %v2161_v42 = vmax.f32 %v2157_v39, 0.0 }
 0xe2a   : > { %v2162_v43 = vpack.c.bf16 %v2161_v42, %v2160_v41 }
 0xe2c   : > { %3082 = vmatmul.mubr.bf16.vlgmr.msra.gmra.mxu0 %v2162_v43 }
 0xeec   : > { %v2262_v44 = vpop.f32.mrf.mxu0 }
 0xeed   : > { %v2269_v47 = vadd.f32 %v2262_v44, %v3882_v45 }
 0xeee   : > { %v3083_v48 = vpop.f32.mrf.mxu0 }
 0xeef   : > { %v2276_v50 = vadd.f32 %v2643_v46, %v2269_v47 }
 0xef0   : > { %v2265_v5 = vpop.f32.mrf.mxu0 }
 0xef1   : > { %v2270_v0 = vadd.f32 %v2265_v5, %v3886_v49  ;;  %2280 = vadd.xlane.f32.xlu0 %v2276_v50  ;;  %v2286_v52 = vmul.f32 %v2276_v50, %v2276_v50 }
 0xef2   : > { %v3084_v51 = vpop.f32.mrf.mxu0 }
 0xef3   : > { %v2277_v30 = vadd.f32 %v2643_v46, %v2270_v0 }
 0xef5   : > { %2288 = vadd.xlane.f32.xlu0 %v2286_v52  ;;  %2282 = vadd.xlane.f32.xlu1 %v2277_v30  ;;  %v2287_v53 = vmul.f32 %v2277_v30, %v2277_v30 }
 0xef9   : > { %2290 = vadd.xlane.f32.xlu1 %v2287_v53 }
 0xf7a   : > { %v2281_v54 = vpop.xlane.xlu0 %2280 }
 0xf7b   : > { %v2284_v55 = vmul.f32 0.03125, %v2281_v54 }
 0xf7d   : > { %v2294_v58 = vmul.f32 %v2284_v55, %v2284_v55  ;;  %v2298_v4 = vsub.f32 %v2276_v50, %v2284_v55 }
 0xf7e   : > { %v2289_v56 = vpop.xlane.xlu0 %2288  ;;  %v2283_v57 = vpop.xlane.xlu1 %2282 }
 0xf7f   : > { %v2292_v45 = vmul.f32 0.03125, %v2289_v56  ;;  %v2285_v59 = vmul.f32 0.03125, %v2283_v57 }
 0xf81   : > { %v2296_v60 = vsub.f32 %v2292_v45, %v2294_v58  ;;  %v2295_v49 = vmul.f32 %v2285_v59, %v2285_v59  ;;  %v2299_v26 = vsub.f32 %v2277_v30, %v2285_v59 }
 0xf82   : > { %v2291_v61 = vpop.xlane.xlu1 %2290 }
 0xf83   : > { %v2300_v62 = vadd.f32 1e-05, %v2296_v60  ;;  %v2293_v63 = vmul.f32 0.03125, %v2291_v61 }
 0xf85   : > { %3299 = vrsqrt.f32 %v2300_v62  ;;  %v2297_v2 = vsub.f32 %v2293_v63, %v2295_v49 }
 0xf87   : > { %v2301_v3 = vadd.f32 1e-05, %v2297_v2 }
 0xf89   : > { %3301 = vrsqrt.f32 %v2301_v3 }
 0xf92   : > { %v3300_v6 = vpop.eup %3299 }
 0xf93   : > { %v2304_v9 = vmul.f32 %v3300_v6, %v2298_v4 }
 0xf95   : > { %v2310_v11 = vmul.f32 %v2644_v7, %v2304_v9 }
 0xf96   : > { %v3302_v13 = vpop.eup %3301 }
 0xf97   : > { %v2316_v15 = vadd.f32 %v2645_v10, %v2310_v11  ;;  %v2305_v16 = vmul.f32 %v3302_v13, %v2299_v26 }
 0xf99   : > { %v2326_v17 = vmul.f32 %v2666_v12, %v2316_v15  ;;  %v2311_v20 = vmul.f32 %v2644_v7, %v2305_v16  ;;  %v2328_v27 = vmul.f32 %v2670_v18, %v2316_v15 }
 0xf9b   : > { %2330 = vadd.xlane.f32.xlu0 %v2326_v17  ;;  %v2317_v22 = vadd.f32 %v2645_v10, %v2311_v20 }
 0xf9d   : > { %v2327_v28 = vmul.f32 %v2667_v21, %v2317_v22  ;;  %v2329_v29 = vmul.f32 %v2671_v1, %v2317_v22 }
 0xf9f   : > { %2334 = vadd.xlane.f32.xlu0 %v2328_v27  ;;  %2332 = vadd.xlane.f32.xlu1 %v2327_v28 }
 0xfa3   : > { %2336 = vadd.xlane.f32.xlu1 %v2329_v29 }
0x1024   : > { %v2331_v19 = vpop.xlane.xlu0 %2330 }
0x1025   : > { %v2345_v37 = vrot.slane %v2331_v19, %v2344_v25 }
0x1028   : > { %v2333_v33 = vpop.xlane.xlu1 %2332  ;;  %v2335_v34 = vpop.xlane.xlu0 %2334 }
0x1029   : > { %v2350_v35 = vrot.slane %v2333_v33, %v2349_v32  ;;  %v2356_v38 = vrot.slane %v2335_v34, %v2344_v25 }
0x102b   : > { %v2352_v40 = vsel %vm2351_vm4, %v2350_v35, %v2345_v37 }
0x102c   : > { %v2337_v36 = vpop.xlane.xlu1 %2336 }
0x102d   : > { %v2360_v39 = vrot.slane %v2337_v36, %v2349_v32 }
0x102f   : > { %v2361_v41 = vsel %vm2351_vm4, %v2360_v39, %v2356_v38 }
0x1030   : > { %v2363_v23 = vsel %vm2362_vm5, %v2361_v41, %v2352_v40 }
0x1031   : > { %2366 = vst.msk [vmem:[%s309_s6] sm:$0x3] %vm2365_vm6, %v2363_v23 }
0x1032   : > { %3394 = shalt.err (!%p3391_p4)
}
0x1033   : > { %s3395_s12 = scalar_lea.hbm %s3922_s9, 32  ;;  %s3399_s25 = scalar_lea.hbm %s3963_s4, 64 }
0x1034   : > { %p3396_p6 = scmp.ne.s32.totalorder %s3922_s9, %s3395_s12  ;;  %p3400_p13 = scmp.lt.s32.totalorder %s3922_s9, %s3963_s4 }
0x1035   : > { %p3401_p11 = scmp.lt.s32.totalorder %s3399_s25, %s3395_s12 }
0x1036   : > { %p3397_p8 = pnand %p3396_p6, %p3979_p10 }
0x1037   : > { %p3402_p2 = por %p3401_p11, %p3400_p13 }
0x1038   : > { %p3398_p5 = pneg %p3397_p8 }
0x103a   : > { %p3403_p0 = pnand %p3402_p2, %p3398_p5 }
0x103c   : > { %3406 = shalt.err (!%p3403_p0)
}
0x103d   : > { %3104 = dma.vmem_to_hbm [thread:$0]  (%p3979_p10), %s2382_s14, 32, %s3922_s9, %s2368_s30  }
0x103e PF: > { %s2393_s26 = sand.u32 1, %s3445_s15   ;;  %p3980_p1 = scmp.ne.s32.totalorder %s3971_s28, 0 }
0x103f   : > { %p3981_p3 = scmp.ge.s32.totalorder %s3457_s18, 2  ;;  %s2394_s5 = scalar_lea.sflag [#allocation4], %s2393_s26 }
0x1041   : > { %p3114_p7 = pnand %p3981_p3, %p3980_p1 }
0x1043   : > { %p3115_p9 = pneg %p3114_p7 }
0x1045   : > { %3440 = dma.done.wait (%p3115_p9), %s2394_s5, 32  }
0x1046   : > { %3442 = vsyncadd (%p3115_p9), %s2394_s5, 4294967264  ;;  %p21_p12 = scmp.ge.s32.totalorder %s3528_s21, 4   ;;  %s3982_s15 = smov %s3449_s16 }
0x1047   : > { %s3983_s16 = smov %s3453_s17  ;;  %s3984_s17 = smov %s3540_s24 }
0x1048   : > { %s3985_s18 = smov %s3528_s21  ;;  %23 = sbr.rel (!%p21_p12) target bundleno = 8 (0x8), region = 118 }
0x104d   :  { %2399 = vsyncpa [#allocation3], 1 }
0x104e   :  { %2401 = vsyncpa [#allocation3 + $0x1], 1 }
0x104f   :  { %2402 = vsyncpa [#allocation6], 1 }
0x1050   :  { %2404 = vsyncpa [#allocation6 + $0x1], 1 }
0x1051   :  { %2405 = vsyncpa [#allocation9], 1 }
0x1052   :  { %2406 = vsyncpa [#allocation4], 1 }
0x1053   :  { %2408 = vsyncpa [#allocation4 + $0x1], 1 }

</bundles_post_ra>
